<compile_context>
chip_gen: v6e
topology: v6e:2x2x1
jax: 0.10.0
libtpu: 0.0.40
codegen_flags: <defaults>
</compile_context>

<pallas_src>
import functools
import math

import numpy as np

import jax
import jax.numpy as jnp
from jax.experimental import pallas as pl
from jax.experimental.pallas import tpu as pltpu  # noqa: F401  (TPU backend)


# ------------------------- trace-time constant builders ---------------------

def _conv_shift_mats(n, h, w):
    """(9, T, T) matrices: (x @ M[tap])[c, t] = x[c, t + dy*w + dx] (0 at edges)."""
    t = n * h * w
    idx = np.arange(t)
    row = (idx // w) % h
    col = idx % w
    mats = []
    for dy in (-1, 0, 1):
        for dx in (-1, 0, 1):
            src = idx + dy * w + dx
            valid = (row + dy >= 0) & (row + dy < h) & (col + dx >= 0) & (col + dx < w)
            m = np.zeros((t, t), np.float32)
            m[src[valid], idx[valid]] = 1.0
            mats.append(m)
    return jnp.asarray(np.stack(mats, axis=0))


def _sample_block_mat(n, s):
    """(T, T): 1 where two tokens belong to the same sample."""
    return jnp.asarray(np.kron(np.eye(n, dtype=np.float32),
                               np.ones((s, s), np.float32)))


def _group_avg_mat(c, g, s):
    """(C, C): block-diagonal 1/(cpg*s) within each GroupNorm group."""
    cpg = c // g
    m = np.kron(np.eye(g, dtype=np.float32), np.ones((cpg, cpg), np.float32))
    return jnp.asarray(m / float(cpg * s))


def _sample_onehot_nt(n, s):
    """(N, T): 1 where token belongs to sample."""
    return jnp.asarray(np.kron(np.eye(n, dtype=np.float32),
                               np.ones((1, s), np.float32)))


# ------------------------------ fused kernel --------------------------------

def _unet_block_kernel(
    x_ref, emb_ref, sh_ref, p_ref, a_in_ref, a_out_ref, bnt_ref,
    n0w_ref, n0b_ref, c0w_ref, c0b_ref,
    affw_ref, affb_ref,
    n1w_ref, n1b_ref, c1w_ref, c1b_ref,
    skw_ref, skb_ref,
    n2w_ref, n2b_ref, qkvw_ref, qkvb_ref, prw_ref, prb_ref,
    o_ref,
    *, eps, skip_scale, num_heads,
):
    f32 = jnp.float32
    x = x_ref[...]                       # (Cin, T), channel-major input
    P = p_ref[...]                       # (T, T) same-sample block matrix

    def silu(v):
        # numerically-stable SiLU: v * sigmoid(v) = v * 0.5 * (1 + tanh(v/2))
        return v * (0.5 * (1.0 + jnp.tanh(0.5 * v)))

    def group_norm(v, a_ref, gw_ref, gb_ref):
        a = a_ref[...]                   # (C, C) group-average (incl. 1/count)
        mean = jnp.dot(a, jnp.dot(v, P, preferred_element_type=f32),
                       preferred_element_type=f32)
        d = v - mean
        var = jnp.dot(a, jnp.dot(d * d, P, preferred_element_type=f32),
                      preferred_element_type=f32)
        return d * jax.lax.rsqrt(var + eps) * gw_ref[...] + gb_ref[...]

    def conv3x3(v, w9_ref, b_ref):
        # 9 taps via constant shift/mask matmuls, then ONE big-K MXU matmul.
        taps = [jnp.dot(v, sh_ref[k], preferred_element_type=f32)
                for k in range(9)]
        xk = jnp.concatenate(taps, axis=0)                  # (9*Cin, T)
        return jnp.dot(w9_ref[...], xk, preferred_element_type=f32) + b_ref[...]

    # ---- main branch: conv0(silu(norm0(x))) ----
    h = conv3x3(silu(group_norm(x, a_in_ref, n0w_ref, n0b_ref)),
                c0w_ref, c0b_ref)                           # (Cout, T)
    cout = h.shape[0]

    # ---- adaptive scale/shift from the embedding ----
    params = jnp.dot(affw_ref[...], emb_ref[...],
                     preferred_element_type=f32) + affb_ref[...]   # (2*Cout, N)
    bnt = bnt_ref[...]                                      # (N, T)
    scale = jnp.dot(params[:cout, :], bnt, preferred_element_type=f32)
    shift = jnp.dot(params[cout:, :], bnt, preferred_element_type=f32)
    h = silu(shift + group_norm(h, a_out_ref, n1w_ref, n1b_ref) * (scale + 1.0))

    # ---- conv1 (dropout p=0 -> identity) + fused 1x1 skip epilogue ----
    h = conv3x3(h, c1w_ref, c1b_ref)
    sk = jnp.dot(skw_ref[...], x, preferred_element_type=f32) + skb_ref[...]
    xr = (h + sk) * skip_scale                              # (Cout, T)

    # ---- attention: qkv 1x1 -> block-diag softmax per head -> proj 1x1 ----
    h2 = group_norm(xr, a_out_ref, n2w_ref, n2b_ref)
    qkv = jnp.dot(qkvw_ref[...], h2, preferred_element_type=f32) + qkvb_ref[...]
    q_all = qkv[0:cout, :]        # rows = head*cph + ch; 1/sqrt(cph) folded in K
    k_all = qkv[cout:2 * cout, :]
    v_all = qkv[2 * cout:3 * cout, :]
    cph = cout // num_heads
    neg = jnp.float32(-1e30)
    head_out = []
    for hd in range(num_heads):
        r0, r1 = hd * cph, (hd + 1) * cph
        qh, kh, vh = q_all[r0:r1, :], k_all[r0:r1, :], v_all[r0:r1, :]
        s = jax.lax.dot_general(qh, kh, (((0,), (0,)), ((), ())),
                                preferred_element_type=f32)          # (T, T)
        s = jnp.where(P > 0.5, s, neg)            # mask cross-sample pairs
        s = s - jnp.max(s, axis=-1, keepdims=True)
        pr = jnp.exp(s)
        pr = pr * pl.reciprocal(jnp.sum(pr, axis=-1, keepdims=True), approx=True)
        head_out.append(jax.lax.dot_general(vh, pr, (((1,), (1,)), ((), ())),
                                            preferred_element_type=f32))  # (cph, T)
    a_cm = jnp.concatenate(head_out, axis=0)                # (Cout, T)
    proj = jnp.dot(prw_ref[...], a_cm, preferred_element_type=f32) + prb_ref[...]
    o_ref[...] = (proj + xr) * skip_scale


# ------------------------------ forward wrapper ------------------------------

def unet_block_forward(x_nchw, emb, p, *, num_heads, skip_scale, eps=1e-5):
    n, cin, hh, ww = x_nchw.shape
    cout = p["conv0_w"].shape[0]
    s = hh * ww
    t = n * s
    g_in = min(32, cin // 4)      # EDM GroupNorm: min(32, C // 4) groups
    g_out = min(32, cout // 4)
    cph = cout // num_heads

    # channel-major activations: tokens (sample-major, then y, x) on lanes
    x_cm = jnp.transpose(x_nchw, (1, 0, 2, 3)).reshape(cin, t)
    emb_t = jnp.transpose(emb, (1, 0))                       # (Emb, N)

    # trace-time constants
    sh = _conv_shift_mats(n, hh, ww)                         # (9, T, T)
    p_blk = _sample_block_mat(n, s)                          # (T, T)
    a_in = _group_avg_mat(cin, g_in, s)                      # (Cin, Cin)
    a_out = _group_avg_mat(cout, g_out, s)                   # (Cout, Cout)
    bnt = _sample_onehot_nt(n, s)                            # (N, T)

    col = lambda v: v.reshape(-1, 1)
    conv0_w9 = jnp.transpose(p["conv0_w"], (0, 2, 3, 1)).reshape(cout, 9 * cin)
    conv1_w9 = jnp.transpose(p["conv1_w"], (0, 2, 3, 1)).reshape(cout, 9 * cout)
    skip_w = p["skip_w"][:, :, 0, 0]                         # (Cout, Cin)
    proj_w = p["proj_w"][:, :, 0, 0]                         # (Cout, Cout)
    # qkv rows: PyTorch channel order is (head, ch_in_head, qkv); regroup to
    # (qkv, head, ch_in_head) and fold the 1/sqrt(cph) attention scale into K.
    qkv_w = jnp.transpose(p["qkv_w"][:, :, 0, 0].reshape(num_heads, cph, 3, cout),
                          (2, 0, 1, 3)).reshape(3 * cout, cout)
    qkv_b = jnp.transpose(p["qkv_b"].reshape(num_heads, cph, 3),
                          (2, 0, 1)).reshape(3 * cout)
    kscale = jnp.concatenate([jnp.ones((cout,), jnp.float32),
                              jnp.full((cout,), 1.0 / math.sqrt(cph), jnp.float32),
                              jnp.ones((cout,), jnp.float32)])
    qkv_w = qkv_w * kscale[:, None]
    qkv_b = qkv_b * kscale

    kernel = functools.partial(_unet_block_kernel, eps=eps,
                               skip_scale=skip_scale, num_heads=num_heads)
    out_cm = pl.pallas_call(
        kernel,
        out_shape=jax.ShapeDtypeStruct((cout, t), jnp.float32),
    )(x_cm, emb_t, sh, p_blk, a_in, a_out, bnt,
      col(p["norm0_w"]), col(p["norm0_b"]), conv0_w9, col(p["conv0_b"]),
      p["affine_w"], col(p["affine_b"]),
      col(p["norm1_w"]), col(p["norm1_b"]), conv1_w9, col(p["conv1_b"]),
      skip_w, col(p["skip_b"]),
      col(p["norm2_w"]), col(p["norm2_b"]), qkv_w, col(qkv_b),
      proj_w, col(p["proj_b"]))

    return jnp.transpose(out_cm.reshape(cout, n, hh, ww), (1, 0, 2, 3))  # NCHW


# ----------------------------------- main ------------------------------------

if __name__ == "__main__":
    N, Cin, Cout, Emb, H, W = 2, 8, 16, 32, 8, 8
    heads = 2
    skip_scale = 1.0 / math.sqrt(2.0)

    key = jax.random.PRNGKey(0)
    ks = jax.random.split(key, 20)

    def rn(k, shape, scale=1.0):
        return scale * jax.random.normal(k, shape, jnp.float32)

    params = {
        "norm0_w": 1.0 + 0.1 * rn(ks[0], (Cin,)),
        "norm0_b": 0.1 * rn(ks[1], (Cin,)),
        "conv0_w": rn(ks[2], (Cout, Cin, 3, 3), 1.0 / math.sqrt(Cin * 9)),
        "conv0_b": 0.1 * rn(ks[3], (Cout,)),
        "affine_w": rn(ks[4], (2 * Cout, Emb), 1.0 / math.sqrt(Emb)),
        "affine_b": 0.1 * rn(ks[5], (2 * Cout,)),
        "norm1_w": 1.0 + 0.1 * rn(ks[6], (Cout,)),
        "norm1_b": 0.1 * rn(ks[7], (Cout,)),
        # conv1 / proj use init_zero in the module; small random values here so
        # the synthetic test actually exercises those paths.
        "conv1_w": rn(ks[8], (Cout, Cout, 3, 3), 1.0 / math.sqrt(Cout * 9)),
        "conv1_b": 0.1 * rn(ks[9], (Cout,)),
        "skip_w": rn(ks[10], (Cout, Cin, 1, 1), 1.0 / math.sqrt(Cin)),
        "skip_b": 0.1 * rn(ks[11], (Cout,)),
        "norm2_w": 1.0 + 0.1 * rn(ks[12], (Cout,)),
        "norm2_b": 0.1 * rn(ks[13], (Cout,)),
        "qkv_w": rn(ks[14], (3 * Cout, Cout, 1, 1), 1.0 / math.sqrt(Cout)),
        "qkv_b": 0.1 * rn(ks[15], (3 * Cout,)),
        "proj_w": rn(ks[16], (Cout, Cout, 1, 1), 1.0 / math.sqrt(Cout)),
        "proj_b": 0.1 * rn(ks[17], (Cout,)),
    }

    x = rn(ks[18], (N, Cin, H, W))      # NCHW, like the PyTorch module
    emb = rn(ks[19], (N, Emb))

    fwd = jax.jit(functools.partial(unet_block_forward,
                                    num_heads=heads, skip_scale=skip_scale))
    out = fwd(x, emb, params)
    jax.block_until_ready(out)
    assert out.shape == (N, Cout, H, W) and out.dtype == jnp.float32
    assert bool(jnp.all(jnp.isfinite(out)))
    print("KERNEL_OK")
</pallas_src>

<mosaic_0001>
module attributes {stable_mosaic.version = 11 : i64} {
  func.func @_unet_block_kernel(%arg0: memref<8x128xf32, #tpu.memory_space<vmem>>, %arg1: memref<32x2xf32, #tpu.memory_space<vmem>>, %arg2: memref<9x128x128xf32, #tpu.memory_space<vmem>>, %arg3: memref<128x128xf32, #tpu.memory_space<vmem>>, %arg4: memref<8x8xf32, #tpu.memory_space<vmem>>, %arg5: memref<16x16xf32, #tpu.memory_space<vmem>>, %arg6: memref<2x128xf32, #tpu.memory_space<vmem>>, %arg7: memref<8x1xf32, #tpu.memory_space<vmem>>, %arg8: memref<8x1xf32, #tpu.memory_space<vmem>>, %arg9: memref<16x72xf32, #tpu.memory_space<vmem>>, %arg10: memref<16x1xf32, #tpu.memory_space<vmem>>, %arg11: memref<32x32xf32, #tpu.memory_space<vmem>>, %arg12: memref<32x1xf32, #tpu.memory_space<vmem>>, %arg13: memref<16x1xf32, #tpu.memory_space<vmem>>, %arg14: memref<16x1xf32, #tpu.memory_space<vmem>>, %arg15: memref<16x144xf32, #tpu.memory_space<vmem>>, %arg16: memref<16x1xf32, #tpu.memory_space<vmem>>, %arg17: memref<16x8xf32, #tpu.memory_space<vmem>>, %arg18: memref<16x1xf32, #tpu.memory_space<vmem>>, %arg19: memref<16x1xf32, #tpu.memory_space<vmem>>, %arg20: memref<16x1xf32, #tpu.memory_space<vmem>>, %arg21: memref<48x16xf32, #tpu.memory_space<vmem>>, %arg22: memref<48x1xf32, #tpu.memory_space<vmem>>, %arg23: memref<16x16xf32, #tpu.memory_space<vmem>>, %arg24: memref<16x1xf32, #tpu.memory_space<vmem>>, %arg25: memref<16x128xf32, #tpu.memory_space<vmem>>) attributes {dimension_semantics = [], scalar_prefetch = 0 : i64, scratch_operands = 0 : i64, tpu.core_type = #tpu.core_type<tc>} {
    %c0 = arith.constant 0 : index
    %c0_0 = arith.constant 0 : index
    %0 = vector.load %arg0[%c0, %c0_0] : memref<8x128xf32, #tpu.memory_space<vmem>>, vector<8x128xf32>
    %c0_1 = arith.constant 0 : index
    %c0_2 = arith.constant 0 : index
    %1 = vector.load %arg3[%c0_1, %c0_2] : memref<128x128xf32, #tpu.memory_space<vmem>>, vector<128x128xf32>
    %c0_3 = arith.constant 0 : index
    %c0_4 = arith.constant 0 : index
    %2 = vector.load %arg4[%c0_3, %c0_4] : memref<8x8xf32, #tpu.memory_space<vmem>>, vector<8x8xf32>
    %cst = arith.constant dense<0.000000e+00> : vector<8x128xf32>
    %3 = tpu.matmul %0, %1, %cst {dimension_numbers = #tpu.dot_dimension_numbers<[1], [0], [0], [1], [0, 0, 1, 1], [], []>} : vector<8x128xf32>, vector<128x128xf32>, vector<8x128xf32> -> vector<8x128xf32>
    %cst_5 = arith.constant dense<0.000000e+00> : vector<8x128xf32>
    %4 = tpu.matmul %2, %3, %cst_5 {dimension_numbers = #tpu.dot_dimension_numbers<[1], [0], [0], [1], [0, 0, 1, 1], [], []>} : vector<8x8xf32>, vector<8x128xf32>, vector<8x128xf32> -> vector<8x128xf32>
    %5 = arith.subf %0, %4 : vector<8x128xf32>
    %6 = arith.mulf %5, %5 : vector<8x128xf32>
    %cst_6 = arith.constant dense<0.000000e+00> : vector<8x128xf32>
    %7 = tpu.matmul %6, %1, %cst_6 {dimension_numbers = #tpu.dot_dimension_numbers<[1], [0], [0], [1], [0, 0, 1, 1], [], []>} : vector<8x128xf32>, vector<128x128xf32>, vector<8x128xf32> -> vector<8x128xf32>
    %cst_7 = arith.constant dense<0.000000e+00> : vector<8x128xf32>
    %8 = tpu.matmul %2, %7, %cst_7 {dimension_numbers = #tpu.dot_dimension_numbers<[1], [0], [0], [1], [0, 0, 1, 1], [], []>} : vector<8x8xf32>, vector<8x128xf32>, vector<8x128xf32> -> vector<8x128xf32>
    %cst_8 = arith.constant 9.99999974E-6 : f32
    %9 = vector.broadcast %cst_8 : f32 to vector<8x128xf32>
    %10 = arith.addf %8, %9 : vector<8x128xf32>
    %11 = math.rsqrt %10 : vector<8x128xf32>
    %12 = arith.mulf %5, %11 : vector<8x128xf32>
    %c0_9 = arith.constant 0 : index
    %c0_10 = arith.constant 0 : index
    %13 = vector.load %arg7[%c0_9, %c0_10] : memref<8x1xf32, #tpu.memory_space<vmem>>, vector<8x1xf32>
    %14 = vector.broadcast %13 : vector<8x1xf32> to vector<8x128xf32>
    %15 = arith.mulf %12, %14 : vector<8x128xf32>
    %c0_11 = arith.constant 0 : index
    %c0_12 = arith.constant 0 : index
    %16 = vector.load %arg8[%c0_11, %c0_12] : memref<8x1xf32, #tpu.memory_space<vmem>>, vector<8x1xf32>
    %17 = vector.broadcast %16 : vector<8x1xf32> to vector<8x128xf32>
    %18 = arith.addf %15, %17 : vector<8x128xf32>
    %cst_13 = arith.constant 5.000000e-01 : f32
    %19 = vector.broadcast %cst_13 : f32 to vector<8x128xf32>
    %20 = arith.mulf %19, %18 : vector<8x128xf32>
    %21 = math.tanh %20 : vector<8x128xf32>
    %cst_14 = arith.constant 1.000000e+00 : f32
    %22 = vector.broadcast %cst_14 : f32 to vector<8x128xf32>
    %23 = arith.addf %22, %21 : vector<8x128xf32>
    %cst_15 = arith.constant 5.000000e-01 : f32
    %24 = vector.broadcast %cst_15 : f32 to vector<8x128xf32>
    %25 = arith.mulf %24, %23 : vector<8x128xf32>
    %26 = arith.mulf %18, %25 : vector<8x128xf32>
    %c0_16 = arith.constant 0 : index
    %c0_17 = arith.constant 0 : index
    %c0_18 = arith.constant 0 : index
    %27 = vector.load %arg2[%c0_16, %c0_17, %c0_18] : memref<9x128x128xf32, #tpu.memory_space<vmem>>, vector<1x128x128xf32>
    %28 = vector.shape_cast %27 : vector<1x128x128xf32> to vector<128x128xf32>
    %cst_19 = arith.constant dense<0.000000e+00> : vector<8x128xf32>
    %29 = tpu.matmul %26, %28, %cst_19 {dimension_numbers = #tpu.dot_dimension_numbers<[1], [0], [0], [1], [0, 0, 1, 1], [], []>} : vector<8x128xf32>, vector<128x128xf32>, vector<8x128xf32> -> vector<8x128xf32>
    %c1 = arith.constant 1 : index
    %c0_20 = arith.constant 0 : index
    %c0_21 = arith.constant 0 : index
    %30 = vector.load %arg2[%c1, %c0_20, %c0_21] : memref<9x128x128xf32, #tpu.memory_space<vmem>>, vector<1x128x128xf32>
    %31 = vector.shape_cast %30 : vector<1x128x128xf32> to vector<128x128xf32>
    %cst_22 = arith.constant dense<0.000000e+00> : vector<8x128xf32>
    %32 = tpu.matmul %26, %31, %cst_22 {dimension_numbers = #tpu.dot_dimension_numbers<[1], [0], [0], [1], [0, 0, 1, 1], [], []>} : vector<8x128xf32>, vector<128x128xf32>, vector<8x128xf32> -> vector<8x128xf32>
    %c2 = arith.constant 2 : index
    %c0_23 = arith.constant 0 : index
    %c0_24 = arith.constant 0 : index
    %33 = vector.load %arg2[%c2, %c0_23, %c0_24] : memref<9x128x128xf32, #tpu.memory_space<vmem>>, vector<1x128x128xf32>
    %34 = vector.shape_cast %33 : vector<1x128x128xf32> to vector<128x128xf32>
    %cst_25 = arith.constant dense<0.000000e+00> : vector<8x128xf32>
    %35 = tpu.matmul %26, %34, %cst_25 {dimension_numbers = #tpu.dot_dimension_numbers<[1], [0], [0], [1], [0, 0, 1, 1], [], []>} : vector<8x128xf32>, vector<128x128xf32>, vector<8x128xf32> -> vector<8x128xf32>
    %c3 = arith.constant 3 : index
    %c0_26 = arith.constant 0 : index
    %c0_27 = arith.constant 0 : index
    %36 = vector.load %arg2[%c3, %c0_26, %c0_27] : memref<9x128x128xf32, #tpu.memory_space<vmem>>, vector<1x128x128xf32>
    %37 = vector.shape_cast %36 : vector<1x128x128xf32> to vector<128x128xf32>
    %cst_28 = arith.constant dense<0.000000e+00> : vector<8x128xf32>
    %38 = tpu.matmul %26, %37, %cst_28 {dimension_numbers = #tpu.dot_dimension_numbers<[1], [0], [0], [1], [0, 0, 1, 1], [], []>} : vector<8x128xf32>, vector<128x128xf32>, vector<8x128xf32> -> vector<8x128xf32>
    %c4 = arith.constant 4 : index
    %c0_29 = arith.constant 0 : index
    %c0_30 = arith.constant 0 : index
    %39 = vector.load %arg2[%c4, %c0_29, %c0_30] : memref<9x128x128xf32, #tpu.memory_space<vmem>>, vector<1x128x128xf32>
    %40 = vector.shape_cast %39 : vector<1x128x128xf32> to vector<128x128xf32>
    %cst_31 = arith.constant dense<0.000000e+00> : vector<8x128xf32>
    %41 = tpu.matmul %26, %40, %cst_31 {dimension_numbers = #tpu.dot_dimension_numbers<[1], [0], [0], [1], [0, 0, 1, 1], [], []>} : vector<8x128xf32>, vector<128x128xf32>, vector<8x128xf32> -> vector<8x128xf32>
    %c5 = arith.constant 5 : index
    %c0_32 = arith.constant 0 : index
    %c0_33 = arith.constant 0 : index
    %42 = vector.load %arg2[%c5, %c0_32, %c0_33] : memref<9x128x128xf32, #tpu.memory_space<vmem>>, vector<1x128x128xf32>
    %43 = vector.shape_cast %42 : vector<1x128x128xf32> to vector<128x128xf32>
    %cst_34 = arith.constant dense<0.000000e+00> : vector<8x128xf32>
    %44 = tpu.matmul %26, %43, %cst_34 {dimension_numbers = #tpu.dot_dimension_numbers<[1], [0], [0], [1], [0, 0, 1, 1], [], []>} : vector<8x128xf32>, vector<128x128xf32>, vector<8x128xf32> -> vector<8x128xf32>
    %c6 = arith.constant 6 : index
    %c0_35 = arith.constant 0 : index
    %c0_36 = arith.constant 0 : index
    %45 = vector.load %arg2[%c6, %c0_35, %c0_36] : memref<9x128x128xf32, #tpu.memory_space<vmem>>, vector<1x128x128xf32>
    %46 = vector.shape_cast %45 : vector<1x128x128xf32> to vector<128x128xf32>
    %cst_37 = arith.constant dense<0.000000e+00> : vector<8x128xf32>
    %47 = tpu.matmul %26, %46, %cst_37 {dimension_numbers = #tpu.dot_dimension_numbers<[1], [0], [0], [1], [0, 0, 1, 1], [], []>} : vector<8x128xf32>, vector<128x128xf32>, vector<8x128xf32> -> vector<8x128xf32>
    %c7 = arith.constant 7 : index
    %c0_38 = arith.constant 0 : index
    %c0_39 = arith.constant 0 : index
    %48 = vector.load %arg2[%c7, %c0_38, %c0_39] : memref<9x128x128xf32, #tpu.memory_space<vmem>>, vector<1x128x128xf32>
    %49 = vector.shape_cast %48 : vector<1x128x128xf32> to vector<128x128xf32>
    %cst_40 = arith.constant dense<0.000000e+00> : vector<8x128xf32>
    %50 = tpu.matmul %26, %49, %cst_40 {dimension_numbers = #tpu.dot_dimension_numbers<[1], [0], [0], [1], [0, 0, 1, 1], [], []>} : vector<8x128xf32>, vector<128x128xf32>, vector<8x128xf32> -> vector<8x128xf32>
    %c8 = arith.constant 8 : index
    %c0_41 = arith.constant 0 : index
    %c0_42 = arith.constant 0 : index
    %51 = vector.load %arg2[%c8, %c0_41, %c0_42] : memref<9x128x128xf32, #tpu.memory_space<vmem>>, vector<1x128x128xf32>
    %52 = vector.shape_cast %51 : vector<1x128x128xf32> to vector<128x128xf32>
    %cst_43 = arith.constant dense<0.000000e+00> : vector<8x128xf32>
    %53 = tpu.matmul %26, %52, %cst_43 {dimension_numbers = #tpu.dot_dimension_numbers<[1], [0], [0], [1], [0, 0, 1, 1], [], []>} : vector<8x128xf32>, vector<128x128xf32>, vector<8x128xf32> -> vector<8x128xf32>
    %54 = tpu.concatenate %29, %32, %35, %38, %41, %44, %47, %50, %53 in 0 : vector<8x128xf32>, vector<8x128xf32>, vector<8x128xf32>, vector<8x128xf32>, vector<8x128xf32>, vector<8x128xf32>, vector<8x128xf32>, vector<8x128xf32>, vector<8x128xf32> -> vector<72x128xf32>
    %c0_44 = arith.constant 0 : index
    %c0_45 = arith.constant 0 : index
    %55 = vector.load %arg9[%c0_44, %c0_45] : memref<16x72xf32, #tpu.memory_space<vmem>>, vector<16x72xf32>
    %cst_46 = arith.constant dense<0.000000e+00> : vector<16x128xf32>
    %56 = tpu.matmul %55, %54, %cst_46 {dimension_numbers = #tpu.dot_dimension_numbers<[1], [0], [0], [1], [0, 0, 1, 1], [], []>} : vector<16x72xf32>, vector<72x128xf32>, vector<16x128xf32> -> vector<16x128xf32>
    %c0_47 = arith.constant 0 : index
    %c0_48 = arith.constant 0 : index
    %57 = vector.load %arg10[%c0_47, %c0_48] : memref<16x1xf32, #tpu.memory_space<vmem>>, vector<16x1xf32>
    %58 = vector.broadcast %57 : vector<16x1xf32> to vector<16x128xf32>
    %59 = arith.addf %56, %58 : vector<16x128xf32>
    %c0_49 = arith.constant 0 : index
    %c0_50 = arith.constant 0 : index
    %60 = vector.load %arg11[%c0_49, %c0_50] : memref<32x32xf32, #tpu.memory_space<vmem>>, vector<32x32xf32>
    %c0_51 = arith.constant 0 : index
    %c0_52 = arith.constant 0 : index
    %61 = vector.load %arg1[%c0_51, %c0_52] : memref<32x2xf32, #tpu.memory_space<vmem>>, vector<32x2xf32>
    %cst_53 = arith.constant dense<0.000000e+00> : vector<32x2xf32>
    %62 = tpu.matmul %60, %61, %cst_53 {dimension_numbers = #tpu.dot_dimension_numbers<[1], [0], [0], [1], [0, 0, 1, 1], [], []>} : vector<32x32xf32>, vector<32x2xf32>, vector<32x2xf32> -> vector<32x2xf32>
    %c0_54 = arith.constant 0 : index
    %c0_55 = arith.constant 0 : index
    %63 = vector.load %arg12[%c0_54, %c0_55] : memref<32x1xf32, #tpu.memory_space<vmem>>, vector<32x1xf32>
    %64 = vector.broadcast %63 : vector<32x1xf32> to vector<32x2xf32>
    %65 = arith.addf %62, %64 : vector<32x2xf32>
    %c0_56 = arith.constant 0 : index
    %c0_57 = arith.constant 0 : index
    %66 = vector.load %arg6[%c0_56, %c0_57] : memref<2x128xf32, #tpu.memory_space<vmem>>, vector<2x128xf32>
    %67 = vector.extract_strided_slice %65 {offsets = [0, 0], sizes = [16, 2], strides = [1, 1]} : vector<32x2xf32> to vector<16x2xf32>
    %cst_58 = arith.constant dense<0.000000e+00> : vector<16x128xf32>
    %68 = tpu.matmul %67, %66, %cst_58 {dimension_numbers = #tpu.dot_dimension_numbers<[1], [0], [0], [1], [0, 0, 1, 1], [], []>} : vector<16x2xf32>, vector<2x128xf32>, vector<16x128xf32> -> vector<16x128xf32>
    %69 = vector.extract_strided_slice %65 {offsets = [16, 0], sizes = [16, 2], strides = [1, 1]} : vector<32x2xf32> to vector<16x2xf32>
    %cst_59 = arith.constant dense<0.000000e+00> : vector<16x128xf32>
    %70 = tpu.matmul %69, %66, %cst_59 {dimension_numbers = #tpu.dot_dimension_numbers<[1], [0], [0], [1], [0, 0, 1, 1], [], []>} : vector<16x2xf32>, vector<2x128xf32>, vector<16x128xf32> -> vector<16x128xf32>
    %c0_60 = arith.constant 0 : index
    %c0_61 = arith.constant 0 : index
    %71 = vector.load %arg5[%c0_60, %c0_61] : memref<16x16xf32, #tpu.memory_space<vmem>>, vector<16x16xf32>
    %cst_62 = arith.constant dense<0.000000e+00> : vector<16x128xf32>
    %72 = tpu.matmul %59, %1, %cst_62 {dimension_numbers = #tpu.dot_dimension_numbers<[1], [0], [0], [1], [0, 0, 1, 1], [], []>} : vector<16x128xf32>, vector<128x128xf32>, vector<16x128xf32> -> vector<16x128xf32>
    %cst_63 = arith.constant dense<0.000000e+00> : vector<16x128xf32>
    %73 = tpu.matmul %71, %72, %cst_63 {dimension_numbers = #tpu.dot_dimension_numbers<[1], [0], [0], [1], [0, 0, 1, 1], [], []>} : vector<16x16xf32>, vector<16x128xf32>, vector<16x128xf32> -> vector<16x128xf32>
    %74 = arith.subf %59, %73 : vector<16x128xf32>
    %75 = arith.mulf %74, %74 : vector<16x128xf32>
    %cst_64 = arith.constant dense<0.000000e+00> : vector<16x128xf32>
    %76 = tpu.matmul %75, %1, %cst_64 {dimension_numbers = #tpu.dot_dimension_numbers<[1], [0], [0], [1], [0, 0, 1, 1], [], []>} : vector<16x128xf32>, vector<128x128xf32>, vector<16x128xf32> -> vector<16x128xf32>
    %cst_65 = arith.constant dense<0.000000e+00> : vector<16x128xf32>
    %77 = tpu.matmul %71, %76, %cst_65 {dimension_numbers = #tpu.dot_dimension_numbers<[1], [0], [0], [1], [0, 0, 1, 1], [], []>} : vector<16x16xf32>, vector<16x128xf32>, vector<16x128xf32> -> vector<16x128xf32>
    %cst_66 = arith.constant 9.99999974E-6 : f32
    %78 = vector.broadcast %cst_66 : f32 to vector<16x128xf32>
    %79 = arith.addf %77, %78 : vector<16x128xf32>
    %80 = math.rsqrt %79 : vector<16x128xf32>
    %81 = arith.mulf %74, %80 : vector<16x128xf32>
    %c0_67 = arith.constant 0 : index
    %c0_68 = arith.constant 0 : index
    %82 = vector.load %arg13[%c0_67, %c0_68] : memref<16x1xf32, #tpu.memory_space<vmem>>, vector<16x1xf32>
    %83 = vector.broadcast %82 : vector<16x1xf32> to vector<16x128xf32>
    %84 = arith.mulf %81, %83 : vector<16x128xf32>
    %c0_69 = arith.constant 0 : index
    %c0_70 = arith.constant 0 : index
    %85 = vector.load %arg14[%c0_69, %c0_70] : memref<16x1xf32, #tpu.memory_space<vmem>>, vector<16x1xf32>
    %86 = vector.broadcast %85 : vector<16x1xf32> to vector<16x128xf32>
    %87 = arith.addf %84, %86 : vector<16x128xf32>
    %cst_71 = arith.constant 1.000000e+00 : f32
    %88 = vector.broadcast %cst_71 : f32 to vector<16x128xf32>
    %89 = arith.addf %68, %88 : vector<16x128xf32>
    %90 = arith.mulf %87, %89 : vector<16x128xf32>
    %91 = arith.addf %70, %90 : vector<16x128xf32>
    %cst_72 = arith.constant 5.000000e-01 : f32
    %92 = vector.broadcast %cst_72 : f32 to vector<16x128xf32>
    %93 = arith.mulf %92, %91 : vector<16x128xf32>
    %94 = math.tanh %93 : vector<16x128xf32>
    %cst_73 = arith.constant 1.000000e+00 : f32
    %95 = vector.broadcast %cst_73 : f32 to vector<16x128xf32>
    %96 = arith.addf %95, %94 : vector<16x128xf32>
    %cst_74 = arith.constant 5.000000e-01 : f32
    %97 = vector.broadcast %cst_74 : f32 to vector<16x128xf32>
    %98 = arith.mulf %97, %96 : vector<16x128xf32>
    %99 = arith.mulf %91, %98 : vector<16x128xf32>
    %c0_75 = arith.constant 0 : index
    %c0_76 = arith.constant 0 : index
    %c0_77 = arith.constant 0 : index
    %100 = vector.load %arg2[%c0_75, %c0_76, %c0_77] : memref<9x128x128xf32, #tpu.memory_space<vmem>>, vector<1x128x128xf32>
    %101 = vector.shape_cast %100 : vector<1x128x128xf32> to vector<128x128xf32>
    %cst_78 = arith.constant dense<0.000000e+00> : vector<16x128xf32>
    %102 = tpu.matmul %99, %101, %cst_78 {dimension_numbers = #tpu.dot_dimension_numbers<[1], [0], [0], [1], [0, 0, 1, 1], [], []>} : vector<16x128xf32>, vector<128x128xf32>, vector<16x128xf32> -> vector<16x128xf32>
    %c1_79 = arith.constant 1 : index
    %c0_80 = arith.constant 0 : index
    %c0_81 = arith.constant 0 : index
    %103 = vector.load %arg2[%c1_79, %c0_80, %c0_81] : memref<9x128x128xf32, #tpu.memory_space<vmem>>, vector<1x128x128xf32>
    %104 = vector.shape_cast %103 : vector<1x128x128xf32> to vector<128x128xf32>
    %cst_82 = arith.constant dense<0.000000e+00> : vector<16x128xf32>
    %105 = tpu.matmul %99, %104, %cst_82 {dimension_numbers = #tpu.dot_dimension_numbers<[1], [0], [0], [1], [0, 0, 1, 1], [], []>} : vector<16x128xf32>, vector<128x128xf32>, vector<16x128xf32> -> vector<16x128xf32>
    %c2_83 = arith.constant 2 : index
    %c0_84 = arith.constant 0 : index
    %c0_85 = arith.constant 0 : index
    %106 = vector.load %arg2[%c2_83, %c0_84, %c0_85] : memref<9x128x128xf32, #tpu.memory_space<vmem>>, vector<1x128x128xf32>
    %107 = vector.shape_cast %106 : vector<1x128x128xf32> to vector<128x128xf32>
    %cst_86 = arith.constant dense<0.000000e+00> : vector<16x128xf32>
    %108 = tpu.matmul %99, %107, %cst_86 {dimension_numbers = #tpu.dot_dimension_numbers<[1], [0], [0], [1], [0, 0, 1, 1], [], []>} : vector<16x128xf32>, vector<128x128xf32>, vector<16x128xf32> -> vector<16x128xf32>
    %c3_87 = arith.constant 3 : index
    %c0_88 = arith.constant 0 : index
    %c0_89 = arith.constant 0 : index
    %109 = vector.load %arg2[%c3_87, %c0_88, %c0_89] : memref<9x128x128xf32, #tpu.memory_space<vmem>>, vector<1x128x128xf32>
    %110 = vector.shape_cast %109 : vector<1x128x128xf32> to vector<128x128xf32>
    %cst_90 = arith.constant dense<0.000000e+00> : vector<16x128xf32>
    %111 = tpu.matmul %99, %110, %cst_90 {dimension_numbers = #tpu.dot_dimension_numbers<[1], [0], [0], [1], [0, 0, 1, 1], [], []>} : vector<16x128xf32>, vector<128x128xf32>, vector<16x128xf32> -> vector<16x128xf32>
    %c4_91 = arith.constant 4 : index
    %c0_92 = arith.constant 0 : index
    %c0_93 = arith.constant 0 : index
    %112 = vector.load %arg2[%c4_91, %c0_92, %c0_93] : memref<9x128x128xf32, #tpu.memory_space<vmem>>, vector<1x128x128xf32>
    %113 = vector.shape_cast %112 : vector<1x128x128xf32> to vector<128x128xf32>
    %cst_94 = arith.constant dense<0.000000e+00> : vector<16x128xf32>
    %114 = tpu.matmul %99, %113, %cst_94 {dimension_numbers = #tpu.dot_dimension_numbers<[1], [0], [0], [1], [0, 0, 1, 1], [], []>} : vector<16x128xf32>, vector<128x128xf32>, vector<16x128xf32> -> vector<16x128xf32>
    %c5_95 = arith.constant 5 : index
    %c0_96 = arith.constant 0 : index
    %c0_97 = arith.constant 0 : index
    %115 = vector.load %arg2[%c5_95, %c0_96, %c0_97] : memref<9x128x128xf32, #tpu.memory_space<vmem>>, vector<1x128x128xf32>
    %116 = vector.shape_cast %115 : vector<1x128x128xf32> to vector<128x128xf32>
    %cst_98 = arith.constant dense<0.000000e+00> : vector<16x128xf32>
    %117 = tpu.matmul %99, %116, %cst_98 {dimension_numbers = #tpu.dot_dimension_numbers<[1], [0], [0], [1], [0, 0, 1, 1], [], []>} : vector<16x128xf32>, vector<128x128xf32>, vector<16x128xf32> -> vector<16x128xf32>
    %c6_99 = arith.constant 6 : index
    %c0_100 = arith.constant 0 : index
    %c0_101 = arith.constant 0 : index
    %118 = vector.load %arg2[%c6_99, %c0_100, %c0_101] : memref<9x128x128xf32, #tpu.memory_space<vmem>>, vector<1x128x128xf32>
    %119 = vector.shape_cast %118 : vector<1x128x128xf32> to vector<128x128xf32>
    %cst_102 = arith.constant dense<0.000000e+00> : vector<16x128xf32>
    %120 = tpu.matmul %99, %119, %cst_102 {dimension_numbers = #tpu.dot_dimension_numbers<[1], [0], [0], [1], [0, 0, 1, 1], [], []>} : vector<16x128xf32>, vector<128x128xf32>, vector<16x128xf32> -> vector<16x128xf32>
    %c7_103 = arith.constant 7 : index
    %c0_104 = arith.constant 0 : index
    %c0_105 = arith.constant 0 : index
    %121 = vector.load %arg2[%c7_103, %c0_104, %c0_105] : memref<9x128x128xf32, #tpu.memory_space<vmem>>, vector<1x128x128xf32>
    %122 = vector.shape_cast %121 : vector<1x128x128xf32> to vector<128x128xf32>
    %cst_106 = arith.constant dense<0.000000e+00> : vector<16x128xf32>
    %123 = tpu.matmul %99, %122, %cst_106 {dimension_numbers = #tpu.dot_dimension_numbers<[1], [0], [0], [1], [0, 0, 1, 1], [], []>} : vector<16x128xf32>, vector<128x128xf32>, vector<16x128xf32> -> vector<16x128xf32>
    %c8_107 = arith.constant 8 : index
    %c0_108 = arith.constant 0 : index
    %c0_109 = arith.constant 0 : index
    %124 = vector.load %arg2[%c8_107, %c0_108, %c0_109] : memref<9x128x128xf32, #tpu.memory_space<vmem>>, vector<1x128x128xf32>
    %125 = vector.shape_cast %124 : vector<1x128x128xf32> to vector<128x128xf32>
    %cst_110 = arith.constant dense<0.000000e+00> : vector<16x128xf32>
    %126 = tpu.matmul %99, %125, %cst_110 {dimension_numbers = #tpu.dot_dimension_numbers<[1], [0], [0], [1], [0, 0, 1, 1], [], []>} : vector<16x128xf32>, vector<128x128xf32>, vector<16x128xf32> -> vector<16x128xf32>
    %127 = tpu.concatenate %102, %105, %108, %111, %114, %117, %120, %123, %126 in 0 : vector<16x128xf32>, vector<16x128xf32>, vector<16x128xf32>, vector<16x128xf32>, vector<16x128xf32>, vector<16x128xf32>, vector<16x128xf32>, vector<16x128xf32>, vector<16x128xf32> -> vector<144x128xf32>
    %c0_111 = arith.constant 0 : index
    %c0_112 = arith.constant 0 : index
    %128 = vector.load %arg15[%c0_111, %c0_112] : memref<16x144xf32, #tpu.memory_space<vmem>>, vector<16x144xf32>
    %cst_113 = arith.constant dense<0.000000e+00> : vector<16x128xf32>
    %129 = tpu.matmul %128, %127, %cst_113 {dimension_numbers = #tpu.dot_dimension_numbers<[1], [0], [0], [1], [0, 0, 1, 1], [], []>} : vector<16x144xf32>, vector<144x128xf32>, vector<16x128xf32> -> vector<16x128xf32>
    %c0_114 = arith.constant 0 : index
    %c0_115 = arith.constant 0 : index
    %130 = vector.load %arg16[%c0_114, %c0_115] : memref<16x1xf32, #tpu.memory_space<vmem>>, vector<16x1xf32>
    %131 = vector.broadcast %130 : vector<16x1xf32> to vector<16x128xf32>
    %132 = arith.addf %129, %131 : vector<16x128xf32>
    %c0_116 = arith.constant 0 : index
    %c0_117 = arith.constant 0 : index
    %133 = vector.load %arg17[%c0_116, %c0_117] : memref<16x8xf32, #tpu.memory_space<vmem>>, vector<16x8xf32>
    %cst_118 = arith.constant dense<0.000000e+00> : vector<16x128xf32>
    %134 = tpu.matmul %133, %0, %cst_118 {dimension_numbers = #tpu.dot_dimension_numbers<[1], [0], [0], [1], [0, 0, 1, 1], [], []>} : vector<16x8xf32>, vector<8x128xf32>, vector<16x128xf32> -> vector<16x128xf32>
    %c0_119 = arith.constant 0 : index
    %c0_120 = arith.constant 0 : index
    %135 = vector.load %arg18[%c0_119, %c0_120] : memref<16x1xf32, #tpu.memory_space<vmem>>, vector<16x1xf32>
    %136 = vector.broadcast %135 : vector<16x1xf32> to vector<16x128xf32>
    %137 = arith.addf %134, %136 : vector<16x128xf32>
    %138 = arith.addf %132, %137 : vector<16x128xf32>
    %cst_121 = arith.constant 0.707106769 : f32
    %139 = vector.broadcast %cst_121 : f32 to vector<16x128xf32>
    %140 = arith.mulf %138, %139 : vector<16x128xf32>
    %c0_122 = arith.constant 0 : index
    %c0_123 = arith.constant 0 : index
    %141 = vector.load %arg5[%c0_122, %c0_123] : memref<16x16xf32, #tpu.memory_space<vmem>>, vector<16x16xf32>
    %cst_124 = arith.constant dense<0.000000e+00> : vector<16x128xf32>
    %142 = tpu.matmul %140, %1, %cst_124 {dimension_numbers = #tpu.dot_dimension_numbers<[1], [0], [0], [1], [0, 0, 1, 1], [], []>} : vector<16x128xf32>, vector<128x128xf32>, vector<16x128xf32> -> vector<16x128xf32>
    %cst_125 = arith.constant dense<0.000000e+00> : vector<16x128xf32>
    %143 = tpu.matmul %141, %142, %cst_125 {dimension_numbers = #tpu.dot_dimension_numbers<[1], [0], [0], [1], [0, 0, 1, 1], [], []>} : vector<16x16xf32>, vector<16x128xf32>, vector<16x128xf32> -> vector<16x128xf32>
    %144 = arith.subf %140, %143 : vector<16x128xf32>
    %145 = arith.mulf %144, %144 : vector<16x128xf32>
    %cst_126 = arith.constant dense<0.000000e+00> : vector<16x128xf32>
    %146 = tpu.matmul %145, %1, %cst_126 {dimension_numbers = #tpu.dot_dimension_numbers<[1], [0], [0], [1], [0, 0, 1, 1], [], []>} : vector<16x128xf32>, vector<128x128xf32>, vector<16x128xf32> -> vector<16x128xf32>
    %cst_127 = arith.constant dense<0.000000e+00> : vector<16x128xf32>
    %147 = tpu.matmul %141, %146, %cst_127 {dimension_numbers = #tpu.dot_dimension_numbers<[1], [0], [0], [1], [0, 0, 1, 1], [], []>} : vector<16x16xf32>, vector<16x128xf32>, vector<16x128xf32> -> vector<16x128xf32>
    %cst_128 = arith.constant 9.99999974E-6 : f32
    %148 = vector.broadcast %cst_128 : f32 to vector<16x128xf32>
    %149 = arith.addf %147, %148 : vector<16x128xf32>
    %150 = math.rsqrt %149 : vector<16x128xf32>
    %151 = arith.mulf %144, %150 : vector<16x128xf32>
    %c0_129 = arith.constant 0 : index
    %c0_130 = arith.constant 0 : index
    %152 = vector.load %arg19[%c0_129, %c0_130] : memref<16x1xf32, #tpu.memory_space<vmem>>, vector<16x1xf32>
    %153 = vector.broadcast %152 : vector<16x1xf32> to vector<16x128xf32>
    %154 = arith.mulf %151, %153 : vector<16x128xf32>
    %c0_131 = arith.constant 0 : index
    %c0_132 = arith.constant 0 : index
    %155 = vector.load %arg20[%c0_131, %c0_132] : memref<16x1xf32, #tpu.memory_space<vmem>>, vector<16x1xf32>
    %156 = vector.broadcast %155 : vector<16x1xf32> to vector<16x128xf32>
    %157 = arith.addf %154, %156 : vector<16x128xf32>
    %c0_133 = arith.constant 0 : index
    %c0_134 = arith.constant 0 : index
    %158 = vector.load %arg21[%c0_133, %c0_134] : memref<48x16xf32, #tpu.memory_space<vmem>>, vector<48x16xf32>
    %cst_135 = arith.constant dense<0.000000e+00> : vector<48x128xf32>
    %159 = tpu.matmul %158, %157, %cst_135 {dimension_numbers = #tpu.dot_dimension_numbers<[1], [0], [0], [1], [0, 0, 1, 1], [], []>} : vector<48x16xf32>, vector<16x128xf32>, vector<48x128xf32> -> vector<48x128xf32>
    %c0_136 = arith.constant 0 : index
    %c0_137 = arith.constant 0 : index
    %160 = vector.load %arg22[%c0_136, %c0_137] : memref<48x1xf32, #tpu.memory_space<vmem>>, vector<48x1xf32>
    %161 = vector.broadcast %160 : vector<48x1xf32> to vector<48x128xf32>
    %162 = arith.addf %159, %161 : vector<48x128xf32>
    %163 = vector.extract_strided_slice %162 {offsets = [0, 0], sizes = [16, 128], strides = [1, 1]} : vector<48x128xf32> to vector<16x128xf32>
    %164 = vector.extract_strided_slice %162 {offsets = [16, 0], sizes = [16, 128], strides = [1, 1]} : vector<48x128xf32> to vector<16x128xf32>
    %165 = vector.extract_strided_slice %162 {offsets = [32, 0], sizes = [16, 128], strides = [1, 1]} : vector<48x128xf32> to vector<16x128xf32>
    %166 = vector.extract_strided_slice %163 {offsets = [0, 0], sizes = [8, 128], strides = [1, 1]} : vector<16x128xf32> to vector<8x128xf32>
    %167 = vector.extract_strided_slice %164 {offsets = [0, 0], sizes = [8, 128], strides = [1, 1]} : vector<16x128xf32> to vector<8x128xf32>
    %168 = vector.extract_strided_slice %165 {offsets = [0, 0], sizes = [8, 128], strides = [1, 1]} : vector<16x128xf32> to vector<8x128xf32>
    %cst_138 = arith.constant dense<0.000000e+00> : vector<128x128xf32>
    %169 = tpu.matmul %166, %167, %cst_138 {dimension_numbers = #tpu.dot_dimension_numbers<[0], [0], [1], [1], [0, 1, 1, 1], [], []>} : vector<8x128xf32>, vector<8x128xf32>, vector<128x128xf32> -> vector<128x128xf32>
    %cst_139 = arith.constant 5.000000e-01 : f32
    %170 = vector.broadcast %cst_139 : f32 to vector<128x128xf32>
    %171 = arith.cmpf ogt, %1, %170 : vector<128x128xf32>
    %cst_140 = arith.constant -1.000000e+30 : f32
    %172 = vector.broadcast %cst_140 : f32 to vector<128x128xf32>
    %173 = arith.select %171, %169, %172 : vector<128x128xi1>, vector<128x128xf32>
    %cst_141 = arith.constant dense<0xFF800000> : vector<128xf32>
    %174 = vector.multi_reduction <maximumf>, %173, %cst_141 [1] : vector<128x128xf32> to vector<128xf32>
    %175 = vector.shape_cast %174 : vector<128xf32> to vector<128x1xf32>
    %176 = vector.broadcast %175 : vector<128x1xf32> to vector<128x128xf32>
    %177 = arith.subf %173, %176 : vector<128x128xf32>
    %178 = math.exp %177 : vector<128x128xf32>
    %cst_142 = arith.constant dense<0.000000e+00> : vector<128xf32>
    %179 = vector.multi_reduction <add>, %178, %cst_142 [1] : vector<128x128xf32> to vector<128xf32>
    %180 = vector.shape_cast %179 : vector<128xf32> to vector<128x1xf32>
    %181 = tpu.reciprocal %180 {approx = true} : vector<128x1xf32> -> vector<128x1xf32>
    %182 = vector.broadcast %181 : vector<128x1xf32> to vector<128x128xf32>
    %183 = arith.mulf %178, %182 : vector<128x128xf32>
    %cst_143 = arith.constant dense<0.000000e+00> : vector<8x128xf32>
    %184 = tpu.matmul %168, %183, %cst_143 {dimension_numbers = #tpu.dot_dimension_numbers<[1], [1], [0], [0], [0, 0, 1, 0], [], []>} : vector<8x128xf32>, vector<128x128xf32>, vector<8x128xf32> -> vector<8x128xf32>
    %185 = vector.extract_strided_slice %163 {offsets = [8, 0], sizes = [8, 128], strides = [1, 1]} : vector<16x128xf32> to vector<8x128xf32>
    %186 = vector.extract_strided_slice %164 {offsets = [8, 0], sizes = [8, 128], strides = [1, 1]} : vector<16x128xf32> to vector<8x128xf32>
    %187 = vector.extract_strided_slice %165 {offsets = [8, 0], sizes = [8, 128], strides = [1, 1]} : vector<16x128xf32> to vector<8x128xf32>
    %cst_144 = arith.constant dense<0.000000e+00> : vector<128x128xf32>
    %188 = tpu.matmul %185, %186, %cst_144 {dimension_numbers = #tpu.dot_dimension_numbers<[0], [0], [1], [1], [0, 1, 1, 1], [], []>} : vector<8x128xf32>, vector<8x128xf32>, vector<128x128xf32> -> vector<128x128xf32>
    %cst_145 = arith.constant 5.000000e-01 : f32
    %189 = vector.broadcast %cst_145 : f32 to vector<128x128xf32>
    %190 = arith.cmpf ogt, %1, %189 : vector<128x128xf32>
    %cst_146 = arith.constant -1.000000e+30 : f32
    %191 = vector.broadcast %cst_146 : f32 to vector<128x128xf32>
    %192 = arith.select %190, %188, %191 : vector<128x128xi1>, vector<128x128xf32>
    %cst_147 = arith.constant dense<0xFF800000> : vector<128xf32>
    %193 = vector.multi_reduction <maximumf>, %192, %cst_147 [1] : vector<128x128xf32> to vector<128xf32>
    %194 = vector.shape_cast %193 : vector<128xf32> to vector<128x1xf32>
    %195 = vector.broadcast %194 : vector<128x1xf32> to vector<128x128xf32>
    %196 = arith.subf %192, %195 : vector<128x128xf32>
    %197 = math.exp %196 : vector<128x128xf32>
    %cst_148 = arith.constant dense<0.000000e+00> : vector<128xf32>
    %198 = vector.multi_reduction <add>, %197, %cst_148 [1] : vector<128x128xf32> to vector<128xf32>
    %199 = vector.shape_cast %198 : vector<128xf32> to vector<128x1xf32>
    %200 = tpu.reciprocal %199 {approx = true} : vector<128x1xf32> -> vector<128x1xf32>
    %201 = vector.broadcast %200 : vector<128x1xf32> to vector<128x128xf32>
    %202 = arith.mulf %197, %201 : vector<128x128xf32>
    %cst_149 = arith.constant dense<0.000000e+00> : vector<8x128xf32>
    %203 = tpu.matmul %187, %202, %cst_149 {dimension_numbers = #tpu.dot_dimension_numbers<[1], [1], [0], [0], [0, 0, 1, 0], [], []>} : vector<8x128xf32>, vector<128x128xf32>, vector<8x128xf32> -> vector<8x128xf32>
    %204 = tpu.concatenate %184, %203 in 0 : vector<8x128xf32>, vector<8x128xf32> -> vector<16x128xf32>
    %c0_150 = arith.constant 0 : index
    %c0_151 = arith.constant 0 : index
    %205 = vector.load %arg23[%c0_150, %c0_151] : memref<16x16xf32, #tpu.memory_space<vmem>>, vector<16x16xf32>
    %cst_152 = arith.constant dense<0.000000e+00> : vector<16x128xf32>
    %206 = tpu.matmul %205, %204, %cst_152 {dimension_numbers = #tpu.dot_dimension_numbers<[1], [0], [0], [1], [0, 0, 1, 1], [], []>} : vector<16x16xf32>, vector<16x128xf32>, vector<16x128xf32> -> vector<16x128xf32>
    %c0_153 = arith.constant 0 : index
    %c0_154 = arith.constant 0 : index
    %207 = vector.load %arg24[%c0_153, %c0_154] : memref<16x1xf32, #tpu.memory_space<vmem>>, vector<16x1xf32>
    %208 = vector.broadcast %207 : vector<16x1xf32> to vector<16x128xf32>
    %209 = arith.addf %206, %208 : vector<16x128xf32>
    %210 = arith.addf %209, %140 : vector<16x128xf32>
    %cst_155 = arith.constant 0.707106769 : f32
    %211 = vector.broadcast %cst_155 : f32 to vector<16x128xf32>
    %212 = arith.mulf %210, %211 : vector<16x128xf32>
    %c0_156 = arith.constant 0 : index
    %c0_157 = arith.constant 0 : index
    %213 = vector.load %arg25[%c0_156, %c0_157] : memref<16x128xf32, #tpu.memory_space<vmem>>, vector<16x128xf32>
    tpu.vector_store %arg25[%c0_156, %c0_157], %212 {strides = array<i32>} : memref<16x128xf32, #tpu.memory_space<vmem>>, vector<16x128xf32>,
    return
  }
}

</mosaic_0001>

<bundles_post_ra>
// kernel: squeeze.5
= control target key start
LH: loop header
LB: loop body
LE: loop exit
PB: predicated region body
PF: predicated region fallthrough
CT: control target
= control target key end

     0   :  { %vm3_vm0 = vcmask 130048   ;;  %s300_s0 = inlined_call_operand.vmem [shape: f32[48,16,1,1], index: 0, kind: input, shape index: {}]   ;;  %s301_s1 = inlined_call_operand.vmem [shape: f32[2,8,3,16], index: 1, kind: output, shape index: {}]  }
   0x1   :  { %v2_v0 = vld [vmem:[%s300_s0] sm:$0xff]   ;;  %v184_v1 = vld [vmem:[%s300_s0 + $0x8] sm:$0xff]   ;;  %v185_v2 = vld [vmem:[%s300_s0 + $0x10] sm:$0xff]  }
   0x2   :  { %4 = vst.msk [vmem:[#allocation0] sm:$0x7] %vm3_vm0, %v2_v0   ;;  %6 = vst.msk [vmem:[#allocation0 + $0x5] sm:$0x38] %vm3_vm0, %v2_v0   ;;  %v186_v3 = vld [vmem:[%s300_s0 + $0x18] sm:$0xff]   ;;  %v187_v4 = vld [vmem:[%s300_s0 + $0x20] sm:$0xff]  }
   0x3   :  { %8 = vst.msk [vmem:[#allocation0 + $0xa] sm:$0xc0] %vm3_vm0, %v2_v0   ;;  %13 = vst.msk [vmem:[#allocation0 + $0x12] ss:$6 sm:$0x3] %vm3_vm0, %v184_v1   ;;  %v188_v5 = vld [vmem:[%s300_s0 + $0x28] sm:$0xff]  }
   0x4   :  { %15 = vst.msk [vmem:[#allocation0 + $0x17] sm:$0xc] %vm3_vm0, %v184_v1   ;;  %17 = vst.msk [vmem:[#allocation0 + $0x1c] sm:$0x70] %vm3_vm0, %v184_v1  }
   0x5   :  { %19 = vst.msk [vmem:[#allocation0 + $0x21] sm:$0x80] %vm3_vm0, %v184_v1   ;;  %24 = vst.msk [vmem:[#allocation0 + $0x29] sm:$0x3] %vm3_vm0, %v185_v2  }
   0x6   :  { %26 = vst.msk [vmem:[#allocation0 + $0x2e] sm:$0x1c] %vm3_vm0, %v185_v2   ;;  %28 = vst.msk [vmem:[#allocation0 + $0x33] sm:$0xe0] %vm3_vm0, %v185_v2  }
   0x7   :  { %33 = vst.msk [vmem:[#allocation0 + $0x40] sm:$0x7] %vm3_vm0, %v186_v3   ;;  %35 = vst.msk [vmem:[#allocation0 + $0x45] sm:$0x38] %vm3_vm0, %v186_v3  }
   0x8   :  { %37 = vst.msk [vmem:[#allocation0 + $0x4a] sm:$0xc0] %vm3_vm0, %v186_v3   ;;  %42 = vst.msk [vmem:[#allocation0 + $0x52] ss:$6 sm:$0x3] %vm3_vm0, %v187_v4  }
   0x9   :  { %44 = vst.msk [vmem:[#allocation0 + $0x57] sm:$0xc] %vm3_vm0, %v187_v4   ;;  %46 = vst.msk [vmem:[#allocation0 + $0x5c] sm:$0x70] %vm3_vm0, %v187_v4   ;;  %v62_v6 = vld [vmem:[#allocation0] sm:$0xf] }
   0xa   :  { %48 = vst.msk [vmem:[#allocation0 + $0x61] sm:$0x80] %vm3_vm0, %v187_v4   ;;  %53 = vst.msk [vmem:[#allocation0 + $0x69] sm:$0x3] %vm3_vm0, %v188_v5   ;;  %v67_v7 = vld [vmem:[#allocation0 + $0x8] sm:$0xf] }
   0xb   :  { %55 = vst.msk [vmem:[#allocation0 + $0x6e] sm:$0x1c] %vm3_vm0, %v188_v5   ;;  %57 = vst.msk [vmem:[#allocation0 + $0x73] sm:$0xe0] %vm3_vm0, %v188_v5   ;;  %v73_v8 = vld [vmem:[#allocation0 + $0x10] sm:$0xf] }
   0xc   :  { %65 = vst [vmem:[%s301_s1] sm:$0xf] %v62_v6  ;;  %189 = vst [vmem:[%s301_s1 + $0x4] sm:$0xf] %v67_v7  ;;  %v80_v9 = vld [vmem:[#allocation0 + $0x18] sm:$0xf] }
   0xd   :  { %190 = vst [vmem:[%s301_s1 + $0x8] sm:$0xf] %v73_v8  ;;  %v87_v10 = vld [vmem:[#allocation0 + $0x20] sm:$0xf]  ;;  %v94_v11 = vld [vmem:[#allocation0 + $0x28] sm:$0xf] }
   0xe   :  { %191 = vst [vmem:[%s301_s1 + $0xc] sm:$0xf] %v80_v9  ;;  %192 = vst [vmem:[%s301_s1 + $0x10] sm:$0xf] %v87_v10  ;;  %v101_v12 = vld [vmem:[#allocation0 + $0x30] sm:$0xf] }
   0xf   :  { %193 = vst [vmem:[%s301_s1 + $0x14] sm:$0xf] %v94_v11  ;;  %v108_v13 = vld [vmem:[#allocation0 + $0x38] sm:$0xf]  ;;  %v115_v14 = vld [vmem:[#allocation0 + $0x40] sm:$0xf] }
  0x10   :  { %194 = vst [vmem:[%s301_s1 + $0x18] sm:$0xf] %v101_v12  ;;  %195 = vst [vmem:[%s301_s1 + $0x1c] sm:$0xf] %v108_v13  ;;  %v122_v15 = vld [vmem:[#allocation0 + $0x48] sm:$0xf] }
  0x11   :  { %196 = vst [vmem:[%s301_s1 + $0x20] sm:$0xf] %v115_v14  ;;  %v129_v16 = vld [vmem:[#allocation0 + $0x50] sm:$0xf]  ;;  %v136_v17 = vld [vmem:[#allocation0 + $0x58] sm:$0xf] }
  0x12   :  { %197 = vst [vmem:[%s301_s1 + $0x24] sm:$0xf] %v122_v15  ;;  %198 = vst [vmem:[%s301_s1 + $0x28] sm:$0xf] %v129_v16  ;;  %v143_v18 = vld [vmem:[#allocation0 + $0x60] sm:$0xf] }
  0x13   :  { %199 = vst [vmem:[%s301_s1 + $0x2c] sm:$0xf] %v136_v17  ;;  %v150_v19 = vld [vmem:[#allocation0 + $0x68] sm:$0xf]  ;;  %v157_v20 = vld [vmem:[#allocation0 + $0x70] sm:$0xf] }
  0x14   :  { %200 = vst [vmem:[%s301_s1 + $0x30] sm:$0xf] %v143_v18  ;;  %201 = vst [vmem:[%s301_s1 + $0x34] sm:$0xf] %v150_v19  ;;  %v164_v21 = vld [vmem:[#allocation0 + $0x78] sm:$0xf] }
  0x15   :  { %202 = vst [vmem:[%s301_s1 + $0x38] sm:$0xf] %v157_v20  ;;  %203 = vst [vmem:[%s301_s1 + $0x3c] sm:$0xf] %v164_v21 }

// kernel: mul.14
= control target key start
LH: loop header
LB: loop body
LE: loop exit
PB: predicated region body
PF: predicated region fallthrough
CT: control target
= control target key end

     0   :  { %s34_s0 = inlined_call_operand.vmem [shape: f32[48], index: 0, kind: input, shape index: {}]   ;;  %s35_s1 = inlined_call_operand.vmem [shape: f32[48], index: 1, kind: input, shape index: {}]   ;;  %s36_s2 = inlined_call_operand.vmem [shape: f32[48], index: 2, kind: output, shape index: {}]  }
   0x1   :  { %v3_v0 = vld [vmem:[%s34_s0] sm:$0x1] }
   0x2   :  { %v4_v1 = vld [vmem:[%s35_s1] sm:$0x1] }
   0x3   :  { %v7_v2 = vmul.f32 %v4_v1, %v3_v0 }
   0x5   :  { %9 = vst [vmem:[%s36_s2] sm:$0x1] %v7_v2 }

// kernel: unet_block_forward.1
= control target key start
LH: loop header
LB: loop body
LE: loop exit
PB: predicated region body
PF: predicated region fallthrough
CT: control target
= control target key end

     0   :  { %v6472_v0 = vmov 0.0   ;;  %vm6473_vm0 = vmmov 0   ;;  %vm168_vm1 = vcmask 64512   ;;  %v6474_v25 = vmov 0   ;;  %s8744_s3 = inlined_call_operand.vmem [shape: f32[128,128], index: 3, kind: input, shape index: {}]   ;;  %s8745_s0 = inlined_call_operand.vmem [shape: f32[8,128], index: 0, kind: input, shape index: {}]   ;;  %s8746_s4 = inlined_call_operand.vmem [shape: f32[8,8], index: 4, kind: input, shape index: {}]   ;;  %s8747_s7 = inlined_call_operand.vmem [shape: f32[8,1], index: 7, kind: input, shape index: {}]   ;;  %s8748_s8 = inlined_call_operand.vmem [shape: f32[8,1], index: 8, kind: input, shape index: {}]   ;;  %s8749_s12 = inlined_call_operand.vmem [shape: f32[32,1], index: 12, kind: input, shape index: {}]   ;;  %s8750_s13 = inlined_call_operand.vmem [shape: f32[16,1], index: 13, kind: input, shape index: {}]   ;;  %s8751_s14 = inlined_call_operand.vmem [shape: f32[16,1], index: 14, kind: input, shape index: {}]   ;;  %s8752_s16 = inlined_call_operand.vmem [shape: f32[16,1], index: 16, kind: input, shape index: {}]   ;;  %s8753_s19 = inlined_call_operand.vmem [shape: f32[16,1], index: 19, kind: input, shape index: {}]   ;;  %s8754_s20 = inlined_call_operand.vmem [shape: f32[16,1], index: 20, kind: input, shape index: {}]   ;;  %s8755_s22 = inlined_call_operand.vmem [shape: f32[48,1], index: 22, kind: input, shape index: {}]   ;;  %s8756_s2 = inlined_call_operand.vmem [shape: f32[9,128,128], index: 2, kind: input, shape index: {}]   ;;  %s8757_s9 = inlined_call_operand.vmem [shape: f32[16,72], index: 9, kind: input, shape index: {}]   ;;  %s8758_s10 = inlined_call_operand.vmem [shape: f32[16,1], index: 10, kind: input, shape index: {}]   ;;  %s8759_s18 = inlined_call_operand.vmem [shape: f32[16,1], index: 18, kind: input, shape index: {}]   ;;  %s8760_s1 = inlined_call_operand.vmem [shape: f32[32,2], index: 1, kind: input, shape index: {}]   ;;  %s8761_s11 = inlined_call_operand.vmem [shape: f32[32,32], index: 11, kind: input, shape index: {}]   ;;  %s8762_s5 = inlined_call_operand.vmem [shape: f32[16,16], index: 5, kind: input, shape index: {}]   ;;  %s8763_s6 = inlined_call_operand.vmem [shape: f32[2,128], index: 6, kind: input, shape index: {}]   ;;  %s8764_s17 = inlined_call_operand.vmem [shape: f32[16,8], index: 17, kind: input, shape index: {}]   ;;  %s8765_s15 = inlined_call_operand.vmem [shape: f32[16,144], index: 15, kind: input, shape index: {}]   ;;  %s8766_s21 = inlined_call_operand.vmem [shape: f32[48,16], index: 21, kind: input, shape index: {}]   ;;  %s8767_s24 = inlined_call_operand.vmem [shape: f32[16,1], index: 24, kind: input, shape index: {}]   ;;  %s8768_s23 = inlined_call_operand.vmem [shape: f32[16,16], index: 23, kind: input, shape index: {}]   ;;  %s8769_s25 = inlined_call_operand.vmem [shape: f32[16,128], index: 25, kind: output, shape index: {}]  }
   0x1   :  { %8779 = sst [smem:[#allocation2_spill]] %s8744_s3  ;;  %5074 = vmatprep.subr.mxu0 %v6472_v0  ;;  %5106 = vmatprep.mubr.msk.f32.mxu0 %vm6473_vm0, %v6472_v0  ;;  %v3132_v35 = vld [vmem:[%s8754_s20 + $0x8] sm:$0xff]  ;;  %v3154_v37 = vld [vmem:[%s8755_s22 + $0x18] sm:$0xff]  ;;  %v419_v42 = vld [vmem:[%s8756_s2 + $0x70] sm:$0xff]  ;;  %vm1201_vm2 = vcmask 588800   ;;  %vm1315_vm3 = vcmask 261120  }
   0x2   :  { %8780 = sst [smem:[#allocation3_spill]] %s8745_s0  ;;  %5109 = vmatprep.subr.mxu1 %v6472_v0  ;;  %5111 = vmatprep.mubr.msk.f32.mxu1 %vm6473_vm0, %v6472_v0  ;;  %v3152_v36 = vld [vmem:[%s8755_s22 + $0x8] sm:$0xff]  ;;  %v6764_v40 = vld [vmem:[%s8756_s2 + $0x78] sm:$0xff]  ;;  %v4347_v43 = vld [vmem:[%s8756_s2 + $0xf0] sm:$0xff]  ;;  %vm1491_vm4 = vcmask 130048   ;;  %vm1766_vm5 = vcmask 1041408  }
   0x3   :  { %8781 = sst [smem:[#allocation4_spill]] %s8746_s4  ;;  %6147 = vset.pattern.permute.xlu0 %v6474_v25  ;;  %6148 = vset.pattern.permute.xlu1 %v6474_v25  ;;  %v4348_v41 = vld [vmem:[%s8756_s2 + $0xf8] sm:$0xff]  ;;  %v418_v44 = vld [vmem:[%s8756_s2 + $0x68] sm:$0xff]  ;;  %v417_v46 = vld [vmem:[%s8756_s2 + $0x60] sm:$0xff]  ;;  %vm1759_vm6 = vcmask 15360  }
   0x4   :  { %8782 = sst [smem:[#allocation5_spill]] %s8747_s7  ;;  %v4346_v45 = vld [vmem:[%s8756_s2 + $0xe8] sm:$0xff]  ;;  %v4345_v47 = vld [vmem:[%s8756_s2 + $0xe0] sm:$0xff]  ;;  %v416_v48 = vld [vmem:[%s8756_s2 + $0x58] sm:$0xff] }
   0x5   :  { %8783 = sst [smem:[#allocation6_spill]] %s8748_s8  ;;  %v4344_v49 = vld [vmem:[%s8756_s2 + $0xd8] sm:$0xff]  ;;  %v415_v50 = vld [vmem:[%s8756_s2 + $0x50] sm:$0xff]  ;;  %v414_v52 = vld [vmem:[%s8756_s2 + $0x48] sm:$0xff] }
   0x6   :  { %8784 = sst [smem:[#allocation7_spill]] %s8749_s12  ;;  %v4343_v51 = vld [vmem:[%s8756_s2 + $0xd0] sm:$0xff]  ;;  %v4342_v53 = vld [vmem:[%s8756_s2 + $0xc8] sm:$0xff]  ;;  %v413_v54 = vld [vmem:[%s8756_s2 + $0x40] sm:$0xff] }
   0x7   :  { %8785 = sst [smem:[#allocation8_spill]] %s8750_s13  ;;  %v4341_v55 = vld [vmem:[%s8756_s2 + $0xc0] sm:$0xff]  ;;  %v412_v56 = vld [vmem:[%s8756_s2 + $0x38] sm:$0xff]  ;;  %v411_v58 = vld [vmem:[%s8756_s2 + $0x30] sm:$0xff] }
   0x8   :  { %8786 = sst [smem:[#allocation9_spill]] %s8751_s14  ;;  %v4340_v57 = vld [vmem:[%s8756_s2 + $0xb8] sm:$0xff]  ;;  %v4339_v59 = vld [vmem:[%s8756_s2 + $0xb0] sm:$0xff]  ;;  %v410_v60 = vld [vmem:[%s8756_s2 + $0x28] sm:$0xff] }
   0x9   :  { %8787 = sst [smem:[#allocation10_spill]] %s8752_s16  ;;  %v4338_v61 = vld [vmem:[%s8756_s2 + $0xa8] sm:$0xff]  ;;  %v409_v62 = vld [vmem:[%s8756_s2 + $0x20] sm:$0xff]  ;;  %v4380_v25 = vld [vmem:[%s8756_s2 + $0x1f8] sm:$0xff] }
   0xa   :  { %8788 = sst [smem:[#allocation11_spill]] %s8753_s19  ;;  %v4337_v63 = vld [vmem:[%s8756_s2 + $0xa0] sm:$0xff] }
   0xb   :  { %8789 = sst [smem:[#allocation12_spill]] %s8768_s23 }
   0xc   :  { %8790 = sst [smem:[#allocation13_spill]] %s8769_s25 }
   0xd   :  { %s8791_s13 = sld [smem:[#allocation2_spill]] }
   0xe   :  { %s8792_s0 = sld [smem:[#allocation3_spill]] }
   0xf   :  { %s8793_s8 = sld [smem:[#allocation4_spill]] }
  0x10   :  { %s8794_s12 = sld [smem:[#allocation5_spill]] }
  0x11   :  { %s8795_s4 = sld [smem:[#allocation6_spill]] }
  0x12   :  { %s8796_s7 = sld [smem:[#allocation7_spill]] }
  0x13   :  { %v6609_v1 = vld [vmem:[%s8791_s13 + $0x78] sm:$0xff]  ;;  %v6614_v2 = vld [vmem:[%s8791_s13 + $0x70] sm:$0xff]  ;;  %v94_v3 = vld [vmem:[%s8791_s13 + $0x68] sm:$0xff]  ;;  %s8797_s28 = sld [smem:[#allocation8_spill]] }
  0x14   :  { %5075 = vmatpush3.msra.mxu0 %v6609_v1  ;;  %v93_v4 = vld [vmem:[%s8791_s13 + $0x60] sm:$0xff]  ;;  %v92_v5 = vld [vmem:[%s8791_s13 + $0x58] sm:$0xff]  ;;  %v91_v6 = vld [vmem:[%s8791_s13 + $0x50] sm:$0xff]  ;;  %s8798_s3 = sld [smem:[#allocation9_spill]] }
  0x15   :  { %5076 = vmatprep.subr.mxu0 %v6472_v0  ;;  %v90_v7 = vld [vmem:[%s8791_s13 + $0x48] sm:$0xff]  ;;  %v89_v8 = vld [vmem:[%s8791_s13 + $0x40] sm:$0xff]  ;;  %v88_v9 = vld [vmem:[%s8791_s13 + $0x38] sm:$0xff]  ;;  %s8799_s30 = sld [smem:[#allocation10_spill]] }
  0x16   :  { %5077 = vmatpush3.msra.mxu0 %v6614_v2  ;;  %v87_v10 = vld [vmem:[%s8791_s13 + $0x30] sm:$0xff]  ;;  %v86_v11 = vld [vmem:[%s8791_s13 + $0x28] sm:$0xff]  ;;  %v85_v12 = vld [vmem:[%s8791_s13 + $0x20] sm:$0xff]  ;;  %s8800_s27 = sld [smem:[#allocation11_spill]] }
  0x17   :  { %5078 = vmatprep.subr.mxu0 %v6472_v0  ;;  %v84_v13 = vld [vmem:[%s8791_s13 + $0x18] sm:$0xff]  ;;  %v83_v14 = vld [vmem:[%s8791_s13 + $0x10] sm:$0xff]  ;;  %v82_v15 = vld [vmem:[%s8791_s13 + $0x8] sm:$0xff] }
  0x18   :  { %5079 = vmatpush3.msra.mxu0 %v94_v3  ;;  %v81_v16 = vld [vmem:[%s8791_s13] sm:$0xff]  ;;  %v1293_v29 = vld [vmem:[%s8796_s7 + $0x10] sm:$0xff] }
  0x19   :  { %5080 = vmatprep.subr.mxu0 %v6472_v0  ;;  %v80_v17 = vld [vmem:[%s8792_s0] sm:$0xff] }
  0x1a   :  { %5081 = vmatpush3.msra.mxu0 %v93_v4  ;;  %v6689_v18 = vld [vmem:[%s8793_s8] sm:$0xff] }
  0x1b   :  { %5082 = vmatprep.subr.mxu0 %v6472_v0  ;;  %v386_v26 = vld [vmem:[%s8794_s12] sm:$0xff]  ;;  %v2618_v33 = vld [vmem:[%s8799_s30 + $0x8] sm:$0xff] }
  0x1c   :  { %5083 = vmatpush3.msra.mxu0 %v92_v5  ;;  %389 = vperm.xlu0 %6147, %v386_v26   ;;  %v393_v27 = vld [vmem:[%s8795_s4] sm:$0xff]  ;;  %v3118_v34 = vld [vmem:[%s8800_s27 + $0x8] sm:$0xff]  ;;  %v4379_v26 = vld [vmem:[%s8756_s2 + $0x1f0] sm:$0xff] }
  0x1d   :  { %5084 = vmatprep.subr.mxu0 %v6472_v0  ;;  %v1291_v28 = vld [vmem:[%s8796_s7] sm:$0xff] }
  0x1e   :  { %5085 = vmatpush3.msra.mxu0 %v91_v6  ;;  %v1731_v30 = vld [vmem:[%s8797_s28] sm:$0xff] }
  0x1f   :  { %5086 = vmatprep.subr.mxu0 %v6472_v0  ;;  %v1745_v31 = vld [vmem:[%s8798_s3] sm:$0xff] }
  0x20   :  { %5087 = vmatpush3.msra.mxu0 %v90_v7  ;;  %396 = vperm.xlu0 %6147, %v393_v27   ;;  %v2617_v32 = vld [vmem:[%s8799_s30] sm:$0xff]  ;;  %v4362_v27 = vld [vmem:[%s8756_s2 + $0x168] sm:$0xff] }
  0x21   :  { %5088 = vmatprep.subr.mxu0 %v6472_v0 }
  0x22   :  { %5089 = vmatpush3.msra.mxu0 %v89_v8 }
  0x23   :  { %5090 = vmatprep.subr.mxu0 %v6472_v0 }
  0x24   :  { %5091 = vmatpush3.msra.mxu0 %v88_v9  ;;  %1297 = vperm.xlu0 %6147, %v1291_v28   ;;  %v4378_v28 = vld [vmem:[%s8756_s2 + $0x1e8] sm:$0xff] }
  0x25   :  { %5092 = vmatprep.subr.mxu0 %v6472_v0 }
  0x26   :  { %5093 = vmatpush3.msra.mxu0 %v87_v10 }
  0x27   :  { %5094 = vmatprep.subr.mxu0 %v6472_v0 }
  0x28   :  { %5095 = vmatpush3.msra.mxu0 %v86_v11  ;;  %1307 = vperm.xlu0 %6147, %v1293_v29   ;;  %v4361_v29 = vld [vmem:[%s8756_s2 + $0x160] sm:$0xff] }
  0x29   :  { %5096 = vmatprep.subr.mxu0 %v6472_v0 }
  0x2a   :  { %5097 = vmatpush3.msra.mxu0 %v85_v12 }
  0x2b   :  { %5098 = vmatprep.subr.mxu0 %v6472_v0 }
  0x2c   :  { %5099 = vmatpush3.msra.mxu0 %v84_v13  ;;  %1735 = vperm.xlu0 %6147, %v1731_v30   ;;  %v4377_v30 = vld [vmem:[%s8756_s2 + $0x1e0] sm:$0xff] }
  0x2d   :  { %5100 = vmatprep.subr.mxu0 %v6472_v0 }
  0x2e   :  { %5101 = vmatpush3.msra.mxu0 %v83_v14 }
  0x2f   :  { %5102 = vmatprep.subr.mxu0 %v6472_v0 }
  0x30   :  { %5103 = vmatpush3.msra.mxu0 %v82_v15  ;;  %1749 = vperm.xlu0 %6147, %v1745_v31   ;;  %v4360_v31 = vld [vmem:[%s8756_s2 + $0x158] sm:$0xff] }
  0x31   :  { %5104 = vmatprep.subr.mxu0 %v6472_v0 }
  0x32   :  { %5105 = vmatpush3.msra.mxu0 %v81_v16 }
  0x33   :  { %5107 = vmatmul.mubr.f32.vlgmr.msra.gmra.mxu0 %v80_v17  ;;  %5149 = vmatprep.subr.mxu0 %v6472_v0 }
  0x34   :  { %5151 = vmatprep.mubr.msk.f32.mxu0 %vm6473_vm0, %v6472_v0  ;;  %2621 = vperm.xlu0 %6147, %v2617_v32   ;;  %v4376_v32 = vld [vmem:[%s8756_s2 + $0x1d8] sm:$0xff] }
  0x38   :  { %2626 = vperm.xlu0 %6147, %v2618_v33   ;;  %v4359_v33 = vld [vmem:[%s8756_s2 + $0x150] sm:$0xff] }
  0x3c   :  { %3126 = vperm.xlu0 %6147, %v3118_v34   ;;  %v4375_v34 = vld [vmem:[%s8756_s2 + $0x1d0] sm:$0xff] }
  0x40   :  { %3140 = vperm.xlu0 %6147, %v3132_v35   ;;  %v4358_v35 = vld [vmem:[%s8756_s2 + $0x148] sm:$0xff] }
  0x44   :  { %3164 = vperm.xlu0 %6147, %v3152_v36   ;;  %v4374_v36 = vld [vmem:[%s8756_s2 + $0x1c8] sm:$0xff] }
  0x48   :  { %3174 = vperm.xlu0 %6147, %v3154_v37   ;;  %v4357_v37 = vld [vmem:[%s8756_s2 + $0x140] sm:$0xff] }
  0xf3   :  { %v164_v19 = vpop.f32.mrf.mxu0 }
  0xf4   :  { %5110 = vmatpush3.msra.mxu1 %v164_v19 }
  0xf5   :  { %v5108_v20 = vpop.f32.mrf.mxu0  ;;  %5112 = vmatmul.mubr.msk.f32.vlgmr.msra.gmra.mxu1 %vm168_vm1, %v6689_v18  ;;  %5114 = vmatprep.subr.mxu1 %v6472_v0 }
  0xf6   :  { %5115 = vmatpush3.msra.mxu1 %v6609_v1  ;;  %5146 = vmatprep.mubr.msk.f32.mxu1 %vm6473_vm0, %v6472_v0  ;;  %v408_v1 = vld [vmem:[%s8756_s2 + $0x18] sm:$0xff] }
  0xf7   :  { %5116 = vmatprep.subr.mxu1 %v6472_v0 }
  0xf8   :  { %5117 = vmatpush3.msra.mxu1 %v6614_v2  ;;  %v4336_v2 = vld [vmem:[%s8756_s2 + $0x98] sm:$0xff] }
  0xf9   :  { %5118 = vmatprep.subr.mxu1 %v6472_v0 }
  0xfa   :  { %5119 = vmatpush3.msra.mxu1 %v94_v3  ;;  %v407_v3 = vld [vmem:[%s8756_s2 + $0x10] sm:$0xff] }
  0xfb   :  { %5120 = vmatprep.subr.mxu1 %v6472_v0 }
  0xfc   :  { %5121 = vmatpush3.msra.mxu1 %v93_v4  ;;  %v4335_v4 = vld [vmem:[%s8756_s2 + $0x90] sm:$0xff] }
  0xfd   :  { %5122 = vmatprep.subr.mxu1 %v6472_v0 }
  0xfe   :  { %5123 = vmatpush3.msra.mxu1 %v92_v5  ;;  %v406_v5 = vld [vmem:[%s8756_s2 + $0x8] sm:$0xff] }
  0xff   :  { %5124 = vmatprep.subr.mxu1 %v6472_v0 }
 0x100   :  { %5125 = vmatpush3.msra.mxu1 %v91_v6  ;;  %v4334_v6 = vld [vmem:[%s8756_s2 + $0x88] sm:$0xff] }
 0x101   :  { %5126 = vmatprep.subr.mxu1 %v6472_v0 }
 0x102   :  { %5127 = vmatpush3.msra.mxu1 %v90_v7  ;;  %v405_v7 = vld [vmem:[%s8756_s2] sm:$0xff] }
 0x103   :  { %5128 = vmatprep.subr.mxu1 %v6472_v0 }
 0x104   :  { %5129 = vmatpush3.msra.mxu1 %v89_v8  ;;  %v4333_v8 = vld [vmem:[%s8756_s2 + $0x80] sm:$0xff] }
 0x105   :  { %5130 = vmatprep.subr.mxu1 %v6472_v0 }
 0x106   :  { %5131 = vmatpush3.msra.mxu1 %v88_v9 }
 0x107   :  { %5132 = vmatprep.subr.mxu1 %v6472_v0 }
 0x108   :  { %5133 = vmatpush3.msra.mxu1 %v87_v10 }
 0x109   :  { %5134 = vmatprep.subr.mxu1 %v6472_v0 }
 0x10a   :  { %5135 = vmatpush3.msra.mxu1 %v86_v11 }
 0x10b   :  { %5136 = vmatprep.subr.mxu1 %v6472_v0 }
 0x10c   :  { %5137 = vmatpush3.msra.mxu1 %v85_v12  ;;  %v390_v12 = vpop.permute.xlu0 %389 }
 0x10d   :  { %5138 = vmatprep.subr.mxu1 %v6472_v0 }
 0x10e   :  { %5139 = vmatpush3.msra.mxu1 %v84_v13 }
 0x10f   :  { %5140 = vmatprep.subr.mxu1 %v6472_v0 }
 0x110   :  { %5141 = vmatpush3.msra.mxu1 %v83_v14 }
 0x111   :  { %5142 = vmatprep.subr.mxu1 %v6472_v0 }
 0x112   :  { %5143 = vmatpush3.msra.mxu1 %v82_v15 }
 0x113   :  { %5144 = vmatprep.subr.mxu1 %v6472_v0 }
 0x114   :  { %5145 = vmatpush3.msra.mxu1 %v81_v16  ;;  %v397_v16 = vpop.permute.xlu0 %396 }
 0x115   :  { %5154 = vmatprep.subr.mxu1 %v6472_v0 }
 0x1b5   :  { %v238_v21 = vpop.f32.mrf.mxu1 }
 0x1b6   :  { %v6714_v22 = vsub.f32 %v80_v17, %v238_v21 }
 0x1b7   :  { %v5113_v23 = vpop.f32.mrf.mxu1 }
 0x1b8   :  { %v243_v24 = vmul.f32 %v6714_v22, %v6714_v22 }
 0x1ba   :  { %5147 = vmatmul.mubr.f32.vlgmr.msra.gmra.mxu1 %v243_v24  ;;  %v4364_v24 = vld [vmem:[%s8756_s2 + $0x178] sm:$0xff] }
 0x1bb   :  { %5186 = vmatprep.mubr.msk.f32.mxu1 %vm6473_vm0, %v6472_v0  ;;  %5155 = vmatpush3.msra.mxu1 %v6764_v40 }
 0x1bc   :  { %5156 = vmatprep.subr.mxu1 %v6472_v0 }
 0x1bd   :  { %5157 = vmatpush3.msra.mxu1 %v419_v42  ;;  %v4355_v42 = vld [vmem:[%s8756_s2 + $0x130] sm:$0xff] }
 0x1be   :  { %5158 = vmatprep.subr.mxu1 %v6472_v0 }
 0x1bf   :  { %5159 = vmatpush3.msra.mxu1 %v418_v44  ;;  %v4354_v44 = vld [vmem:[%s8756_s2 + $0x128] sm:$0xff] }
 0x1c0   :  { %5160 = vmatprep.subr.mxu1 %v6472_v0 }
 0x1c1   :  { %5161 = vmatpush3.msra.mxu1 %v417_v46  ;;  %v4353_v46 = vld [vmem:[%s8756_s2 + $0x120] sm:$0xff] }
 0x1c2   :  { %5162 = vmatprep.subr.mxu1 %v6472_v0 }
 0x1c3   :  { %5163 = vmatpush3.msra.mxu1 %v416_v48  ;;  %v4352_v48 = vld [vmem:[%s8756_s2 + $0x118] sm:$0xff] }
 0x1c4   :  { %5164 = vmatprep.subr.mxu1 %v6472_v0 }
 0x1c5   :  { %5165 = vmatpush3.msra.mxu1 %v415_v50  ;;  %v4351_v50 = vld [vmem:[%s8756_s2 + $0x110] sm:$0xff] }
 0x1c6   :  { %5166 = vmatprep.subr.mxu1 %v6472_v0 }
 0x1c7   :  { %5167 = vmatpush3.msra.mxu1 %v414_v52  ;;  %v4350_v52 = vld [vmem:[%s8756_s2 + $0x108] sm:$0xff] }
 0x1c8   :  { %5168 = vmatprep.subr.mxu1 %v6472_v0 }
 0x1c9   :  { %5169 = vmatpush3.msra.mxu1 %v413_v54  ;;  %v4349_v54 = vld [vmem:[%s8756_s2 + $0x100] sm:$0xff] }
 0x1ca   :  { %5170 = vmatprep.subr.mxu1 %v6472_v0 }
 0x1cb   :  { %5171 = vmatpush3.msra.mxu1 %v412_v56  ;;  %v4396_v56 = vld [vmem:[%s8756_s2 + $0x278] sm:$0xff] }
 0x1cc   :  { %5172 = vmatprep.subr.mxu1 %v6472_v0 }
 0x1cd   :  { %5173 = vmatpush3.msra.mxu1 %v411_v58  ;;  %v4395_v58 = vld [vmem:[%s8756_s2 + $0x270] sm:$0xff] }
 0x1ce   :  { %5174 = vmatprep.subr.mxu1 %v6472_v0 }
 0x1cf   :  { %5175 = vmatpush3.msra.mxu1 %v410_v60  ;;  %v4394_v60 = vld [vmem:[%s8756_s2 + $0x268] sm:$0xff] }
 0x1d0   :  { %5176 = vmatprep.subr.mxu1 %v6472_v0 }
 0x1d1   :  { %5177 = vmatpush3.msra.mxu1 %v409_v62  ;;  %v4393_v62 = vld [vmem:[%s8756_s2 + $0x260] sm:$0xff] }
 0x1d2   :  { %5178 = vmatprep.subr.mxu1 %v6472_v0 }
 0x1d3   :  { %5179 = vmatpush3.msra.mxu1 %v408_v1  ;;  %v4392_v1 = vld [vmem:[%s8756_s2 + $0x258] sm:$0xff] }
 0x1d4   :  { %5180 = vmatprep.subr.mxu1 %v6472_v0 }
 0x1d5   :  { %5181 = vmatpush3.msra.mxu1 %v407_v3  ;;  %v4391_v3 = vld [vmem:[%s8756_s2 + $0x250] sm:$0xff] }
 0x1d6   :  { %5182 = vmatprep.subr.mxu1 %v6472_v0 }
 0x1d7   :  { %5183 = vmatpush3.msra.mxu1 %v406_v5  ;;  %v4390_v5 = vld [vmem:[%s8756_s2 + $0x248] sm:$0xff] }
 0x1d8   :  { %5184 = vmatprep.subr.mxu1 %v6472_v0 }
 0x1d9   :  { %5185 = vmatpush3.msra.mxu1 %v405_v7  ;;  %v4389_v7 = vld [vmem:[%s8756_s2 + $0x240] sm:$0xff] }
 0x1da   :  { %5224 = vmatprep.subr.mxu1 %v6472_v0 }
 0x27a   :  { %v310_v38 = vpop.f32.mrf.mxu1 }
 0x27b   :  { %5150 = vmatpush3.msra.mxu0 %v310_v38  ;;  %v4373_v38 = vld [vmem:[%s8756_s2 + $0x1c0] sm:$0xff] }
 0x27c   :  { %v5148_v39 = vpop.f32.mrf.mxu1  ;;  %5152 = vmatmul.mubr.msk.f32.vlgmr.msra.gmra.mxu0 %vm168_vm1, %v6689_v18  ;;  %5189 = vmatprep.subr.mxu0 %v6472_v0 }
 0x27d   :  { %5221 = vmatprep.mubr.msk.f32.mxu0 %vm6473_vm0, %v6472_v0  ;;  %5190 = vmatpush3.msra.mxu0 %v4348_v41  ;;  %v4356_v39 = vld [vmem:[%s8756_s2 + $0x138] sm:$0xff] }
 0x27e   :  { %5191 = vmatprep.subr.mxu0 %v6472_v0  ;;  %v4372_v41 = vld [vmem:[%s8756_s2 + $0x1b8] sm:$0xff] }
 0x27f   :  { %5192 = vmatpush3.msra.mxu0 %v4347_v43  ;;  %v4371_v43 = vld [vmem:[%s8756_s2 + $0x1b0] sm:$0xff] }
 0x280   :  { %5193 = vmatprep.subr.mxu0 %v6472_v0 }
 0x281   :  { %5194 = vmatpush3.msra.mxu0 %v4346_v45  ;;  %v4370_v45 = vld [vmem:[%s8756_s2 + $0x1a8] sm:$0xff] }
 0x282   :  { %5195 = vmatprep.subr.mxu0 %v6472_v0 }
 0x283   :  { %5196 = vmatpush3.msra.mxu0 %v4345_v47  ;;  %v4369_v47 = vld [vmem:[%s8756_s2 + $0x1a0] sm:$0xff] }
 0x284   :  { %5197 = vmatprep.subr.mxu0 %v6472_v0 }
 0x285   :  { %5198 = vmatpush3.msra.mxu0 %v4344_v49  ;;  %v4368_v49 = vld [vmem:[%s8756_s2 + $0x198] sm:$0xff] }
 0x286   :  { %5199 = vmatprep.subr.mxu0 %v6472_v0 }
 0x287   :  { %5200 = vmatpush3.msra.mxu0 %v4343_v51  ;;  %v4367_v51 = vld [vmem:[%s8756_s2 + $0x190] sm:$0xff] }
 0x288   :  { %5201 = vmatprep.subr.mxu0 %v6472_v0 }
 0x289   :  { %5202 = vmatpush3.msra.mxu0 %v4342_v53  ;;  %v4366_v53 = vld [vmem:[%s8756_s2 + $0x188] sm:$0xff] }
 0x28a   :  { %5203 = vmatprep.subr.mxu0 %v6472_v0 }
 0x28b   :  { %5204 = vmatpush3.msra.mxu0 %v4341_v55  ;;  %v4365_v55 = vld [vmem:[%s8756_s2 + $0x180] sm:$0xff] }
 0x28c   :  { %5205 = vmatprep.subr.mxu0 %v6472_v0 }
 0x28d   :  { %5206 = vmatpush3.msra.mxu0 %v4340_v57  ;;  %v4412_v57 = vld [vmem:[%s8756_s2 + $0x2f8] sm:$0xff] }
 0x28e   :  { %5207 = vmatprep.subr.mxu0 %v6472_v0 }
 0x28f   :  { %5208 = vmatpush3.msra.mxu0 %v4339_v59  ;;  %v4411_v59 = vld [vmem:[%s8756_s2 + $0x2f0] sm:$0xff] }
 0x290   :  { %5209 = vmatprep.subr.mxu0 %v6472_v0 }
 0x291   :  { %5210 = vmatpush3.msra.mxu0 %v4338_v61  ;;  %v4410_v61 = vld [vmem:[%s8756_s2 + $0x2e8] sm:$0xff] }
 0x292   :  { %5211 = vmatprep.subr.mxu0 %v6472_v0 }
 0x293   :  { %5212 = vmatpush3.msra.mxu0 %v4337_v63  ;;  %v4409_v63 = vld [vmem:[%s8756_s2 + $0x2e0] sm:$0xff] }
 0x294   :  { %5213 = vmatprep.subr.mxu0 %v6472_v0 }
 0x295   :  { %5214 = vmatpush3.msra.mxu0 %v4336_v2  ;;  %v4408_v2 = vld [vmem:[%s8756_s2 + $0x2d8] sm:$0xff] }
 0x296   :  { %5215 = vmatprep.subr.mxu0 %v6472_v0 }
 0x297   :  { %5216 = vmatpush3.msra.mxu0 %v4335_v4  ;;  %v4407_v4 = vld [vmem:[%s8756_s2 + $0x2d0] sm:$0xff] }
 0x298   :  { %5217 = vmatprep.subr.mxu0 %v6472_v0 }
 0x299   :  { %5218 = vmatpush3.msra.mxu0 %v4334_v6  ;;  %v4406_v6 = vld [vmem:[%s8756_s2 + $0x2c8] sm:$0xff] }
 0x29a   :  { %5219 = vmatprep.subr.mxu0 %v6472_v0 }
 0x29b   :  { %5220 = vmatpush3.msra.mxu0 %v4333_v8  ;;  %v4405_v8 = vld [vmem:[%s8756_s2 + $0x2c0] sm:$0xff] }
 0x29c   :  { %5259 = vmatprep.subr.mxu0 %v6472_v0 }
 0x33c   :  { %v380_v9 = vpop.f32.mrf.mxu0 }
 0x33d   :  { %v381_v10 = vadd.f32 1e-05, %v380_v9  ;;  %v4388_v9 = vld [vmem:[%s8756_s2 + $0x238] sm:$0xff] }
 0x33e   :  { %v5153_v11 = vpop.f32.mrf.mxu0 }
 0x33f   :  { %6149 = vrsqrt.f32 %v381_v10  ;;  %v4404_v10 = vld [vmem:[%s8756_s2 + $0x2b8] sm:$0xff]  ;;  %v4387_v11 = vld [vmem:[%s8756_s2 + $0x230] sm:$0xff] }
 0x34c   :  { %v6150_v13 = vpop.eup %6149 }
 0x34d   :  { %v385_v14 = vmul.f32 %v6150_v13, %v6714_v22  ;;  %v4363_v22 = vld [vmem:[%s8756_s2 + $0x170] sm:$0xff]  ;;  %v4386_v13 = vld [vmem:[%s8756_s2 + $0x228] sm:$0xff] }
 0x34f   :  { %v392_v15 = vmul.f32 %v390_v12, %v385_v14  ;;  %v4403_v12 = vld [vmem:[%s8756_s2 + $0x2b0] sm:$0xff]  ;;  %v4402_v14 = vld [vmem:[%s8756_s2 + $0x2a8] sm:$0xff] }
 0x351   :  { %v399_v17 = vadd.f32 %v397_v16, %v392_v15  ;;  %v4385_v15 = vld [vmem:[%s8756_s2 + $0x220] sm:$0xff] }
 0x352   :  { %v4401_v16 = vld [vmem:[%s8756_s2 + $0x2a0] sm:$0xff] }
 0x353   :  { %v400_v18 = vmul.f32 0.5, %v399_v17 }
 0x355   :  { %6151 = vtanh.f32 %v400_v18  ;;  %v4400_v18 = vld [vmem:[%s8756_s2 + $0x298] sm:$0xff] }
 0x362   :  { %v6152_v19 = vpop.eup %6151 }
 0x363   :  { %v402_v20 = vadd.f32 1.0, %v6152_v19  ;;  %v4383_v19 = vld [vmem:[%s8756_s2 + $0x210] sm:$0xff] }
 0x365   :  { %v403_v21 = vmul.f32 0.5, %v402_v20  ;;  %v4399_v20 = vld [vmem:[%s8756_s2 + $0x290] sm:$0xff] }
 0x367   :  { %v6893_v23 = vmul.f32 %v403_v21, %v399_v17  ;;  %v4384_v17 = vld [vmem:[%s8756_s2 + $0x218] sm:$0xff]  ;;  %v4382_v21 = vld [vmem:[%s8756_s2 + $0x208] sm:$0xff] }
 0x369   :  { %5187 = vmatmul.mubr.f32.vlgmr.msra.gmra.mxu1 %v6893_v23  ;;  %5222 = vmatmul.mubr.f32.vlgmr.msra.gmra.mxu0 %v6893_v23 }
 0x36a   :  { %5225 = vmatpush3.msra.mxu1 %v4364_v24  ;;  %5260 = vmatpush3.msra.mxu0 %v4380_v25  ;;  %v4398_v24 = vld [vmem:[%s8756_s2 + $0x288] sm:$0xff]  ;;  %v4381_v25 = vld [vmem:[%s8756_s2 + $0x200] sm:$0xff] }
 0x36b   :  { %5226 = vmatprep.subr.mxu1 %v6472_v0  ;;  %5261 = vmatprep.subr.mxu0 %v6472_v0 }
 0x36c   :  { %5227 = vmatpush3.msra.mxu1 %v4363_v22  ;;  %5262 = vmatpush3.msra.mxu0 %v4379_v26  ;;  %v4397_v22 = vld [vmem:[%s8756_s2 + $0x280] sm:$0xff]  ;;  %v4428_v26 = vld [vmem:[%s8756_s2 + $0x378] sm:$0xff] }
 0x36d   :  { %5228 = vmatprep.subr.mxu1 %v6472_v0  ;;  %5263 = vmatprep.subr.mxu0 %v6472_v0 }
 0x36e   :  { %5229 = vmatpush3.msra.mxu1 %v4362_v27  ;;  %5264 = vmatpush3.msra.mxu0 %v4378_v28  ;;  %v4444_v27 = vld [vmem:[%s8756_s2 + $0x3f8] sm:$0xff]  ;;  %v4427_v28 = vld [vmem:[%s8756_s2 + $0x370] sm:$0xff] }
 0x36f   :  { %5230 = vmatprep.subr.mxu1 %v6472_v0  ;;  %5265 = vmatprep.subr.mxu0 %v6472_v0 }
 0x370   :  { %5231 = vmatpush3.msra.mxu1 %v4361_v29  ;;  %5266 = vmatpush3.msra.mxu0 %v4377_v30  ;;  %v4443_v29 = vld [vmem:[%s8756_s2 + $0x3f0] sm:$0xff]  ;;  %v4426_v30 = vld [vmem:[%s8756_s2 + $0x368] sm:$0xff] }
 0x371   :  { %5232 = vmatprep.subr.mxu1 %v6472_v0  ;;  %5267 = vmatprep.subr.mxu0 %v6472_v0 }
 0x372   :  { %5233 = vmatpush3.msra.mxu1 %v4360_v31  ;;  %5268 = vmatpush3.msra.mxu0 %v4376_v32  ;;  %v4442_v31 = vld [vmem:[%s8756_s2 + $0x3e8] sm:$0xff]  ;;  %v4425_v32 = vld [vmem:[%s8756_s2 + $0x360] sm:$0xff] }
 0x373   :  { %5234 = vmatprep.subr.mxu1 %v6472_v0  ;;  %5269 = vmatprep.subr.mxu0 %v6472_v0 }
 0x374   :  { %5235 = vmatpush3.msra.mxu1 %v4359_v33  ;;  %5270 = vmatpush3.msra.mxu0 %v4375_v34  ;;  %v4441_v33 = vld [vmem:[%s8756_s2 + $0x3e0] sm:$0xff]  ;;  %v4424_v34 = vld [vmem:[%s8756_s2 + $0x358] sm:$0xff] }
 0x375   :  { %5236 = vmatprep.subr.mxu1 %v6472_v0  ;;  %5271 = vmatprep.subr.mxu0 %v6472_v0 }
 0x376   :  { %5237 = vmatpush3.msra.mxu1 %v4358_v35  ;;  %5272 = vmatpush3.msra.mxu0 %v4374_v36  ;;  %v4440_v35 = vld [vmem:[%s8756_s2 + $0x3d8] sm:$0xff]  ;;  %v4423_v36 = vld [vmem:[%s8756_s2 + $0x350] sm:$0xff] }
 0x377   :  { %5238 = vmatprep.subr.mxu1 %v6472_v0  ;;  %5273 = vmatprep.subr.mxu0 %v6472_v0 }
 0x378   :  { %5239 = vmatpush3.msra.mxu1 %v4357_v37  ;;  %5274 = vmatpush3.msra.mxu0 %v4373_v38  ;;  %v4439_v37 = vld [vmem:[%s8756_s2 + $0x3d0] sm:$0xff]  ;;  %v4422_v38 = vld [vmem:[%s8756_s2 + $0x348] sm:$0xff] }
 0x379   :  { %5240 = vmatprep.subr.mxu1 %v6472_v0  ;;  %5275 = vmatprep.subr.mxu0 %v6472_v0 }
 0x37a   :  { %5241 = vmatpush3.msra.mxu1 %v4356_v39  ;;  %5276 = vmatpush3.msra.mxu0 %v4372_v41  ;;  %v4438_v39 = vld [vmem:[%s8756_s2 + $0x3c8] sm:$0xff]  ;;  %v4421_v41 = vld [vmem:[%s8756_s2 + $0x340] sm:$0xff] }
 0x37b   :  { %5242 = vmatprep.subr.mxu1 %v6472_v0  ;;  %5277 = vmatprep.subr.mxu0 %v6472_v0 }
 0x37c   :  { %5243 = vmatpush3.msra.mxu1 %v4355_v42  ;;  %5278 = vmatpush3.msra.mxu0 %v4371_v43  ;;  %v4437_v42 = vld [vmem:[%s8756_s2 + $0x3c0] sm:$0xff]  ;;  %v4420_v43 = vld [vmem:[%s8756_s2 + $0x338] sm:$0xff] }
 0x37d   :  { %5244 = vmatprep.subr.mxu1 %v6472_v0  ;;  %5279 = vmatprep.subr.mxu0 %v6472_v0 }
 0x37e   :  { %5245 = vmatpush3.msra.mxu1 %v4354_v44  ;;  %5280 = vmatpush3.msra.mxu0 %v4370_v45  ;;  %v4436_v44 = vld [vmem:[%s8756_s2 + $0x3b8] sm:$0xff]  ;;  %v4419_v45 = vld [vmem:[%s8756_s2 + $0x330] sm:$0xff] }
 0x37f   :  { %5246 = vmatprep.subr.mxu1 %v6472_v0  ;;  %5281 = vmatprep.subr.mxu0 %v6472_v0 }
 0x380   :  { %5247 = vmatpush3.msra.mxu1 %v4353_v46  ;;  %5282 = vmatpush3.msra.mxu0 %v4369_v47  ;;  %v4435_v46 = vld [vmem:[%s8756_s2 + $0x3b0] sm:$0xff]  ;;  %v4418_v47 = vld [vmem:[%s8756_s2 + $0x328] sm:$0xff] }
 0x381   :  { %5248 = vmatprep.subr.mxu1 %v6472_v0  ;;  %5283 = vmatprep.subr.mxu0 %v6472_v0 }
 0x382   :  { %5249 = vmatpush3.msra.mxu1 %v4352_v48  ;;  %5284 = vmatpush3.msra.mxu0 %v4368_v49  ;;  %v4434_v48 = vld [vmem:[%s8756_s2 + $0x3a8] sm:$0xff]  ;;  %v4417_v49 = vld [vmem:[%s8756_s2 + $0x320] sm:$0xff] }
 0x383   :  { %5250 = vmatprep.subr.mxu1 %v6472_v0  ;;  %5285 = vmatprep.subr.mxu0 %v6472_v0 }
 0x384   :  { %5251 = vmatpush3.msra.mxu1 %v4351_v50  ;;  %5286 = vmatpush3.msra.mxu0 %v4367_v51  ;;  %v4433_v50 = vld [vmem:[%s8756_s2 + $0x3a0] sm:$0xff]  ;;  %v4416_v51 = vld [vmem:[%s8756_s2 + $0x318] sm:$0xff] }
 0x385   :  { %5252 = vmatprep.subr.mxu1 %v6472_v0  ;;  %5287 = vmatprep.subr.mxu0 %v6472_v0 }
 0x386   :  { %5253 = vmatpush3.msra.mxu1 %v4350_v52  ;;  %5288 = vmatpush3.msra.mxu0 %v4366_v53  ;;  %v4432_v52 = vld [vmem:[%s8756_s2 + $0x398] sm:$0xff]  ;;  %v4415_v53 = vld [vmem:[%s8756_s2 + $0x310] sm:$0xff] }
 0x387   :  { %5254 = vmatprep.subr.mxu1 %v6472_v0  ;;  %5289 = vmatprep.subr.mxu0 %v6472_v0 }
 0x388   :  { %5255 = vmatpush3.msra.mxu1 %v4349_v54  ;;  %5256 = vmatprep.mubr.msk.f32.mxu1 %vm6473_vm0, %v6472_v0  ;;  %v4431_v54 = vld [vmem:[%s8756_s2 + $0x390] sm:$0xff] }
 0x389   :  { %5290 = vmatpush3.msra.mxu0 %v4365_v55  ;;  %5291 = vmatprep.mubr.msk.f32.mxu0 %vm6473_vm0, %v6472_v0  ;;  %v4414_v55 = vld [vmem:[%s8756_s2 + $0x308] sm:$0xff] }
 0x38a   :  { %5257 = vmatmul.mubr.f32.vlgmr.msra.gmra.mxu1 %v6893_v23  ;;  %5292 = vmatmul.mubr.f32.vlgmr.msra.gmra.mxu0 %v6893_v23 }
 0x38b   :  { %5294 = vmatprep.subr.mxu1 %v6472_v0  ;;  %5329 = vmatprep.subr.mxu0 %v6472_v0 }
 0x38c   :  { %5295 = vmatpush3.msra.mxu1 %v4396_v56  ;;  %5330 = vmatpush3.msra.mxu0 %v4412_v57  ;;  %v4430_v56 = vld [vmem:[%s8756_s2 + $0x388] sm:$0xff]  ;;  %v4413_v57 = vld [vmem:[%s8756_s2 + $0x300] sm:$0xff] }
 0x38d   :  { %5296 = vmatprep.subr.mxu1 %v6472_v0  ;;  %5331 = vmatprep.subr.mxu0 %v6472_v0 }
 0x38e   :  { %5297 = vmatpush3.msra.mxu1 %v4395_v58  ;;  %5332 = vmatpush3.msra.mxu0 %v4411_v59  ;;  %v4429_v58 = vld [vmem:[%s8756_s2 + $0x380] sm:$0xff]  ;;  %v4460_v59 = vld [vmem:[%s8756_s2 + $0x478] sm:$0xff] }
 0x38f   :  { %5298 = vmatprep.subr.mxu1 %v6472_v0  ;;  %5333 = vmatprep.subr.mxu0 %v6472_v0 }
 0x390   :  { %5299 = vmatpush3.msra.mxu1 %v4394_v60  ;;  %5334 = vmatpush3.msra.mxu0 %v4410_v61  ;;  %v4459_v60 = vld [vmem:[%s8756_s2 + $0x470] sm:$0xff]  ;;  %v4458_v61 = vld [vmem:[%s8756_s2 + $0x468] sm:$0xff] }
 0x391   :  { %5300 = vmatprep.subr.mxu1 %v6472_v0  ;;  %5335 = vmatprep.subr.mxu0 %v6472_v0 }
 0x392   :  { %5301 = vmatpush3.msra.mxu1 %v4393_v62  ;;  %5336 = vmatpush3.msra.mxu0 %v4409_v63  ;;  %v4457_v62 = vld [vmem:[%s8756_s2 + $0x460] sm:$0xff]  ;;  %v4456_v63 = vld [vmem:[%s8756_s2 + $0x458] sm:$0xff] }
 0x393   :  { %5302 = vmatprep.subr.mxu1 %v6472_v0  ;;  %5337 = vmatprep.subr.mxu0 %v6472_v0 }
 0x394   :  { %5303 = vmatpush3.msra.mxu1 %v4392_v1  ;;  %5338 = vmatpush3.msra.mxu0 %v4408_v2  ;;  %v4455_v1 = vld [vmem:[%s8756_s2 + $0x450] sm:$0xff]  ;;  %v4454_v2 = vld [vmem:[%s8756_s2 + $0x448] sm:$0xff] }
 0x395   :  { %5304 = vmatprep.subr.mxu1 %v6472_v0  ;;  %5339 = vmatprep.subr.mxu0 %v6472_v0 }
 0x396   :  { %5305 = vmatpush3.msra.mxu1 %v4391_v3  ;;  %5340 = vmatpush3.msra.mxu0 %v4407_v4  ;;  %v4453_v3 = vld [vmem:[%s8756_s2 + $0x440] sm:$0xff]  ;;  %v4452_v4 = vld [vmem:[%s8756_s2 + $0x438] sm:$0xff] }
 0x397   :  { %5306 = vmatprep.subr.mxu1 %v6472_v0  ;;  %5341 = vmatprep.subr.mxu0 %v6472_v0 }
 0x398   :  { %5307 = vmatpush3.msra.mxu1 %v4390_v5  ;;  %5342 = vmatpush3.msra.mxu0 %v4406_v6  ;;  %v4451_v5 = vld [vmem:[%s8756_s2 + $0x430] sm:$0xff]  ;;  %v4450_v6 = vld [vmem:[%s8756_s2 + $0x428] sm:$0xff] }
 0x399   :  { %5308 = vmatprep.subr.mxu1 %v6472_v0  ;;  %5343 = vmatprep.subr.mxu0 %v6472_v0 }
 0x39a   :  { %5309 = vmatpush3.msra.mxu1 %v4389_v7  ;;  %5344 = vmatpush3.msra.mxu0 %v4405_v8  ;;  %v4449_v7 = vld [vmem:[%s8756_s2 + $0x420] sm:$0xff]  ;;  %v4448_v8 = vld [vmem:[%s8756_s2 + $0x418] sm:$0xff] }
 0x39b   :  { %5310 = vmatprep.subr.mxu1 %v6472_v0  ;;  %5345 = vmatprep.subr.mxu0 %v6472_v0 }
 0x39c   :  { %5311 = vmatpush3.msra.mxu1 %v4388_v9  ;;  %5346 = vmatpush3.msra.mxu0 %v4404_v10  ;;  %v4447_v9 = vld [vmem:[%s8756_s2 + $0x410] sm:$0xff]  ;;  %v4446_v10 = vld [vmem:[%s8756_s2 + $0x408] sm:$0xff] }
 0x39d   :  { %5312 = vmatprep.subr.mxu1 %v6472_v0  ;;  %5347 = vmatprep.subr.mxu0 %v6472_v0 }
 0x39e   :  { %5313 = vmatpush3.msra.mxu1 %v4387_v11  ;;  %5348 = vmatpush3.msra.mxu0 %v4403_v12  ;;  %v4445_v11 = vld [vmem:[%s8756_s2 + $0x400] sm:$0xff]  ;;  %v7367_v12 = vld [vmem:[%s8791_s13 + $0x78] sm:$0xff] }
 0x39f   :  { %5314 = vmatprep.subr.mxu1 %v6472_v0  ;;  %5349 = vmatprep.subr.mxu0 %v6472_v0 }
 0x3a0   :  { %5315 = vmatpush3.msra.mxu1 %v4386_v13  ;;  %5350 = vmatpush3.msra.mxu0 %v4402_v14  ;;  %v7374_v13 = vld [vmem:[%s8791_s13 + $0x70] sm:$0xff]  ;;  %v7388_v14 = vld [vmem:[%s8791_s13 + $0x60] sm:$0xff] }
 0x3a1   :  { %5316 = vmatprep.subr.mxu1 %v6472_v0  ;;  %5351 = vmatprep.subr.mxu0 %v6472_v0 }
 0x3a2   :  { %5317 = vmatpush3.msra.mxu1 %v4385_v15  ;;  %5352 = vmatpush3.msra.mxu0 %v4401_v16  ;;  %v7395_v15 = vld [vmem:[%s8791_s13 + $0x58] sm:$0xff]  ;;  %v7402_v16 = vld [vmem:[%s8791_s13 + $0x50] sm:$0xff] }
 0x3a3   :  { %5318 = vmatprep.subr.mxu1 %v6472_v0  ;;  %5353 = vmatprep.subr.mxu0 %v6472_v0 }
 0x3a4   :  { %5319 = vmatpush3.msra.mxu1 %v4384_v17  ;;  %5354 = vmatpush3.msra.mxu0 %v4400_v18  ;;  %v7409_v17 = vld [vmem:[%s8791_s13 + $0x48] sm:$0xff]  ;;  %v7416_v18 = vld [vmem:[%s8791_s13 + $0x40] sm:$0xff] }
 0x3a5   :  { %5320 = vmatprep.subr.mxu1 %v6472_v0  ;;  %5355 = vmatprep.subr.mxu0 %v6472_v0 }
 0x3a6   :  { %5321 = vmatpush3.msra.mxu1 %v4383_v19  ;;  %5356 = vmatpush3.msra.mxu0 %v4399_v20  ;;  %v7423_v19 = vld [vmem:[%s8791_s13 + $0x38] sm:$0xff]  ;;  %v7430_v20 = vld [vmem:[%s8791_s13 + $0x30] sm:$0xff] }
 0x3a7   :  { %5322 = vmatprep.subr.mxu1 %v6472_v0  ;;  %5357 = vmatprep.subr.mxu0 %v6472_v0 }
 0x3a8   :  { %5323 = vmatpush3.msra.mxu1 %v4382_v21  ;;  %5358 = vmatpush3.msra.mxu0 %v4398_v24  ;;  %v7437_v21 = vld [vmem:[%s8791_s13 + $0x28] sm:$0xff]  ;;  %v7444_v24 = vld [vmem:[%s8791_s13 + $0x20] sm:$0xff] }
 0x3a9   :  { %5324 = vmatprep.subr.mxu1 %v6472_v0  ;;  %5359 = vmatprep.subr.mxu0 %v6472_v0 }
 0x3aa   :  { %5325 = vmatpush3.msra.mxu1 %v4381_v25  ;;  %5326 = vmatprep.mubr.msk.f32.mxu1 %vm6473_vm0, %v6472_v0  ;;  %v7451_v25 = vld [vmem:[%s8791_s13 + $0x18] sm:$0xff] }
 0x3ab   :  { %5360 = vmatpush3.msra.mxu0 %v4397_v22  ;;  %5361 = vmatprep.mubr.msk.f32.mxu0 %vm6473_vm0, %v6472_v0  ;;  %v7458_v22 = vld [vmem:[%s8791_s13 + $0x10] sm:$0xff] }
 0x3ac   :  { %5327 = vmatmul.mubr.f32.vlgmr.msra.gmra.mxu1 %v6893_v23  ;;  %5362 = vmatmul.mubr.f32.vlgmr.msra.gmra.mxu0 %v6893_v23 }
 0x3ad   :  { %5364 = vmatprep.subr.mxu1 %v6472_v0  ;;  %5399 = vmatprep.subr.mxu0 %v6472_v0 }
 0x3ae   :  { %5365 = vmatpush3.msra.mxu1 %v4428_v26  ;;  %5400 = vmatpush3.msra.mxu0 %v4444_v27  ;;  %v7465_v26 = vld [vmem:[%s8791_s13 + $0x8] sm:$0xff]  ;;  %v7472_v27 = vld [vmem:[%s8791_s13] sm:$0xff] }
 0x3af   :  { %5366 = vmatprep.subr.mxu1 %v6472_v0  ;;  %5401 = vmatprep.subr.mxu0 %v6472_v0 }
 0x3b0   :  { %5367 = vmatpush3.msra.mxu1 %v4427_v28  ;;  %5402 = vmatpush3.msra.mxu0 %v4443_v29 }
 0x3b1   :  { %5368 = vmatprep.subr.mxu1 %v6472_v0  ;;  %5403 = vmatprep.subr.mxu0 %v6472_v0 }
 0x3b2   :  { %5369 = vmatpush3.msra.mxu1 %v4426_v30  ;;  %5404 = vmatpush3.msra.mxu0 %v4442_v31 }
 0x3b3   :  { %5370 = vmatprep.subr.mxu1 %v6472_v0  ;;  %5405 = vmatprep.subr.mxu0 %v6472_v0 }
 0x3b4   :  { %5371 = vmatpush3.msra.mxu1 %v4425_v32  ;;  %5406 = vmatpush3.msra.mxu0 %v4441_v33  ;;  %v1187_v32 = vld [vmem:[%s8757_s9] sm:$0xff] }
 0x3b5   :  { %5372 = vmatprep.subr.mxu1 %v6472_v0  ;;  %5407 = vmatprep.subr.mxu0 %v6472_v0 }
 0x3b6   :  { %5373 = vmatpush3.msra.mxu1 %v4424_v34  ;;  %5408 = vmatpush3.msra.mxu0 %v4440_v35 }
 0x3b7   :  { %5374 = vmatprep.subr.mxu1 %v6472_v0  ;;  %5409 = vmatprep.subr.mxu0 %v6472_v0 }
 0x3b8   :  { %5375 = vmatpush3.msra.mxu1 %v4423_v36  ;;  %5410 = vmatpush3.msra.mxu0 %v4439_v37  ;;  %v1190_v37 = vld [vmem:[%s8758_s10 + $0x8] sm:$0xff] }
 0x3b9   :  { %5376 = vmatprep.subr.mxu1 %v6472_v0  ;;  %5411 = vmatprep.subr.mxu0 %v6472_v0 }
 0x3ba   :  { %5377 = vmatpush3.msra.mxu1 %v4422_v38  ;;  %5412 = vmatpush3.msra.mxu0 %v4438_v39  ;;  %v1292_v38 = vld [vmem:[%s8796_s7 + $0x8] sm:$0xff]  ;;  %v1294_v39 = vld [vmem:[%s8796_s7 + $0x18] sm:$0xff] }
 0x3bb   :  { %5378 = vmatprep.subr.mxu1 %v6472_v0  ;;  %5413 = vmatprep.subr.mxu0 %v6472_v0 }
 0x3bc   :  { %5379 = vmatpush3.msra.mxu1 %v4421_v41  ;;  %5414 = vmatpush3.msra.mxu0 %v4437_v42  ;;  %v1732_v41 = vld [vmem:[%s8797_s28 + $0x8] sm:$0xff] }
 0x3bd   :  { %5380 = vmatprep.subr.mxu1 %v6472_v0  ;;  %5415 = vmatprep.subr.mxu0 %v6472_v0  ;;  %v1746_v42 = vld [vmem:[%s8798_s3 + $0x8] sm:$0xff] }
 0x3be   :  { %5381 = vmatpush3.msra.mxu1 %v4420_v43  ;;  %5416 = vmatpush3.msra.mxu0 %v4436_v44  ;;  %v2712_v43 = vld [vmem:[%s8759_s18] sm:$0xff]  ;;  %v2713_v44 = vld [vmem:[%s8759_s18 + $0x8] sm:$0xff] }
 0x3bf   :  { %5382 = vmatprep.subr.mxu1 %v6472_v0  ;;  %5417 = vmatprep.subr.mxu0 %v6472_v0 }
 0x3c0   :  { %5383 = vmatpush3.msra.mxu1 %v4419_v45  ;;  %5418 = vmatpush3.msra.mxu0 %v4435_v46 }
 0x3c1   :  { %5384 = vmatprep.subr.mxu1 %v6472_v0  ;;  %5419 = vmatprep.subr.mxu0 %v6472_v0 }
 0x3c2   :  { %5385 = vmatpush3.msra.mxu1 %v4418_v47  ;;  %5420 = vmatpush3.msra.mxu0 %v4434_v48  ;;  %v3117_v47 = vld [vmem:[%s8800_s27] sm:$0xff] }
 0x3c3   :  { %5386 = vmatprep.subr.mxu1 %v6472_v0  ;;  %5421 = vmatprep.subr.mxu0 %v6472_v0 }
 0x3c4   :  { %5387 = vmatpush3.msra.mxu1 %v4417_v49  ;;  %5422 = vmatpush3.msra.mxu0 %v4433_v50  ;;  %v3131_v50 = vld [vmem:[%s8754_s20] sm:$0xff] }
 0x3c5   :  { %5388 = vmatprep.subr.mxu1 %v6472_v0  ;;  %5423 = vmatprep.subr.mxu0 %v6472_v0 }
 0x3c6   :  { %5389 = vmatpush3.msra.mxu1 %v4416_v51  ;;  %5424 = vmatpush3.msra.mxu0 %v4432_v52  ;;  %v3151_v51 = vld [vmem:[%s8755_s22] sm:$0xff]  ;;  %v3153_v52 = vld [vmem:[%s8755_s22 + $0x10] sm:$0xff] }
 0x3c7   :  { %5390 = vmatprep.subr.mxu1 %v6472_v0  ;;  %5425 = vmatprep.subr.mxu0 %v6472_v0 }
 0x3c8   :  { %5391 = vmatpush3.msra.mxu1 %v4415_v53  ;;  %5426 = vmatpush3.msra.mxu0 %v4431_v54 }
 0x3c9   :  { %5392 = vmatprep.subr.mxu1 %v6472_v0  ;;  %5427 = vmatprep.subr.mxu0 %v6472_v0 }
 0x3ca   :  { %5393 = vmatpush3.msra.mxu1 %v4414_v55  ;;  %5428 = vmatpush3.msra.mxu0 %v4430_v56 }
 0x3cb   :  { %5394 = vmatprep.subr.mxu1 %v6472_v0  ;;  %5429 = vmatprep.subr.mxu0 %v6472_v0 }
 0x3cc   :  { %5395 = vmatpush3.msra.mxu1 %v4413_v57  ;;  %5396 = vmatprep.mubr.msk.f32.mxu1 %vm6473_vm0, %v6472_v0 }
 0x3cd   :  { %5430 = vmatpush3.msra.mxu0 %v4429_v58  ;;  %5431 = vmatprep.mubr.msk.f32.mxu0 %vm6473_vm0, %v6472_v0 }
 0x3ce   :  { %5397 = vmatmul.mubr.f32.vlgmr.msra.gmra.mxu1 %v6893_v23  ;;  %5432 = vmatmul.mubr.f32.vlgmr.msra.gmra.mxu0 %v6893_v23 }
 0x3cf   :  { %5434 = vmatprep.subr.mxu1 %v6472_v0  ;;  %5466 = vmatprep.mubr.msk.f32.mxu1 %vm6473_vm0, %v6472_v0 }
 0x3d0   :  { %5435 = vmatpush3.msra.mxu1 %v4460_v59  ;;  %5487 = vmatprep.mubr.msk.f32.mxu0 %vm1201_vm2, %v1187_v32  ;;  %v1188_v59 = vld [vmem:[%s8757_s9 + $0x8] sm:$0xff]  ;;  %v6316_v32 = vld [vmem:[%s8756_s2 + $0x40] sm:$0xff] }
 0x3d1   :  { %5436 = vmatprep.subr.mxu1 %v6472_v0 }
 0x3d2   :  { %5437 = vmatpush3.msra.mxu1 %v4459_v60  ;;  %v1290_v60 = vld [vmem:[%s8760_s1 + $0x18] sm:$0xff] }
 0x3d3   :  { %5438 = vmatprep.subr.mxu1 %v6472_v0 }
 0x3d4   :  { %5439 = vmatpush3.msra.mxu1 %v4458_v61  ;;  %v1283_v61 = vld [vmem:[%s8761_s11] sm:$0xff] }
 0x3d5   :  { %5440 = vmatprep.subr.mxu1 %v6472_v0 }
 0x3d6   :  { %5441 = vmatpush3.msra.mxu1 %v4457_v62  ;;  %v1289_v62 = vld [vmem:[%s8760_s1 + $0x10] sm:$0xff] }
 0x3d7   :  { %5442 = vmatprep.subr.mxu1 %v6472_v0 }
 0x3d8   :  { %5443 = vmatpush3.msra.mxu1 %v4456_v63  ;;  %v1288_v63 = vld [vmem:[%s8760_s1 + $0x8] sm:$0xff] }
 0x3d9   :  { %5444 = vmatprep.subr.mxu1 %v6472_v0 }
 0x3da   :  { %5445 = vmatpush3.msra.mxu1 %v4455_v1  ;;  %v1287_v1 = vld [vmem:[%s8760_s1] sm:$0xff]  ;;  %s8801_s1 = sld [smem:[#allocation12_spill]] }
 0x3db   :  { %5446 = vmatprep.subr.mxu1 %v6472_v0 }
 0x3dc   :  { %5447 = vmatpush3.msra.mxu1 %v4454_v2  ;;  %v1284_v2 = vld [vmem:[%s8761_s11 + $0x8] sm:$0xff] }
 0x3dd   :  { %5448 = vmatprep.subr.mxu1 %v6472_v0 }
 0x3de   :  { %5449 = vmatpush3.msra.mxu1 %v4453_v3  ;;  %v1285_v3 = vld [vmem:[%s8761_s11 + $0x10] sm:$0xff] }
 0x3df   :  { %5450 = vmatprep.subr.mxu1 %v6472_v0 }
 0x3e0   :  { %5451 = vmatpush3.msra.mxu1 %v4452_v4  ;;  %v1286_v4 = vld [vmem:[%s8761_s11 + $0x18] sm:$0xff] }
 0x3e1   :  { %5452 = vmatprep.subr.mxu1 %v6472_v0 }
 0x3e2   :  { %5453 = vmatpush3.msra.mxu1 %v4451_v5 }
 0x3e3   :  { %5454 = vmatprep.subr.mxu1 %v6472_v0 }
 0x3e4   :  { %5455 = vmatpush3.msra.mxu1 %v4450_v6 }
 0x3e5   :  { %5456 = vmatprep.subr.mxu1 %v6472_v0 }
 0x3e6   :  { %5457 = vmatpush3.msra.mxu1 %v4449_v7 }
 0x3e7   :  { %5458 = vmatprep.subr.mxu1 %v6472_v0 }
 0x3e8   :  { %5459 = vmatpush3.msra.mxu1 %v4448_v8 }
 0x3e9   :  { %5460 = vmatprep.subr.mxu1 %v6472_v0 }
 0x3ea   :  { %5461 = vmatpush3.msra.mxu1 %v4447_v9 }
 0x3eb   :  { %5462 = vmatprep.subr.mxu1 %v6472_v0 }
 0x3ec   :  { %5463 = vmatpush3.msra.mxu1 %v4446_v10 }
 0x3ed   :  { %5464 = vmatprep.subr.mxu1 %v6472_v0 }
 0x3ee   :  { %5465 = vmatpush3.msra.mxu1 %v4445_v11  ;;  %v7592_v11 = vld [vmem:[%s8762_s5] sm:$0xff] }
 0x3ef   :  { %5467 = vmatmul.mubr.f32.vlgmr.msra.gmra.mxu1 %v6893_v23  ;;  %5546 = vmatprep.subr.mxu1 %v7367_v12  ;;  %v7381_v23 = vld [vmem:[%s8791_s13 + $0x68] sm:$0xff] }
 0x3f0   :  { %5547 = vmatpush3.msra.mxu1 %v7367_v12 }
 0x3f1   :  { %5548 = vmatprep.subr.mxu1 %v7374_v13 }
 0x3f2   :  { %5549 = vmatpush3.msra.mxu1 %v7374_v13 }
 0x3f3   :  { %5550 = vmatprep.subr.mxu1 %v7381_v23 }
 0x3f4   :  { %5551 = vmatpush3.msra.mxu1 %v7381_v23 }
 0x3f5   :  { %5552 = vmatprep.subr.mxu1 %v7388_v14 }
 0x3f6   :  { %5553 = vmatpush3.msra.mxu1 %v7388_v14 }
 0x3f7   :  { %5554 = vmatprep.subr.mxu1 %v7395_v15 }
 0x3f8   :  { %5555 = vmatpush3.msra.mxu1 %v7395_v15 }
 0x3f9   :  { %5556 = vmatprep.subr.mxu1 %v7402_v16 }
 0x3fa   :  { %5557 = vmatpush3.msra.mxu1 %v7402_v16 }
 0x3fb   :  { %5558 = vmatprep.subr.mxu1 %v7409_v17 }
 0x3fc   :  { %5559 = vmatpush3.msra.mxu1 %v7409_v17 }
 0x3fd   :  { %5560 = vmatprep.subr.mxu1 %v7416_v18 }
 0x3fe   :  { %5561 = vmatpush3.msra.mxu1 %v7416_v18 }
 0x3ff   :  { %5562 = vmatprep.subr.mxu1 %v7423_v19 }
 0x400   :  { %5563 = vmatpush3.msra.mxu1 %v7423_v19 }
 0x401   :  { %5564 = vmatprep.subr.mxu1 %v7430_v20 }
 0x402   :  { %5565 = vmatpush3.msra.mxu1 %v7430_v20 }
 0x403   :  { %5566 = vmatprep.subr.mxu1 %v7437_v21 }
 0x404   :  { %5567 = vmatpush3.msra.mxu1 %v7437_v21 }
 0x405   :  { %5568 = vmatprep.subr.mxu1 %v7444_v24 }
 0x406   :  { %5569 = vmatpush3.msra.mxu1 %v7444_v24 }
 0x407   :  { %5570 = vmatprep.subr.mxu1 %v7451_v25 }
 0x408   :  { %5571 = vmatpush3.msra.mxu1 %v7451_v25 }
 0x409   :  { %5572 = vmatprep.subr.mxu1 %v7458_v22 }
 0x40a   :  { %5573 = vmatpush3.msra.mxu1 %v7458_v22 }
 0x40b   :  { %5574 = vmatprep.subr.mxu1 %v7465_v26 }
 0x40c   :  { %5575 = vmatpush3.msra.mxu1 %v7465_v26 }
 0x40d   :  { %5576 = vmatprep.subr.mxu1 %v7472_v27 }
 0x40e   :  { %5577 = vmatpush3.msra.mxu1 %v7472_v27 }
 0x40f   :  { %5598 = vmatprep.subr.mxu1 %v6764_v40  ;;  %v1189_v40 = vld [vmem:[%s8758_s10] sm:$0xff] }
 0x410   :  { %1193 = vperm.xlu1 %6148, %v1189_v40   ;;  %v6321_v40 = vld [vmem:[%s8756_s2 + $0x18] sm:$0xff] }
 0x414   :  { %1198 = vperm.xlu1 %6148, %v1190_v37   ;;  %v6322_v37 = vld [vmem:[%s8756_s2 + $0x10] sm:$0xff] }
 0x418   :  { %1302 = vperm.xlu1 %6148, %v1292_v38   ;;  %v6323_v38 = vld [vmem:[%s8756_s2 + $0x8] sm:$0xff] }
 0x41c   :  { %1312 = vperm.xlu1 %6148, %v1294_v39   ;;  %v6324_v39 = vld [vmem:[%s8756_s2] sm:$0xff] }
 0x420   :  { %1740 = vperm.xlu1 %6148, %v1732_v41   ;;  %v7672_v41 = vld [vmem:[%s8756_s2 + $0x178] sm:$0xff] }
 0x424   :  { %1754 = vperm.xlu1 %6148, %v1746_v42  }
 0x428   :  { %2716 = vperm.xlu1 %6148, %v2712_v43   ;;  %v1298_v43 = vpop.permute.xlu0 %1297 }
 0x429   :  { %v7477_v28 = vpop.f32.mrf.mxu1  ;;  %v7479_v29 = vpop.f32.mrf.mxu0 }
 0x42b   :  { %v5188_v30 = vpop.f32.mrf.mxu1  ;;  %v5223_v31 = vpop.f32.mrf.mxu0 }
 0x42c   :  { %2721 = vperm.xlu1 %6148, %v2713_v44   ;;  %v6314_v30 = vld [vmem:[%s8756_s2 + $0x50] sm:$0xff]  ;;  %v6315_v31 = vld [vmem:[%s8756_s2 + $0x48] sm:$0xff] }
 0x430   :  { %3121 = vperm.xlu1 %6148, %v3117_v47  }
 0x434   :  { %3135 = vperm.xlu1 %6148, %v3131_v50  }
 0x438   :  { %3159 = vperm.xlu1 %6148, %v3151_v51  }
 0x43c   :  { %3169 = vperm.xlu1 %6148, %v3153_v52  }
 0x44a   :  { %v661_v33 = vpop.f32.mrf.mxu1  ;;  %v748_v34 = vpop.f32.mrf.mxu0 }
 0x44c   :  { %v5258_v35 = vpop.f32.mrf.mxu1  ;;  %v5293_v36 = vpop.f32.mrf.mxu0 }
 0x44d   :  { %v6319_v35 = vld [vmem:[%s8756_s2 + $0x28] sm:$0xff]  ;;  %v6320_v36 = vld [vmem:[%s8756_s2 + $0x20] sm:$0xff] }
 0x46c   :  { %v835_v45 = vpop.f32.mrf.mxu1  ;;  %v922_v46 = vpop.f32.mrf.mxu0 }
 0x46e   :  { %v5328_v48 = vpop.f32.mrf.mxu1  ;;  %v5363_v49 = vpop.f32.mrf.mxu0 }
 0x46f   :  { %v1308_v48 = vpop.permute.xlu0 %1307 }
 0x48b   :  { %v1194_v5 = vpop.permute.xlu1 %1193 }
 0x48e   :  { %v1009_v53 = vpop.f32.mrf.mxu1  ;;  %v1096_v54 = vpop.f32.mrf.mxu0 }
 0x48f   :  { %v1199_v8 = vpop.permute.xlu1 %1198 }
 0x490   :  { %v5398_v55 = vpop.f32.mrf.mxu1  ;;  %v5433_v56 = vpop.f32.mrf.mxu0 }
 0x491   :  { %v6328_v55 = vld [vmem:[%s8756_s2 + $0xe8] sm:$0xff]  ;;  %v6329_v56 = vld [vmem:[%s8756_s2 + $0xe0] sm:$0xff] }
 0x4af   :  { %v1183_v57 = vpop.f32.mrf.mxu1 }
 0x4b0   :  { %5469 = vmatprep.subr.mxu0 %v1183_v57 }
 0x4b1   :  { %v5468_v58 = vpop.f32.mrf.mxu1  ;;  %5470 = vmatpush3.msra.mxu0 %v1183_v57  ;;  %v6330_v57 = vld [vmem:[%s8756_s2 + $0xd8] sm:$0xff] }
 0x4b2   :  { %5471 = vmatprep.subr.mxu0 %v1096_v54  ;;  %v6331_v58 = vld [vmem:[%s8756_s2 + $0xd0] sm:$0xff] }
 0x4b3   :  { %5472 = vmatpush3.msra.mxu0 %v1096_v54  ;;  %v6327_v54 = vld [vmem:[%s8756_s2 + $0xf0] sm:$0xff] }
 0x4b4   :  { %5473 = vmatprep.subr.mxu0 %v1009_v53 }
 0x4b5   :  { %5474 = vmatpush3.msra.mxu0 %v1009_v53  ;;  %v6326_v53 = vld [vmem:[%s8756_s2 + $0xf8] sm:$0xff] }
 0x4b6   :  { %5475 = vmatprep.subr.mxu0 %v922_v46 }
 0x4b7   :  { %5476 = vmatpush3.msra.mxu0 %v922_v46  ;;  %v1303_v46 = vpop.permute.xlu1 %1302 }
 0x4b8   :  { %5477 = vmatprep.subr.mxu0 %v835_v45 }
 0x4b9   :  { %5478 = vmatpush3.msra.mxu0 %v835_v45  ;;  %v1413_v45 = vld [vmem:[%s8763_s6] sm:$0x3] }
 0x4ba   :  { %5479 = vmatprep.subr.mxu0 %v748_v34 }
 0x4bb   :  { %5480 = vmatpush3.msra.mxu0 %v748_v34  ;;  %v6318_v34 = vld [vmem:[%s8756_s2 + $0x30] sm:$0xff]  ;;  %v1313_v51 = vpop.permute.xlu1 %1312 }
 0x4bc   :  { %5481 = vmatprep.subr.mxu0 %v661_v33 }
 0x4bd   :  { %5482 = vmatpush3.msra.mxu0 %v661_v33  ;;  %v6317_v33 = vld [vmem:[%s8756_s2 + $0x38] sm:$0xff] }
 0x4be   :  { %5483 = vmatprep.subr.mxu0 %v7479_v29 }
 0x4bf   :  { %5484 = vmatpush3.msra.mxu0 %v7479_v29  ;;  %v6313_v29 = vld [vmem:[%s8756_s2 + $0x58] sm:$0xff] }
 0x4c0   :  { %5485 = vmatprep.subr.mxu0 %v7477_v28 }
 0x4c1   :  { %5486 = vmatpush3.msra.mxu0 %v7477_v28  ;;  %v6312_v28 = vld [vmem:[%s8756_s2 + $0x60] sm:$0xff] }
 0x4c2   :  { %5488 = vmatmul.mubr.msk.f32.vlgmr.msra.gmra.mxu0 %vm1201_vm2, %v1188_v59  ;;  %5490 = vmatprep.subr.mxu0 %v1290_v60  ;;  %v6332_v59 = vld [vmem:[%s8756_s2 + $0xc8] sm:$0xff] }
 0x4c3   :  { %5491 = vmatpush3.msra.mxu0 %v1290_v60  ;;  %5498 = vmatprep.mubr.msk.f32.mxu0 %vm1315_vm3, %v1283_v61  ;;  %v6333_v60 = vld [vmem:[%s8756_s2 + $0xc0] sm:$0xff]  ;;  %v6334_v61 = vld [vmem:[%s8756_s2 + $0xb8] sm:$0xff] }
 0x4c4   :  { %5492 = vmatprep.subr.mxu0 %v1289_v62 }
 0x4c5   :  { %5493 = vmatpush3.msra.mxu0 %v1289_v62  ;;  %v6335_v62 = vld [vmem:[%s8756_s2 + $0xb0] sm:$0xff] }
 0x4c6   :  { %5494 = vmatprep.subr.mxu0 %v1288_v63 }
 0x4c7   :  { %5495 = vmatpush3.msra.mxu0 %v1288_v63  ;;  %v6336_v63 = vld [vmem:[%s8756_s2 + $0xa8] sm:$0xff] }
 0x4c8   :  { %5496 = vmatprep.subr.mxu0 %v1287_v1 }
 0x4c9   :  { %5497 = vmatpush3.msra.mxu0 %v1287_v1  ;;  %v6337_v1 = vld [vmem:[%s8756_s2 + $0xa0] sm:$0xff] }
 0x4ca   :  { %5499 = vmatmul.mubr.msk.f32.vlgmr.msra.gmra.mxu0 %vm1315_vm3, %v1284_v2  ;;  %5504 = vmatprep.subr.mxu0 %v7367_v12  ;;  %v6338_v2 = vld [vmem:[%s8756_s2 + $0x98] sm:$0xff] }
 0x4cb   :  { %5501 = vmatprep.mubr.msk.f32.mxu0 %vm1315_vm3, %v1285_v3  ;;  %5505 = vmatpush3.msra.mxu0 %v7367_v12  ;;  %v6339_v3 = vld [vmem:[%s8756_s2 + $0x90] sm:$0xff] }
 0x4cc   :  { %5506 = vmatprep.subr.mxu0 %v7374_v13 }
 0x4cd   :  { %5507 = vmatpush3.msra.mxu0 %v7374_v13 }
 0x4ce   :  { %5502 = vmatmul.mubr.msk.f32.gmra.mxu0 %vm1315_vm3, %v1286_v4  ;;  %5508 = vmatprep.subr.mxu0 %v7381_v23  ;;  %v6340_v4 = vld [vmem:[%s8756_s2 + $0x88] sm:$0xff] }
 0x4cf   :  { %5509 = vmatpush3.msra.mxu0 %v7381_v23 }
 0x4d0   :  { %5510 = vmatprep.subr.mxu0 %v7388_v14 }
 0x4d1   :  { %5511 = vmatpush3.msra.mxu0 %v7388_v14 }
 0x4d2   :  { %5512 = vmatprep.subr.mxu0 %v7395_v15 }
 0x4d3   :  { %5513 = vmatpush3.msra.mxu0 %v7395_v15 }
 0x4d4   :  { %5514 = vmatprep.subr.mxu0 %v7402_v16 }
 0x4d5   :  { %5515 = vmatpush3.msra.mxu0 %v7402_v16 }
 0x4d6   :  { %5516 = vmatprep.subr.mxu0 %v7409_v17 }
 0x4d7   :  { %5517 = vmatpush3.msra.mxu0 %v7409_v17  ;;  %v7607_v17 = vld [vmem:[%s8762_s5 + $0x8] sm:$0xff] }
 0x4d8   :  { %5518 = vmatprep.subr.mxu0 %v7416_v18 }
 0x4d9   :  { %5519 = vmatpush3.msra.mxu0 %v7416_v18 }
 0x4da   :  { %5520 = vmatprep.subr.mxu0 %v7423_v19 }
 0x4db   :  { %5521 = vmatpush3.msra.mxu0 %v7423_v19 }
 0x4dc   :  { %5522 = vmatprep.subr.mxu0 %v7430_v20 }
 0x4dd   :  { %5523 = vmatpush3.msra.mxu0 %v7430_v20 }
 0x4de   :  { %5524 = vmatprep.subr.mxu0 %v7437_v21 }
 0x4df   :  { %5525 = vmatpush3.msra.mxu0 %v7437_v21 }
 0x4e0   :  { %5526 = vmatprep.subr.mxu0 %v7444_v24 }
 0x4e1   :  { %5527 = vmatpush3.msra.mxu0 %v7444_v24 }
 0x4e2   :  { %5528 = vmatprep.subr.mxu0 %v7451_v25 }
 0x4e3   :  { %5529 = vmatpush3.msra.mxu0 %v7451_v25 }
 0x4e4   :  { %5530 = vmatprep.subr.mxu0 %v7458_v22 }
 0x4e5   :  { %5531 = vmatpush3.msra.mxu0 %v7458_v22  ;;  %v6309_v22 = vld [vmem:[%s8756_s2 + $0x78] sm:$0xff] }
 0x4e6   :  { %5532 = vmatprep.subr.mxu0 %v7465_v26 }
 0x4e7   :  { %5533 = vmatpush3.msra.mxu0 %v7465_v26  ;;  %v6310_v26 = vld [vmem:[%s8756_s2 + $0x70] sm:$0xff] }
 0x4e8   :  { %5534 = vmatprep.subr.mxu0 %v7472_v27 }
 0x4e9   :  { %5535 = vmatpush3.msra.mxu0 %v7472_v27  ;;  %v6311_v27 = vld [vmem:[%s8756_s2 + $0x68] sm:$0xff] }
 0x582   :  { %v5489_v6 = vpop.f32.mrf.mxu0 }
 0x583   :  { %v1280_v10 = vadd.f32 %v5489_v6, %v1199_v8  ;;  %v6342_v6 = vld [vmem:[%s8756_s2 + $0x1f8] sm:$0xff] }
 0x584   :  { %v1274_v7 = vpop.f32.mrf.mxu0 }
 0x585   :  { %v1275_v9 = vadd.f32 %v1274_v7, %v1194_v5  ;;  %v6341_v5 = vld [vmem:[%s8756_s2 + $0x80] sm:$0xff] }
 0x587   :  { %5536 = vmatprep.mubr.f32.mxu0 %v1275_v9 }
 0x588   :  { %5537 = vmatmul.mubr.f32.vlgmr.msra.gmra.mxu0 %v1280_v10 }
 0x589   :  { %5543 = vmatprep.mubr.msk.f32.mxu0 %vm1491_vm4, %v7592_v11 }
 0x58a   :  { %v7596_v12 = vpop.f32.mrf.mxu0 }
 0x58b   :  { %v1400_v49 = vadd.f32 %v7596_v12, %v1303_v46  ;;  %v1741_v12 = vpop.permute.xlu1 %1740  ;;  %v6344_v46 = vld [vmem:[%s8756_s2 + $0x1f0] sm:$0xff] }
 0x58c   :  { %v7598_v13 = vpop.f32.mrf.mxu0 }
 0x58d   :  { %v1395_v47 = vadd.f32 %v7598_v13, %v1298_v43 }
 0x58e   :  { %v7600_v23 = vpop.f32.mrf.mxu0 }
 0x58f   :  { %v1410_v52 = vadd.f32 %v7600_v23, %v1313_v51  ;;  %v6350_v51 = vld [vmem:[%s8756_s2 + $0x1d8] sm:$0xff] }
 0x590   :  { %v7602_v14 = vpop.f32.mrf.mxu0 }
 0x591   :  { %v1405_v50 = vadd.f32 %v7602_v14, %v1308_v48  ;;  %v1736_v14 = vpop.permute.xlu0 %1735  ;;  %v6347_v48 = vld [vmem:[%s8756_s2 + $0x160] sm:$0xff] }
 0x648   :  { %v5538_v15 = vpop.f32.mrf.mxu0 }
 0x649   :  { %5539 = vmatprep.subr.mxu0 %v5538_v15 }
 0x64a   :  { %v1482_v16 = vpop.f32.mrf.mxu0  ;;  %5540 = vmatpush3.msra.mxu0 %v5538_v15 }
 0x64b   :  { %5541 = vmatprep.subr.mxu0 %v1482_v16 }
 0x64c   :  { %5542 = vmatpush3.msra.mxu0 %v1482_v16 }
 0x64d   :  { %5544 = vmatmul.mubr.msk.f32.vlgmr.msra.gmra.mxu0 %vm1491_vm4, %v7607_v17 }
 0x64e   :  { %5585 = vmatprep.mubr.msk.f32.mxu0 %vm1491_vm4, %v7592_v11 }
 0x70d   :  { %v5545_v18 = vpop.f32.mrf.mxu0 }
 0x70e   :  { %v7613_v19 = vsub.f32 %v1280_v10, %v5545_v18 }
 0x70f   :  { %v1564_v20 = vpop.f32.mrf.mxu0 }
 0x710   :  { %v7615_v21 = vsub.f32 %v1275_v9, %v1564_v20  ;;  %v1576_v25 = vmul.f32 %v7613_v19, %v7613_v19 }
 0x712   :  { %v1575_v24 = vmul.f32 %v7615_v21, %v7615_v21 }
 0x714   :  { %5578 = vmatprep.mubr.f32.mxu1 %v1575_v24  ;;  %v1755_v24 = vpop.permute.xlu1 %1754 }
 0x715   :  { %5579 = vmatmul.mubr.f32.vlgmr.msra.gmra.mxu1 %v1576_v25 }
 0x716   :  { %5599 = vmatpush3.msra.mxu1 %v6309_v22 }
 0x717   :  { %5600 = vmatprep.subr.mxu1 %v6310_v26 }
 0x718   :  { %5601 = vmatpush3.msra.mxu1 %v6310_v26 }
 0x719   :  { %5602 = vmatprep.subr.mxu1 %v6311_v27 }
 0x71a   :  { %5603 = vmatpush3.msra.mxu1 %v6311_v27  ;;  %v1750_v27 = vpop.permute.xlu0 %1749 }
 0x71b   :  { %5604 = vmatprep.subr.mxu1 %v6312_v28 }
 0x71c   :  { %5605 = vmatpush3.msra.mxu1 %v6312_v28 }
 0x71d   :  { %5606 = vmatprep.subr.mxu1 %v6313_v29 }
 0x71e   :  { %5607 = vmatpush3.msra.mxu1 %v6313_v29 }
 0x71f   :  { %5608 = vmatprep.subr.mxu1 %v6314_v30 }
 0x720   :  { %5609 = vmatpush3.msra.mxu1 %v6314_v30 }
 0x721   :  { %5610 = vmatprep.subr.mxu1 %v6315_v31 }
 0x722   :  { %5611 = vmatpush3.msra.mxu1 %v6315_v31 }
 0x723   :  { %5612 = vmatprep.subr.mxu1 %v6316_v32 }
 0x724   :  { %5613 = vmatpush3.msra.mxu1 %v6316_v32 }
 0x725   :  { %5614 = vmatprep.subr.mxu1 %v6317_v33 }
 0x726   :  { %5615 = vmatpush3.msra.mxu1 %v6317_v33 }
 0x727   :  { %5616 = vmatprep.subr.mxu1 %v6318_v34 }
 0x728   :  { %5617 = vmatpush3.msra.mxu1 %v6318_v34 }
 0x729   :  { %5618 = vmatprep.subr.mxu1 %v6319_v35 }
 0x72a   :  { %5619 = vmatpush3.msra.mxu1 %v6319_v35 }
 0x72b   :  { %5620 = vmatprep.subr.mxu1 %v6320_v36 }
 0x72c   :  { %5621 = vmatpush3.msra.mxu1 %v6320_v36 }
 0x72d   :  { %5622 = vmatprep.subr.mxu1 %v6321_v40 }
 0x72e   :  { %5623 = vmatpush3.msra.mxu1 %v6321_v40 }
 0x72f   :  { %5624 = vmatprep.subr.mxu1 %v6322_v37 }
 0x730   :  { %5625 = vmatpush3.msra.mxu1 %v6322_v37 }
 0x731   :  { %5626 = vmatprep.subr.mxu1 %v6323_v38 }
 0x732   :  { %5627 = vmatpush3.msra.mxu1 %v6323_v38 }
 0x733   :  { %5628 = vmatprep.subr.mxu1 %v6324_v39 }
 0x734   :  { %5629 = vmatpush3.msra.mxu1 %v6324_v39 }
 0x735   :  { %5668 = vmatprep.subr.mxu1 %v7672_v41 }
 0x7d5   :  { %v5580_v42 = vpop.f32.mrf.mxu1 }
 0x7d6   :  { %5581 = vmatprep.subr.mxu0 %v5580_v42 }
 0x7d7   :  { %v1643_v44 = vpop.f32.mrf.mxu1  ;;  %5582 = vmatpush3.msra.mxu0 %v5580_v42 }
 0x7d8   :  { %5583 = vmatprep.subr.mxu0 %v1643_v44 }
 0x7d9   :  { %5584 = vmatpush3.msra.mxu0 %v1643_v44 }
 0x7da   :  { %5586 = vmatmul.mubr.msk.f32.vlgmr.msra.gmra.mxu0 %vm1491_vm4, %v7607_v17  ;;  %5588 = vmatprep.subr.msk.mxu0 %vm1766_vm5, %v1413_v45 }
 0x7db   :  { %5590 = vmatprep.mubr.msk.f32.mxu0 %vm1759_vm6, %v1395_v47  ;;  %5589 = vmatpush3.msk.msra.mxu0 %vm1766_vm5, %v1413_v45  ;;  %v6346_v47 = vld [vmem:[%s8756_s2 + $0x1e8] sm:$0xff] }
 0x7dc   :  { %5593 = vmatprep.subr.msk.mxu0 %vm1766_vm5, %v1413_v45 }
 0x7de   :  { %5591 = vmatmul.mubr.msk.f32.vlgmr.msra.gmra.mxu0 %vm1759_vm6, %v1400_v49  ;;  %v6348_v49 = vld [vmem:[%s8756_s2 + $0x1e0] sm:$0xff] }
 0x7df   :  { %5595 = vmatprep.mubr.msk.f32.mxu0 %vm1759_vm6, %v1405_v50  ;;  %5594 = vmatpush3.msk.msra.mxu0 %vm1766_vm5, %v1413_v45  ;;  %v6343_v45 = vld [vmem:[%s8756_s2 + $0x170] sm:$0xff]  ;;  %v6349_v50 = vld [vmem:[%s8756_s2 + $0x158] sm:$0xff] }
 0x7e0   :  { %5633 = vmatprep.subr.mxu0 %v6326_v53 }
 0x7e2   :  { %5596 = vmatmul.mubr.msk.f32.vlgmr.msra.gmra.mxu0 %vm1759_vm6, %v1410_v52  ;;  %v6351_v52 = vld [vmem:[%s8756_s2 + $0x150] sm:$0xff] }
 0x7e3   :  { %5634 = vmatpush3.msra.mxu0 %v6326_v53  ;;  %v6352_v53 = vld [vmem:[%s8756_s2 + $0x1d0] sm:$0xff] }
 0x7e4   :  { %5635 = vmatprep.subr.mxu0 %v6327_v54 }
 0x7e5   :  { %5636 = vmatpush3.msra.mxu0 %v6327_v54  ;;  %v6353_v54 = vld [vmem:[%s8756_s2 + $0x148] sm:$0xff] }
 0x7e6   :  { %5637 = vmatprep.subr.mxu0 %v6328_v55 }
 0x7e7   :  { %5638 = vmatpush3.msra.mxu0 %v6328_v55  ;;  %v6354_v55 = vld [vmem:[%s8756_s2 + $0x1c8] sm:$0xff] }
 0x7e8   :  { %5639 = vmatprep.subr.mxu0 %v6329_v56 }
 0x7e9   :  { %5640 = vmatpush3.msra.mxu0 %v6329_v56  ;;  %v6355_v56 = vld [vmem:[%s8756_s2 + $0x140] sm:$0xff] }
 0x7ea   :  { %5641 = vmatprep.subr.mxu0 %v6330_v57 }
 0x7eb   :  { %5642 = vmatpush3.msra.mxu0 %v6330_v57  ;;  %v6356_v57 = vld [vmem:[%s8756_s2 + $0x1c0] sm:$0xff] }
 0x7ec   :  { %5643 = vmatprep.subr.mxu0 %v6331_v58 }
 0x7ed   :  { %5644 = vmatpush3.msra.mxu0 %v6331_v58  ;;  %v6357_v58 = vld [vmem:[%s8756_s2 + $0x138] sm:$0xff] }
 0x7ee   :  { %5645 = vmatprep.subr.mxu0 %v6332_v59 }
 0x7ef   :  { %5646 = vmatpush3.msra.mxu0 %v6332_v59  ;;  %v6358_v59 = vld [vmem:[%s8756_s2 + $0x1b8] sm:$0xff] }
 0x7f0   :  { %5647 = vmatprep.subr.mxu0 %v6333_v60 }
 0x7f1   :  { %5648 = vmatpush3.msra.mxu0 %v6333_v60  ;;  %v6359_v60 = vld [vmem:[%s8756_s2 + $0x130] sm:$0xff] }
 0x7f2   :  { %5649 = vmatprep.subr.mxu0 %v6334_v61 }
 0x7f3   :  { %5650 = vmatpush3.msra.mxu0 %v6334_v61  ;;  %v6360_v61 = vld [vmem:[%s8756_s2 + $0x1b0] sm:$0xff] }
 0x7f4   :  { %5651 = vmatprep.subr.mxu0 %v6335_v62 }
 0x7f5   :  { %5652 = vmatpush3.msra.mxu0 %v6335_v62  ;;  %v6361_v62 = vld [vmem:[%s8756_s2 + $0x128] sm:$0xff] }
 0x7f6   :  { %5653 = vmatprep.subr.mxu0 %v6336_v63 }
 0x7f7   :  { %5654 = vmatpush3.msra.mxu0 %v6336_v63  ;;  %v6362_v63 = vld [vmem:[%s8756_s2 + $0x1a8] sm:$0xff] }
 0x7f8   :  { %5655 = vmatprep.subr.mxu0 %v6337_v1 }
 0x7f9   :  { %5656 = vmatpush3.msra.mxu0 %v6337_v1  ;;  %v6363_v1 = vld [vmem:[%s8756_s2 + $0x120] sm:$0xff] }
 0x7fa   :  { %5657 = vmatprep.subr.mxu0 %v6338_v2 }
 0x7fb   :  { %5658 = vmatpush3.msra.mxu0 %v6338_v2  ;;  %v6364_v2 = vld [vmem:[%s8756_s2 + $0x1a0] sm:$0xff] }
 0x7fc   :  { %5659 = vmatprep.subr.mxu0 %v6339_v3 }
 0x7fd   :  { %5660 = vmatpush3.msra.mxu0 %v6339_v3  ;;  %v6365_v3 = vld [vmem:[%s8756_s2 + $0x118] sm:$0xff] }
 0x7fe   :  { %5661 = vmatprep.subr.mxu0 %v6340_v4 }
 0x7ff   :  { %5662 = vmatpush3.msra.mxu0 %v6340_v4  ;;  %v6366_v4 = vld [vmem:[%s8756_s2 + $0x198] sm:$0xff] }
 0x800   :  { %5663 = vmatprep.subr.mxu0 %v6341_v5 }
 0x801   :  { %5664 = vmatpush3.msra.mxu0 %v6341_v5  ;;  %v6367_v5 = vld [vmem:[%s8756_s2 + $0x110] sm:$0xff] }
 0x802   :  { %5703 = vmatprep.subr.mxu0 %v6342_v6 }
 0x89a   :  { %v5587_v7 = vpop.f32.mrf.mxu0 }
 0x89b   :  { %v1724_v8 = vadd.f32 1e-05, %v5587_v7  ;;  %v6369_v7 = vld [vmem:[%s8756_s2 + $0x108] sm:$0xff] }
 0x89c   :  { %v1718_v9 = vpop.f32.mrf.mxu0 }
 0x89d   :  { %6153 = vrsqrt.f32 %v1724_v8  ;;  %v1719_v10 = vadd.f32 1e-05, %v1718_v9  ;;  %v6370_v8 = vld [vmem:[%s8756_s2 + $0x188] sm:$0xff]  ;;  %v6371_v9 = vld [vmem:[%s8756_s2 + $0x100] sm:$0xff] }
 0x89e   :  { %v5592_v13 = vpop.f32.mrf.mxu0 }
 0x89f   :  { %6155 = vrsqrt.f32 %v1719_v10  ;;  %v1842_v25 = vadd.f32 1.0, %v5592_v13  ;;  %v6372_v10 = vld [vmem:[%s8756_s2 + $0x180] sm:$0xff]  ;;  %v6374_v13 = vld [vmem:[%s8756_s2 + $0x2f8] sm:$0xff] }
 0x8a0   :  { %v1836_v17 = vpop.f32.mrf.mxu0 }
 0x8a1   :  { %v1837_v29 = vadd.f32 1.0, %v1836_v17  ;;  %v6379_v17 = vld [vmem:[%s8756_s2 + $0x260] sm:$0xff] }
 0x8a2   :  { %v5597_v28 = vpop.f32.mrf.mxu0 }
 0x8a4   :  { %v1919_v34 = vpop.f32.mrf.mxu0 }
 0x8aa   :  { %v6154_v23 = vpop.eup %6153 }
 0x8ab   :  { %v1730_v15 = vmul.f32 %v6154_v23, %v7613_v19  ;;  %v6375_v23 = vld [vmem:[%s8756_s2 + $0x270] sm:$0xff] }
 0x8ac   :  { %v6156_v16 = vpop.eup %6155 }
 0x8ad   :  { %v1744_v18 = vmul.f32 %v1741_v12, %v1730_v15  ;;  %v1729_v20 = vmul.f32 %v6156_v16, %v7615_v21  ;;  %v6373_v12 = vld [vmem:[%s8756_s2 + $0x278] sm:$0xff]  ;;  %v6377_v15 = vld [vmem:[%s8756_s2 + $0x268] sm:$0xff] }
 0x8ae   :  { %v6378_v16 = vld [vmem:[%s8756_s2 + $0x2e8] sm:$0xff] }
 0x8af   :  { %v1758_v22 = vadd.f32 %v1755_v24, %v1744_v18  ;;  %v1743_v26 = vmul.f32 %v1736_v14, %v1729_v20  ;;  %v6376_v14 = vld [vmem:[%s8756_s2 + $0x2f0] sm:$0xff]  ;;  %v6380_v18 = vld [vmem:[%s8756_s2 + $0x2e0] sm:$0xff]  ;;  %v6381_v20 = vld [vmem:[%s8756_s2 + $0x258] sm:$0xff] }
 0x8b0   :  { %v6382_v24 = vld [vmem:[%s8756_s2 + $0x2d8] sm:$0xff] }
 0x8b1   :  { %v1846_v30 = vmul.f32 %v1842_v25, %v1758_v22  ;;  %v1757_v31 = vadd.f32 %v1750_v27, %v1743_v26  ;;  %v6383_v25 = vld [vmem:[%s8756_s2 + $0x250] sm:$0xff]  ;;  %v6385_v26 = vld [vmem:[%s8756_s2 + $0x248] sm:$0xff] }
 0x8b2   :  { %v6384_v22 = vld [vmem:[%s8756_s2 + $0x2d0] sm:$0xff]  ;;  %v6386_v27 = vld [vmem:[%s8756_s2 + $0x2c8] sm:$0xff] }
 0x8b3   :  { %v1925_v32 = vadd.f32 %v5597_v28, %v1846_v30  ;;  %v1845_v33 = vmul.f32 %v1837_v29, %v1757_v31  ;;  %v6387_v28 = vld [vmem:[%s8756_s2 + $0x240] sm:$0xff]  ;;  %v6389_v30 = vld [vmem:[%s8756_s2 + $0x238] sm:$0xff] }
 0x8b4   :  { %v6388_v29 = vld [vmem:[%s8756_s2 + $0x2c0] sm:$0xff]  ;;  %v6390_v31 = vld [vmem:[%s8756_s2 + $0x2b8] sm:$0xff] }
 0x8b5   :  { %v1929_v35 = vmul.f32 0.5, %v1925_v32  ;;  %v1920_v36 = vadd.f32 %v1919_v34, %v1845_v33  ;;  %v6392_v33 = vld [vmem:[%s8756_s2 + $0x2b0] sm:$0xff]  ;;  %v6393_v34 = vld [vmem:[%s8756_s2 + $0x228] sm:$0xff] }
 0x8b7   :  { %6157 = vtanh.f32 %v1929_v35  ;;  %v1928_v19 = vmul.f32 0.5, %v1920_v36  ;;  %v6394_v35 = vld [vmem:[%s8756_s2 + $0x2a8] sm:$0xff] }
 0x8b9   :  { %6159 = vtanh.f32 %v1928_v19  ;;  %v6396_v19 = vld [vmem:[%s8756_s2 + $0x2a0] sm:$0xff] }
 0x8c4   :  { %v6158_v40 = vpop.eup %6157 }
 0x8c5   :  { %v1933_v37 = vadd.f32 1.0, %v6158_v40  ;;  %v6397_v40 = vld [vmem:[%s8756_s2 + $0x218] sm:$0xff] }
 0x8c6   :  { %v6160_v21 = vpop.eup %6159 }
 0x8c7   :  { %v1932_v38 = vadd.f32 1.0, %v6160_v21  ;;  %v1935_v39 = vmul.f32 0.5, %v1933_v37  ;;  %v6398_v37 = vld [vmem:[%s8756_s2 + $0x298] sm:$0xff]  ;;  %v6399_v21 = vld [vmem:[%s8756_s2 + $0x210] sm:$0xff] }
 0x8c9   :  { %v1934_v42 = vmul.f32 0.5, %v1932_v38  ;;  %v7747_v44 = vmul.f32 %v1935_v39, %v1925_v32  ;;  %v6391_v32 = vld [vmem:[%s8756_s2 + $0x230] sm:$0xff]  ;;  %v6401_v39 = vld [vmem:[%s8756_s2 + $0x208] sm:$0xff] }
 0x8ca   :  { %v6400_v38 = vld [vmem:[%s8756_s2 + $0x290] sm:$0xff] }
 0x8cb   :  { %v7745_v43 = vmul.f32 %v1934_v42, %v1920_v36  ;;  %v6395_v36 = vld [vmem:[%s8756_s2 + $0x220] sm:$0xff]  ;;  %v6402_v42 = vld [vmem:[%s8756_s2 + $0x288] sm:$0xff] }
 0x8cd   :  { %5630 = vmatprep.mubr.f32.mxu1 %v7745_v43  ;;  %5665 = vmatprep.mubr.f32.mxu0 %v7745_v43 }
 0x8ce   :  { %5631 = vmatmul.mubr.f32.vlgmr.msra.gmra.mxu1 %v7747_v44  ;;  %5666 = vmatmul.mubr.f32.vlgmr.msra.gmra.mxu0 %v7747_v44 }
 0x8cf   :  { %5669 = vmatpush3.msra.mxu1 %v7672_v41  ;;  %5704 = vmatpush3.msra.mxu0 %v6342_v6  ;;  %v6345_v41 = vld [vmem:[%s8756_s2 + $0x168] sm:$0xff]  ;;  %v6368_v6 = vld [vmem:[%s8756_s2 + $0x190] sm:$0xff] }
 0x8d0   :  { %5670 = vmatprep.subr.mxu1 %v6343_v45  ;;  %5700 = vmatprep.mubr.f32.mxu1 %v7745_v43 }
 0x8d1   :  { %5705 = vmatprep.subr.mxu0 %v6344_v46  ;;  %5735 = vmatprep.mubr.f32.mxu0 %v7745_v43 }
 0x8d2   :  { %5671 = vmatpush3.msra.mxu1 %v6343_v45  ;;  %5706 = vmatpush3.msra.mxu0 %v6344_v46  ;;  %v6403_v45 = vld [vmem:[%s8756_s2 + $0x200] sm:$0xff] }
 0x8d3   :  { %5672 = vmatprep.subr.mxu1 %v6345_v41  ;;  %5707 = vmatprep.subr.mxu0 %v6346_v47  ;;  %v6404_v46 = vld [vmem:[%s8756_s2 + $0x280] sm:$0xff] }
 0x8d4   :  { %5673 = vmatpush3.msra.mxu1 %v6345_v41  ;;  %5708 = vmatpush3.msra.mxu0 %v6346_v47  ;;  %v6405_v41 = vld [vmem:[%s8756_s2 + $0x378] sm:$0xff] }
 0x8d5   :  { %5674 = vmatprep.subr.mxu1 %v6347_v48  ;;  %5709 = vmatprep.subr.mxu0 %v6348_v49  ;;  %v6406_v47 = vld [vmem:[%s8756_s2 + $0x3f8] sm:$0xff] }
 0x8d6   :  { %5675 = vmatpush3.msra.mxu1 %v6347_v48  ;;  %5710 = vmatpush3.msra.mxu0 %v6348_v49  ;;  %v6407_v48 = vld [vmem:[%s8756_s2 + $0x370] sm:$0xff] }
 0x8d7   :  { %5676 = vmatprep.subr.mxu1 %v6349_v50  ;;  %5711 = vmatprep.subr.mxu0 %v6350_v51  ;;  %v6408_v49 = vld [vmem:[%s8756_s2 + $0x3f0] sm:$0xff] }
 0x8d8   :  { %5677 = vmatpush3.msra.mxu1 %v6349_v50  ;;  %5712 = vmatpush3.msra.mxu0 %v6350_v51  ;;  %v6409_v50 = vld [vmem:[%s8756_s2 + $0x368] sm:$0xff] }
 0x8d9   :  { %5678 = vmatprep.subr.mxu1 %v6351_v52  ;;  %5713 = vmatprep.subr.mxu0 %v6352_v53  ;;  %v6410_v51 = vld [vmem:[%s8756_s2 + $0x3e8] sm:$0xff] }
 0x8da   :  { %5679 = vmatpush3.msra.mxu1 %v6351_v52  ;;  %5714 = vmatpush3.msra.mxu0 %v6352_v53  ;;  %v6411_v52 = vld [vmem:[%s8756_s2 + $0x360] sm:$0xff] }
 0x8db   :  { %5680 = vmatprep.subr.mxu1 %v6353_v54  ;;  %5715 = vmatprep.subr.mxu0 %v6354_v55  ;;  %v6412_v53 = vld [vmem:[%s8756_s2 + $0x3e0] sm:$0xff] }
 0x8dc   :  { %5681 = vmatpush3.msra.mxu1 %v6353_v54  ;;  %5716 = vmatpush3.msra.mxu0 %v6354_v55  ;;  %v6413_v54 = vld [vmem:[%s8756_s2 + $0x358] sm:$0xff] }
 0x8dd   :  { %5682 = vmatprep.subr.mxu1 %v6355_v56  ;;  %5717 = vmatprep.subr.mxu0 %v6356_v57  ;;  %v6414_v55 = vld [vmem:[%s8756_s2 + $0x3d8] sm:$0xff] }
 0x8de   :  { %5683 = vmatpush3.msra.mxu1 %v6355_v56  ;;  %5718 = vmatpush3.msra.mxu0 %v6356_v57  ;;  %v6415_v56 = vld [vmem:[%s8756_s2 + $0x350] sm:$0xff] }
 0x8df   :  { %5684 = vmatprep.subr.mxu1 %v6357_v58  ;;  %5719 = vmatprep.subr.mxu0 %v6358_v59  ;;  %v6416_v57 = vld [vmem:[%s8756_s2 + $0x3d0] sm:$0xff] }
 0x8e0   :  { %5685 = vmatpush3.msra.mxu1 %v6357_v58  ;;  %5720 = vmatpush3.msra.mxu0 %v6358_v59  ;;  %v6417_v58 = vld [vmem:[%s8756_s2 + $0x348] sm:$0xff] }
 0x8e1   :  { %5686 = vmatprep.subr.mxu1 %v6359_v60  ;;  %5721 = vmatprep.subr.mxu0 %v6360_v61  ;;  %v6418_v59 = vld [vmem:[%s8756_s2 + $0x3c8] sm:$0xff] }
 0x8e2   :  { %5687 = vmatpush3.msra.mxu1 %v6359_v60  ;;  %5722 = vmatpush3.msra.mxu0 %v6360_v61  ;;  %v6419_v60 = vld [vmem:[%s8756_s2 + $0x340] sm:$0xff] }
 0x8e3   :  { %5688 = vmatprep.subr.mxu1 %v6361_v62  ;;  %5723 = vmatprep.subr.mxu0 %v6362_v63  ;;  %v6420_v61 = vld [vmem:[%s8756_s2 + $0x3c0] sm:$0xff] }
 0x8e4   :  { %5689 = vmatpush3.msra.mxu1 %v6361_v62  ;;  %5724 = vmatpush3.msra.mxu0 %v6362_v63  ;;  %v6421_v62 = vld [vmem:[%s8756_s2 + $0x338] sm:$0xff] }
 0x8e5   :  { %5690 = vmatprep.subr.mxu1 %v6363_v1  ;;  %5725 = vmatprep.subr.mxu0 %v6364_v2  ;;  %v6422_v63 = vld [vmem:[%s8756_s2 + $0x3b8] sm:$0xff] }
 0x8e6   :  { %5691 = vmatpush3.msra.mxu1 %v6363_v1  ;;  %5726 = vmatpush3.msra.mxu0 %v6364_v2  ;;  %v6423_v1 = vld [vmem:[%s8756_s2 + $0x330] sm:$0xff] }
 0x8e7   :  { %5692 = vmatprep.subr.mxu1 %v6365_v3  ;;  %5727 = vmatprep.subr.mxu0 %v6366_v4  ;;  %v6424_v2 = vld [vmem:[%s8756_s2 + $0x3b0] sm:$0xff] }
 0x8e8   :  { %5693 = vmatpush3.msra.mxu1 %v6365_v3  ;;  %5728 = vmatpush3.msra.mxu0 %v6366_v4  ;;  %v6425_v3 = vld [vmem:[%s8756_s2 + $0x328] sm:$0xff] }
 0x8e9   :  { %5694 = vmatprep.subr.mxu1 %v6367_v5  ;;  %5729 = vmatprep.subr.mxu0 %v6368_v6  ;;  %v6426_v4 = vld [vmem:[%s8756_s2 + $0x3a8] sm:$0xff] }
 0x8ea   :  { %5695 = vmatpush3.msra.mxu1 %v6367_v5  ;;  %5730 = vmatpush3.msra.mxu0 %v6368_v6  ;;  %v6427_v5 = vld [vmem:[%s8756_s2 + $0x320] sm:$0xff] }
 0x8eb   :  { %5696 = vmatprep.subr.mxu1 %v6369_v7  ;;  %5731 = vmatprep.subr.mxu0 %v6370_v8  ;;  %v6428_v6 = vld [vmem:[%s8756_s2 + $0x3a0] sm:$0xff] }
 0x8ec   :  { %5697 = vmatpush3.msra.mxu1 %v6369_v7  ;;  %5732 = vmatpush3.msra.mxu0 %v6370_v8  ;;  %v6429_v7 = vld [vmem:[%s8756_s2 + $0x318] sm:$0xff] }
 0x8ed   :  { %5698 = vmatprep.subr.mxu1 %v6371_v9  ;;  %5733 = vmatprep.subr.mxu0 %v6372_v10  ;;  %v6430_v8 = vld [vmem:[%s8756_s2 + $0x398] sm:$0xff] }
 0x8ee   :  { %5699 = vmatpush3.msra.mxu1 %v6371_v9  ;;  %5734 = vmatpush3.msra.mxu0 %v6372_v10  ;;  %v6431_v9 = vld [vmem:[%s8756_s2 + $0x310] sm:$0xff] }
 0x8ef   :  { %5701 = vmatmul.mubr.f32.vlgmr.msra.gmra.mxu1 %v7747_v44  ;;  %5736 = vmatmul.mubr.f32.vlgmr.msra.gmra.mxu0 %v7747_v44  ;;  %v6432_v10 = vld [vmem:[%s8756_s2 + $0x390] sm:$0xff] }
 0x8f0   :  { %5738 = vmatprep.subr.mxu1 %v6373_v12  ;;  %5773 = vmatprep.subr.mxu0 %v6374_v13 }
 0x8f1   :  { %5739 = vmatpush3.msra.mxu1 %v6373_v12  ;;  %5770 = vmatprep.mubr.f32.mxu1 %v7745_v43  ;;  %v6433_v12 = vld [vmem:[%s8756_s2 + $0x308] sm:$0xff] }
 0x8f2   :  { %5774 = vmatpush3.msra.mxu0 %v6374_v13  ;;  %5805 = vmatprep.mubr.f32.mxu0 %v7745_v43  ;;  %v6434_v13 = vld [vmem:[%s8756_s2 + $0x388] sm:$0xff] }
 0x8f3   :  { %5740 = vmatprep.subr.mxu1 %v6375_v23  ;;  %5775 = vmatprep.subr.mxu0 %v6376_v14 }
 0x8f4   :  { %5741 = vmatpush3.msra.mxu1 %v6375_v23  ;;  %5776 = vmatpush3.msra.mxu0 %v6376_v14  ;;  %v6435_v23 = vld [vmem:[%s8756_s2 + $0x300] sm:$0xff] }
 0x8f5   :  { %5742 = vmatprep.subr.mxu1 %v6377_v15  ;;  %5777 = vmatprep.subr.mxu0 %v6378_v16  ;;  %v6436_v14 = vld [vmem:[%s8756_s2 + $0x380] sm:$0xff] }
 0x8f6   :  { %5743 = vmatpush3.msra.mxu1 %v6377_v15  ;;  %5778 = vmatpush3.msra.mxu0 %v6378_v16  ;;  %v6437_v15 = vld [vmem:[%s8756_s2 + $0x478] sm:$0xff]  ;;  %v6438_v16 = vld [vmem:[%s8756_s2 + $0x470] sm:$0xff] }
 0x8f7   :  { %5744 = vmatprep.subr.mxu1 %v6379_v17  ;;  %5779 = vmatprep.subr.mxu0 %v6380_v18 }
 0x8f8   :  { %5745 = vmatpush3.msra.mxu1 %v6379_v17  ;;  %5780 = vmatpush3.msra.mxu0 %v6380_v18  ;;  %v6439_v17 = vld [vmem:[%s8756_s2 + $0x468] sm:$0xff]  ;;  %v6440_v18 = vld [vmem:[%s8756_s2 + $0x460] sm:$0xff] }
 0x8f9   :  { %5746 = vmatprep.subr.mxu1 %v6381_v20  ;;  %5781 = vmatprep.subr.mxu0 %v6382_v24 }
 0x8fa   :  { %5747 = vmatpush3.msra.mxu1 %v6381_v20  ;;  %5782 = vmatpush3.msra.mxu0 %v6382_v24  ;;  %v6442_v20 = vld [vmem:[%s8756_s2 + $0x450] sm:$0xff]  ;;  %v6443_v24 = vld [vmem:[%s8756_s2 + $0x448] sm:$0xff] }
 0x8fb   :  { %5748 = vmatprep.subr.mxu1 %v6383_v25  ;;  %5783 = vmatprep.subr.mxu0 %v6384_v22 }
 0x8fc   :  { %5749 = vmatpush3.msra.mxu1 %v6383_v25  ;;  %5784 = vmatpush3.msra.mxu0 %v6384_v22  ;;  %v6444_v25 = vld [vmem:[%s8756_s2 + $0x440] sm:$0xff]  ;;  %v6445_v22 = vld [vmem:[%s8756_s2 + $0x438] sm:$0xff] }
 0x8fd   :  { %5750 = vmatprep.subr.mxu1 %v6385_v26  ;;  %5785 = vmatprep.subr.mxu0 %v6386_v27 }
 0x8fe   :  { %5751 = vmatpush3.msra.mxu1 %v6385_v26  ;;  %5786 = vmatpush3.msra.mxu0 %v6386_v27  ;;  %v6446_v26 = vld [vmem:[%s8756_s2 + $0x430] sm:$0xff]  ;;  %v6447_v27 = vld [vmem:[%s8756_s2 + $0x428] sm:$0xff] }
 0x8ff   :  { %5752 = vmatprep.subr.mxu1 %v6387_v28  ;;  %5787 = vmatprep.subr.mxu0 %v6388_v29 }
 0x900   :  { %5753 = vmatpush3.msra.mxu1 %v6387_v28  ;;  %5788 = vmatpush3.msra.mxu0 %v6388_v29  ;;  %v6448_v28 = vld [vmem:[%s8756_s2 + $0x420] sm:$0xff]  ;;  %v6449_v29 = vld [vmem:[%s8756_s2 + $0x418] sm:$0xff] }
 0x901   :  { %5754 = vmatprep.subr.mxu1 %v6389_v30  ;;  %5789 = vmatprep.subr.mxu0 %v6390_v31 }
 0x902   :  { %5755 = vmatpush3.msra.mxu1 %v6389_v30  ;;  %5790 = vmatpush3.msra.mxu0 %v6390_v31  ;;  %v6450_v30 = vld [vmem:[%s8756_s2 + $0x410] sm:$0xff]  ;;  %v6451_v31 = vld [vmem:[%s8756_s2 + $0x408] sm:$0xff] }
 0x903   :  { %5756 = vmatprep.subr.mxu1 %v6391_v32  ;;  %5791 = vmatprep.subr.mxu0 %v6392_v33 }
 0x904   :  { %5757 = vmatpush3.msra.mxu1 %v6391_v32  ;;  %5792 = vmatpush3.msra.mxu0 %v6392_v33  ;;  %v6452_v32 = vld [vmem:[%s8756_s2 + $0x400] sm:$0xff] }
 0x905   :  { %5758 = vmatprep.subr.mxu1 %v6393_v34  ;;  %5793 = vmatprep.subr.mxu0 %v6394_v35  ;;  %v2710_v33 = vld [vmem:[%s8764_s17] sm:$0xff] }
 0x906   :  { %5759 = vmatpush3.msra.mxu1 %v6393_v34  ;;  %5794 = vmatpush3.msra.mxu0 %v6394_v35  ;;  %v6453_v34 = vld [vmem:[%s8792_s0] sm:$0xff]  ;;  %v2711_v35 = vld [vmem:[%s8764_s17 + $0x8] sm:$0xff] }
 0x907   :  { %5760 = vmatprep.subr.mxu1 %v6395_v36  ;;  %5795 = vmatprep.subr.mxu0 %v6396_v19 }
 0x908   :  { %5761 = vmatpush3.msra.mxu1 %v6395_v36  ;;  %5796 = vmatpush3.msra.mxu0 %v6396_v19  ;;  %v8112_v36 = vld [vmem:[%s8791_s13 + $0x78] sm:$0xff]  ;;  %v8127_v19 = vld [vmem:[%s8791_s13 + $0x68] sm:$0xff] }
 0x909   :  { %5762 = vmatprep.subr.mxu1 %v6397_v40  ;;  %5797 = vmatprep.subr.mxu0 %v6398_v37  ;;  %vm3540_vm7 = vcmp.gt.f32.partialorder %v8112_v36, 0.5  ;;  %vm3538_vm9 = vcmp.gt.f32.partialorder %v8127_v19, 0.5 }
 0x90a   :  { %5763 = vmatpush3.msra.mxu1 %v6397_v40  ;;  %5798 = vmatpush3.msra.mxu0 %v6398_v37  ;;  %v8134_v40 = vld [vmem:[%s8791_s13 + $0x60] sm:$0xff]  ;;  %v8141_v37 = vld [vmem:[%s8791_s13 + $0x58] sm:$0xff] }
 0x90b   :  { %5764 = vmatprep.subr.mxu1 %v6399_v21  ;;  %5799 = vmatprep.subr.mxu0 %v6400_v38  ;;  %vm3537_vm10 = vcmp.gt.f32.partialorder %v8134_v40, 0.5  ;;  %vm3536_vm11 = vcmp.gt.f32.partialorder %v8141_v37, 0.5 }
 0x90c   :  { %5765 = vmatpush3.msra.mxu1 %v6399_v21  ;;  %5800 = vmatpush3.msra.mxu0 %v6400_v38  ;;  %v8148_v21 = vld [vmem:[%s8791_s13 + $0x50] sm:$0xff]  ;;  %v8155_v38 = vld [vmem:[%s8791_s13 + $0x48] sm:$0xff] }
 0x90d   :  { %5766 = vmatprep.subr.mxu1 %v6401_v39  ;;  %5801 = vmatprep.subr.mxu0 %v6402_v42  ;;  %vm3535_vm12 = vcmp.gt.f32.partialorder %v8148_v21, 0.5  ;;  %vm3534_vm13 = vcmp.gt.f32.partialorder %v8155_v38, 0.5 }
 0x90e   :  { %5767 = vmatpush3.msra.mxu1 %v6401_v39  ;;  %5802 = vmatpush3.msra.mxu0 %v6402_v42  ;;  %v8162_v39 = vld [vmem:[%s8791_s13 + $0x40] sm:$0xff]  ;;  %v8169_v42 = vld [vmem:[%s8791_s13 + $0x38] sm:$0xff] }
 0x90f   :  { %5768 = vmatprep.subr.mxu1 %v6403_v45  ;;  %5803 = vmatprep.subr.mxu0 %v6404_v46  ;;  %vm3533_vm14 = vcmp.gt.f32.partialorder %v8162_v39, 0.5  ;;  %vm3532_vm15 = vcmp.gt.f32.partialorder %v8169_v42, 0.5 }
 0x910   :  { %5769 = vmatpush3.msra.mxu1 %v6403_v45  ;;  %5804 = vmatpush3.msra.mxu0 %v6404_v46  ;;  %v8176_v45 = vld [vmem:[%s8791_s13 + $0x30] sm:$0xff]  ;;  %v8183_v46 = vld [vmem:[%s8791_s13 + $0x28] sm:$0xff] }
 0x911   :  { %5771 = vmatmul.mubr.f32.vlgmr.msra.gmra.mxu1 %v7747_v44  ;;  %5806 = vmatmul.mubr.f32.vlgmr.msra.gmra.mxu0 %v7747_v44 }
 0x912   :  { %5808 = vmatprep.subr.mxu1 %v6405_v41  ;;  %5843 = vmatprep.subr.mxu0 %v6406_v47 }
 0x913   :  { %5809 = vmatpush3.msra.mxu1 %v6405_v41  ;;  %5840 = vmatprep.mubr.f32.mxu1 %v7745_v43  ;;  %v8190_v41 = vld [vmem:[%s8791_s13 + $0x20] sm:$0xff] }
 0x914   :  { %5844 = vmatpush3.msra.mxu0 %v6406_v47  ;;  %5875 = vmatprep.mubr.f32.mxu0 %v7745_v43  ;;  %v8197_v47 = vld [vmem:[%s8791_s13 + $0x18] sm:$0xff]  ;;  %vm3529_vm2 = vcmp.gt.f32.partialorder %v8190_v41, 0.5 }
 0x915   :  { %5810 = vmatprep.subr.mxu1 %v6407_v48  ;;  %5845 = vmatprep.subr.mxu0 %v6408_v49  ;;  %vm3528_vm3 = vcmp.gt.f32.partialorder %v8197_v47, 0.5 }
 0x916   :  { %5811 = vmatpush3.msra.mxu1 %v6407_v48  ;;  %5846 = vmatpush3.msra.mxu0 %v6408_v49  ;;  %v8204_v48 = vld [vmem:[%s8791_s13 + $0x10] sm:$0xff]  ;;  %v8211_v49 = vld [vmem:[%s8791_s13 + $0x8] sm:$0xff] }
 0x917   :  { %5812 = vmatprep.subr.mxu1 %v6409_v50  ;;  %5847 = vmatprep.subr.mxu0 %v6410_v51  ;;  %vm3527_vm5 = vcmp.gt.f32.partialorder %v8204_v48, 0.5  ;;  %vm3526_vm6 = vcmp.gt.f32.partialorder %v8211_v49, 0.5 }
 0x918   :  { %5813 = vmatpush3.msra.mxu1 %v6409_v50  ;;  %5848 = vmatpush3.msra.mxu0 %v6410_v51  ;;  %v8218_v50 = vld [vmem:[%s8791_s13] sm:$0xff]  ;;  %v2614_v51 = vld [vmem:[%s8765_s15 + $0x8] sm:$0xff] }
 0x919   :  { %5814 = vmatprep.subr.mxu1 %v6411_v52  ;;  %5849 = vmatprep.subr.mxu0 %v6412_v53 }
 0x91a   :  { %5815 = vmatpush3.msra.mxu1 %v6411_v52  ;;  %5850 = vmatpush3.msra.mxu0 %v6412_v53 }
 0x91b   :  { %5816 = vmatprep.subr.mxu1 %v6413_v54  ;;  %5851 = vmatprep.subr.mxu0 %v6414_v55 }
 0x91c   :  { %5817 = vmatpush3.msra.mxu1 %v6413_v54  ;;  %5852 = vmatpush3.msra.mxu0 %v6414_v55 }
 0x91d   :  { %5818 = vmatprep.subr.mxu1 %v6415_v56  ;;  %5853 = vmatprep.subr.mxu0 %v6416_v57 }
 0x91e   :  { %5819 = vmatpush3.msra.mxu1 %v6415_v56  ;;  %5854 = vmatpush3.msra.mxu0 %v6416_v57 }
 0x91f   :  { %5820 = vmatprep.subr.mxu1 %v6417_v58  ;;  %5855 = vmatprep.subr.mxu0 %v6418_v59 }
 0x920   :  { %5821 = vmatpush3.msra.mxu1 %v6417_v58  ;;  %5856 = vmatpush3.msra.mxu0 %v6418_v59 }
 0x921   :  { %5822 = vmatprep.subr.mxu1 %v6419_v60  ;;  %5857 = vmatprep.subr.mxu0 %v6420_v61 }
 0x922   :  { %5823 = vmatpush3.msra.mxu1 %v6419_v60  ;;  %5858 = vmatpush3.msra.mxu0 %v6420_v61 }
 0x923   :  { %5824 = vmatprep.subr.mxu1 %v6421_v62  ;;  %5859 = vmatprep.subr.mxu0 %v6422_v63 }
 0x924   :  { %5825 = vmatpush3.msra.mxu1 %v6421_v62  ;;  %5860 = vmatpush3.msra.mxu0 %v6422_v63 }
 0x925   :  { %5826 = vmatprep.subr.mxu1 %v6423_v1  ;;  %5861 = vmatprep.subr.mxu0 %v6424_v2 }
 0x926   :  { %5827 = vmatpush3.msra.mxu1 %v6423_v1  ;;  %5862 = vmatpush3.msra.mxu0 %v6424_v2 }
 0x927   :  { %5828 = vmatprep.subr.mxu1 %v6425_v3  ;;  %5863 = vmatprep.subr.mxu0 %v6426_v4 }
 0x928   :  { %5829 = vmatpush3.msra.mxu1 %v6425_v3  ;;  %5864 = vmatpush3.msra.mxu0 %v6426_v4 }
 0x929   :  { %5830 = vmatprep.subr.mxu1 %v6427_v5  ;;  %5865 = vmatprep.subr.mxu0 %v6428_v6 }
 0x92a   :  { %5831 = vmatpush3.msra.mxu1 %v6427_v5  ;;  %5866 = vmatpush3.msra.mxu0 %v6428_v6  ;;  %v2613_v6 = vld [vmem:[%s8765_s15] sm:$0xff] }
 0x92b   :  { %5832 = vmatprep.subr.mxu1 %v6429_v7  ;;  %5867 = vmatprep.subr.mxu0 %v6430_v8 }
 0x92c   :  { %5833 = vmatpush3.msra.mxu1 %v6429_v7  ;;  %5868 = vmatpush3.msra.mxu0 %v6430_v8  ;;  %v2616_v8 = vld [vmem:[%s8765_s15 + $0x18] sm:$0xff] }
 0x92d   :  { %5834 = vmatprep.subr.mxu1 %v6431_v9  ;;  %5869 = vmatprep.subr.mxu0 %v6432_v10 }
 0x92e   :  { %5835 = vmatpush3.msra.mxu1 %v6431_v9  ;;  %5870 = vmatpush3.msra.mxu0 %v6432_v10  ;;  %v2615_v9 = vld [vmem:[%s8765_s15 + $0x10] sm:$0xff]  ;;  %s8802_s15 = sld [smem:[#allocation13_spill]] }
 0x92f   :  { %5836 = vmatprep.subr.mxu1 %v6433_v12  ;;  %5871 = vmatprep.subr.mxu0 %v6434_v13 }
 0x930   :  { %5837 = vmatpush3.msra.mxu1 %v6433_v12  ;;  %5872 = vmatpush3.msra.mxu0 %v6434_v13  ;;  %v2622_v12 = vpop.permute.xlu0 %2621  ;;  %v2717_v13 = vpop.permute.xlu1 %2716 }
 0x931   :  { %5838 = vmatprep.subr.mxu1 %v6435_v23  ;;  %5873 = vmatprep.subr.mxu0 %v6436_v14 }
 0x932   :  { %5839 = vmatpush3.msra.mxu1 %v6435_v23  ;;  %5874 = vmatpush3.msra.mxu0 %v6436_v14 }
 0x933   :  { %5841 = vmatmul.mubr.f32.vlgmr.msra.gmra.mxu1 %v7747_v44  ;;  %5876 = vmatmul.mubr.f32.vlgmr.msra.gmra.mxu0 %v7747_v44 }
 0x934   :  { %5878 = vmatprep.subr.mxu1 %v6437_v15  ;;  %5910 = vmatprep.mubr.f32.mxu1 %v7745_v43  ;;  %v6441_v43 = vld [vmem:[%s8756_s2 + $0x458] sm:$0xff] }
 0x935   :  { %5879 = vmatpush3.msra.mxu1 %v6437_v15  ;;  %2635 = vmatprep.subr.mxu0 %v6472_v0 }
 0x936   :  { %5880 = vmatprep.subr.mxu1 %v6438_v16  ;;  %4477 = vmatprep.mubr.msk.f32.mxu0 %vm1491_vm4, %v2614_v51 }
 0x937   :  { %5881 = vmatpush3.msra.mxu1 %v6438_v16 }
 0x938   :  { %5882 = vmatprep.subr.mxu1 %v6439_v17 }
 0x939   :  { %5883 = vmatpush3.msra.mxu1 %v6439_v17 }
 0x93a   :  { %5884 = vmatprep.subr.mxu1 %v6440_v18 }
 0x93b   :  { %5885 = vmatpush3.msra.mxu1 %v6440_v18  ;;  %v2627_v18 = vpop.permute.xlu0 %2626 }
 0x93c   :  { %5886 = vmatprep.subr.mxu1 %v6441_v43 }
 0x93d   :  { %5887 = vmatpush3.msra.mxu1 %v6441_v43 }
 0x93e   :  { %5888 = vmatprep.subr.mxu1 %v6442_v20 }
 0x93f   :  { %5889 = vmatpush3.msra.mxu1 %v6442_v20  ;;  %v2722_v20 = vpop.permute.xlu1 %2721 }
 0x940   :  { %5890 = vmatprep.subr.mxu1 %v6443_v24 }
 0x941   :  { %5891 = vmatpush3.msra.mxu1 %v6443_v24 }
 0x942   :  { %5892 = vmatprep.subr.mxu1 %v6444_v25 }
 0x943   :  { %5893 = vmatpush3.msra.mxu1 %v6444_v25 }
 0x944   :  { %5894 = vmatprep.subr.mxu1 %v6445_v22 }
 0x945   :  { %5895 = vmatpush3.msra.mxu1 %v6445_v22 }
 0x946   :  { %5896 = vmatprep.subr.mxu1 %v6446_v26 }
 0x947   :  { %5897 = vmatpush3.msra.mxu1 %v6446_v26 }
 0x948   :  { %5898 = vmatprep.subr.mxu1 %v6447_v27 }
 0x949   :  { %5899 = vmatpush3.msra.mxu1 %v6447_v27 }
 0x94a   :  { %5900 = vmatprep.subr.mxu1 %v6448_v28 }
 0x94b   :  { %5901 = vmatpush3.msra.mxu1 %v6448_v28 }
 0x94c   :  { %5902 = vmatprep.subr.mxu1 %v6449_v29 }
 0x94d   :  { %5903 = vmatpush3.msra.mxu1 %v6449_v29  ;;  %v6470_v29 = vld [vmem:[%s8762_s5] sm:$0xff] }
 0x94e   :  { %5904 = vmatprep.subr.mxu1 %v6450_v30 }
 0x94f   :  { %5905 = vmatpush3.msra.mxu1 %v6450_v30 }
 0x950   :  { %5906 = vmatprep.subr.mxu1 %v6451_v31 }
 0x951   :  { %5907 = vmatpush3.msra.mxu1 %v6451_v31 }
 0x952   :  { %5908 = vmatprep.subr.mxu1 %v6452_v32 }
 0x953   :  { %5909 = vmatpush3.msra.mxu1 %v6452_v32  ;;  %v6471_v32 = vld [vmem:[%s8762_s5 + $0x8] sm:$0xff] }
 0x954   :  { %5911 = vmatmul.mubr.f32.vlgmr.msra.gmra.mxu1 %v7747_v44  ;;  %5913 = vmatprep.subr.mxu1 %v6453_v34  ;;  %v8120_v44 = vld [vmem:[%s8791_s13 + $0x70] sm:$0xff] }
 0x955   :  { %5914 = vmatpush3.msra.mxu1 %v6453_v34  ;;  %5915 = vmatprep.mubr.msk.f32.mxu1 %vm168_vm1, %v2710_v33  ;;  %vm3539_vm8 = vcmp.gt.f32.partialorder %v8120_v44, 0.5 }
 0x956   :  { %5918 = vmatprep.subr.mxu1 %v8112_v36 }
 0x958   :  { %5916 = vmatmul.mubr.msk.f32.vlgmr.msra.gmra.mxu1 %vm168_vm1, %v2711_v35 }
 0x959   :  { %5919 = vmatpush3.msra.mxu1 %v8112_v36 }
 0x95a   :  { %5920 = vmatprep.subr.mxu1 %v8120_v44 }
 0x95b   :  { %5921 = vmatpush3.msra.mxu1 %v8120_v44 }
 0x95c   :  { %5922 = vmatprep.subr.mxu1 %v8127_v19 }
 0x95d   :  { %5923 = vmatpush3.msra.mxu1 %v8127_v19 }
 0x95e   :  { %5924 = vmatprep.subr.mxu1 %v8134_v40 }
 0x95f   :  { %5925 = vmatpush3.msra.mxu1 %v8134_v40 }
 0x960   :  { %5926 = vmatprep.subr.mxu1 %v8141_v37 }
 0x961   :  { %5927 = vmatpush3.msra.mxu1 %v8141_v37 }
 0x962   :  { %5928 = vmatprep.subr.mxu1 %v8148_v21 }
 0x963   :  { %5929 = vmatpush3.msra.mxu1 %v8148_v21 }
 0x964   :  { %5930 = vmatprep.subr.mxu1 %v8155_v38 }
 0x965   :  { %5931 = vmatpush3.msra.mxu1 %v8155_v38 }
 0x966   :  { %5932 = vmatprep.subr.mxu1 %v8162_v39 }
 0x967   :  { %5933 = vmatpush3.msra.mxu1 %v8162_v39 }
 0x968   :  { %5934 = vmatprep.subr.mxu1 %v8169_v42 }
 0x969   :  { %5935 = vmatpush3.msra.mxu1 %v8169_v42 }
 0x96a   :  { %5936 = vmatprep.subr.mxu1 %v8176_v45 }
 0x96b   :  { %5937 = vmatpush3.msra.mxu1 %v8176_v45 }
 0x96c   :  { %5938 = vmatprep.subr.mxu1 %v8183_v46 }
 0x96d   :  { %5939 = vmatpush3.msra.mxu1 %v8183_v46 }
 0x96e   :  { %5940 = vmatprep.subr.mxu1 %v8190_v41 }
 0x96f   :  { %5941 = vmatpush3.msra.mxu1 %v8190_v41 }
 0x970   :  { %5942 = vmatprep.subr.mxu1 %v8197_v47 }
 0x971   :  { %5943 = vmatpush3.msra.mxu1 %v8197_v47 }
 0x972   :  { %5944 = vmatprep.subr.mxu1 %v8204_v48 }
 0x973   :  { %5945 = vmatpush3.msra.mxu1 %v8204_v48 }
 0x974   :  { %5946 = vmatprep.subr.mxu1 %v8211_v49 }
 0x975   :  { %5947 = vmatpush3.msra.mxu1 %v8211_v49 }
 0x976   :  { %5948 = vmatprep.subr.mxu1 %v8218_v50 }
 0x977   :  { %5949 = vmatpush3.msra.mxu1 %v8218_v50 }
 0x98e   :  { %v5667_v52 = vpop.f32.mrf.mxu0  ;;  %v5632_v53 = vpop.f32.mrf.mxu1 }
 0x990   :  { %v2079_v54 = vpop.f32.mrf.mxu0  ;;  %v2004_v55 = vpop.f32.mrf.mxu1 }
 0x9af   :  { %v5737_v56 = vpop.f32.mrf.mxu0  ;;  %v5702_v57 = vpop.f32.mrf.mxu1 }
 0x9b1   :  { %v2229_v58 = vpop.f32.mrf.mxu0  ;;  %v2154_v59 = vpop.f32.mrf.mxu1 }
 0x9d1   :  { %v5807_v60 = vpop.f32.mrf.mxu0  ;;  %v5772_v61 = vpop.f32.mrf.mxu1 }
 0x9d3   :  { %v2379_v62 = vpop.f32.mrf.mxu0  ;;  %v2304_v63 = vpop.f32.mrf.mxu1 }
 0x9f3   :  { %v5877_v1 = vpop.f32.mrf.mxu0  ;;  %v5842_v2 = vpop.f32.mrf.mxu1 }
 0x9f4   :  { %2636 = vmatpush1.msra.mxu0 %v5877_v1 }
 0x9f5   :  { %v2529_v3 = vpop.f32.mrf.mxu0  ;;  %2637 = vmatprep.subr.mxu0 %v6472_v0  ;;  %v2454_v4 = vpop.f32.mrf.mxu1 }
 0x9f6   :  { %2638 = vmatpush1.msra.mxu0 %v2529_v3 }
 0x9f7   :  { %2639 = vmatprep.subr.mxu0 %v6472_v0 }
 0x9f8   :  { %2640 = vmatpush1.msra.mxu0 %v5842_v2 }
 0x9f9   :  { %2641 = vmatprep.subr.mxu0 %v6472_v0 }
 0x9fa   :  { %2642 = vmatpush1.msra.mxu0 %v2454_v4 }
 0x9fb   :  { %2643 = vmatprep.subr.mxu0 %v6472_v0 }
 0x9fc   :  { %2644 = vmatpush1.msra.mxu0 %v5807_v60 }
 0x9fd   :  { %2645 = vmatprep.subr.mxu0 %v6472_v0 }
 0x9fe   :  { %2646 = vmatpush1.msra.mxu0 %v2379_v62 }
 0x9ff   :  { %2647 = vmatprep.subr.mxu0 %v6472_v0 }
 0xa00   :  { %2648 = vmatpush1.msra.mxu0 %v5772_v61  ;;  %v3127_v61 = vpop.permute.xlu0 %3126 }
 0xa01   :  { %2649 = vmatprep.subr.mxu0 %v6472_v0 }
 0xa02   :  { %2650 = vmatpush1.msra.mxu0 %v2304_v63  ;;  %v3122_v63 = vpop.permute.xlu1 %3121 }
 0xa03   :  { %2651 = vmatprep.subr.mxu0 %v6472_v0 }
 0xa04   :  { %2652 = vmatpush1.msra.mxu0 %v5737_v56  ;;  %v3145_v56 = vld [vmem:[%s8766_s21] sm:$0xff] }
 0xa05   :  { %2653 = vmatprep.subr.mxu0 %v6472_v0 }
 0xa06   :  { %2654 = vmatpush1.msra.mxu0 %v2229_v58 }
 0xa07   :  { %2655 = vmatprep.subr.mxu0 %v6472_v0 }
 0xa08   :  { %2656 = vmatpush1.msra.mxu0 %v5702_v57 }
 0xa09   :  { %2657 = vmatprep.subr.mxu0 %v6472_v0 }
 0xa0a   :  { %2658 = vmatpush1.msra.mxu0 %v2154_v59 }
 0xa0b   :  { %2659 = vmatprep.subr.mxu0 %v6472_v0 }
 0xa0c   :  { %2660 = vmatpush1.msra.mxu0 %v5667_v52 }
 0xa0d   :  { %2661 = vmatprep.subr.mxu0 %v6472_v0 }
 0xa0e   :  { %2662 = vmatpush1.msra.mxu0 %v2079_v54 }
 0xa0f   :  { %2663 = vmatprep.subr.mxu0 %v6472_v0 }
 0xa10   :  { %2664 = vmatpush1.msra.mxu0 %v5632_v53 }
 0xa11   :  { %2665 = vmatprep.subr.mxu0 %v6472_v0 }
 0xa12   :  { %2666 = vmatpush1.msra.mxu0 %v2004_v55 }
 0xa13   :  { %2695 = vmatprep.subr.mxu0 %v6472_v0 }
 0xa14   :  { %v5912_v5 = vpop.f32.mrf.mxu1 }
 0xa15   :  { %2696 = vmatpush2.msra.mxu0 %v5912_v5  ;;  %v3141_v5 = vpop.permute.xlu0 %3140 }
 0xa16   :  { %v2604_v7 = vpop.f32.mrf.mxu1  ;;  %2697 = vmatprep.subr.mxu0 %v6472_v0 }
 0xa17   :  { %2698 = vmatpush2.msra.mxu0 %v2604_v7 }
 0xa18   :  { %2700 = vmatmul.mubr.f32.vlgmr.msra.gmra.mxu0 %v2613_v6  ;;  %v5917_v10 = vpop.f32.mrf.mxu1 }
 0xa19   :  { %4478 = vmatprep.mubr.msk.f32.mxu0 %vm1491_vm4, %v2616_v8  ;;  %v2802_v25 = vadd.f32 %v5917_v10, %v2722_v20  ;;  %v3136_v8 = vpop.permute.xlu1 %3135  ;;  %v3146_v10 = vld [vmem:[%s8766_s21 + $0x8] sm:$0xff] }
 0xa1a   :  { %v2796_v23 = vpop.f32.mrf.mxu1 }
 0xa1b   :  { %v2797_v15 = vadd.f32 %v2796_v23, %v2717_v13  ;;  %v3148_v13 = vld [vmem:[%s8766_s21 + $0x18] sm:$0xff]  ;;  %v3165_v23 = vpop.permute.xlu0 %3164 }
 0xa1c   :  { %2705 = vmatmul.mubr.f32.gmra.mxu0 %v2615_v9 }
 0xa1d   :  { %5957 = vmatprep.mubr.msk.f32.mxu0 %vm1491_vm4, %v7592_v11 }
 0xad8   :  { %v2701_v14 = vpop.f32.mrf.mxu0 }
 0xad9   :  { %v2702_v16 = vadd.f32 %v2701_v14, %v2622_v12  ;;  %v3147_v12 = vld [vmem:[%s8766_s21 + $0x10] sm:$0xff]  ;;  %v3149_v14 = vld [vmem:[%s8766_s21 + $0x20] sm:$0xff] }
 0xada   :  { %v2703_v17 = vpop.f32.mrf.mxu0 }
 0xadb   :  { %v2805_v43 = vadd.f32 %v2797_v15, %v2702_v16  ;;  %v3160_v15 = vpop.permute.xlu1 %3159  ;;  %v3150_v17 = vld [vmem:[%s8766_s21 + $0x28] sm:$0xff] }
 0xadc   :  { %v2706_v24 = vpop.f32.mrf.mxu0 }
 0xadd   :  { %v8255_v22 = vmul.f32 0.70710677, %v2805_v43  ;;  %v2707_v26 = vadd.f32 %v2706_v24, %v2627_v18  ;;  %v3175_v24 = vpop.permute.xlu0 %3174 }
 0xade   :  { %v2708_v27 = vpop.f32.mrf.mxu0 }
 0xadf   :  { %v2806_v28 = vadd.f32 %v2802_v25, %v2707_v26  ;;  %5950 = vmatprep.mubr.f32.mxu1 %v8255_v22  ;;  %v3170_v27 = vpop.permute.xlu1 %3169 }
 0xae1   :  { %v8258_v11 = vmul.f32 0.70710677, %v2806_v28 }
 0xae3   :  { %5951 = vmatmul.mubr.f32.vlgmr.msra.gmra.mxu1 %v8258_v11 }
 0xae4   :  { %5999 = vmatprep.mubr.msk.f32.mxu1 %vm1491_vm4, %v6470_v29 }
 0xba3   :  { %v5952_v30 = vpop.f32.mrf.mxu1 }
 0xba4   :  { %5953 = vmatprep.subr.mxu0 %v5952_v30 }
 0xba5   :  { %v2875_v31 = vpop.f32.mrf.mxu1  ;;  %5954 = vmatpush3.msra.mxu0 %v5952_v30 }
 0xba6   :  { %5955 = vmatprep.subr.mxu0 %v2875_v31 }
 0xba7   :  { %5956 = vmatpush3.msra.mxu0 %v2875_v31 }
 0xba8   :  { %5958 = vmatmul.mubr.msk.f32.vlgmr.msra.gmra.mxu0 %vm1491_vm4, %v6471_v32  ;;  %5960 = vmatprep.subr.mxu0 %v8112_v36 }
 0xba9   :  { %5961 = vmatpush3.msra.mxu0 %v8112_v36 }
 0xbaa   :  { %5962 = vmatprep.subr.mxu0 %v8120_v44 }
 0xbab   :  { %5963 = vmatpush3.msra.mxu0 %v8120_v44 }
 0xbac   :  { %5964 = vmatprep.subr.mxu0 %v8127_v19 }
 0xbad   :  { %5965 = vmatpush3.msra.mxu0 %v8127_v19 }
 0xbae   :  { %5966 = vmatprep.subr.mxu0 %v8134_v40 }
 0xbaf   :  { %5967 = vmatpush3.msra.mxu0 %v8134_v40 }
 0xbb0   :  { %5968 = vmatprep.subr.mxu0 %v8141_v37 }
 0xbb1   :  { %5969 = vmatpush3.msra.mxu0 %v8141_v37 }
 0xbb2   :  { %5970 = vmatprep.subr.mxu0 %v8148_v21 }
 0xbb3   :  { %5971 = vmatpush3.msra.mxu0 %v8148_v21 }
 0xbb4   :  { %5972 = vmatprep.subr.mxu0 %v8155_v38 }
 0xbb5   :  { %5973 = vmatpush3.msra.mxu0 %v8155_v38 }
 0xbb6   :  { %5974 = vmatprep.subr.mxu0 %v8162_v39 }
 0xbb7   :  { %5975 = vmatpush3.msra.mxu0 %v8162_v39 }
 0xbb8   :  { %5976 = vmatprep.subr.mxu0 %v8169_v42 }
 0xbb9   :  { %5977 = vmatpush3.msra.mxu0 %v8169_v42 }
 0xbba   :  { %5978 = vmatprep.subr.mxu0 %v8176_v45 }
 0xbbb   :  { %5979 = vmatpush3.msra.mxu0 %v8176_v45 }
 0xbbc   :  { %5980 = vmatprep.subr.mxu0 %v8183_v46 }
 0xbbd   :  { %5981 = vmatpush3.msra.mxu0 %v8183_v46 }
 0xbbe   :  { %5982 = vmatprep.subr.mxu0 %v8190_v41 }
 0xbbf   :  { %5983 = vmatpush3.msra.mxu0 %v8190_v41 }
 0xbc0   :  { %5984 = vmatprep.subr.mxu0 %v8197_v47 }
 0xbc1   :  { %5985 = vmatpush3.msra.mxu0 %v8197_v47 }
 0xbc2   :  { %5986 = vmatprep.subr.mxu0 %v8204_v48 }
 0xbc3   :  { %5987 = vmatpush3.msra.mxu0 %v8204_v48 }
 0xbc4   :  { %5988 = vmatprep.subr.mxu0 %v8211_v49 }
 0xbc5   :  { %5989 = vmatpush3.msra.mxu0 %v8211_v49 }
 0xbc6   :  { %5990 = vmatprep.subr.mxu0 %v8218_v50 }
 0xbc7   :  { %5991 = vmatpush3.msra.mxu0 %v8218_v50 }
 0xc68   :  { %v5959_v33 = vpop.f32.mrf.mxu0 }
 0xc69   :  { %v2960_v34 = vsub.f32 %v8258_v11, %v5959_v33 }
 0xc6a   :  { %v2950_v35 = vpop.f32.mrf.mxu0 }
 0xc6b   :  { %v2959_v51 = vsub.f32 %v8255_v22, %v2950_v35  ;;  %v2962_v53 = vmul.f32 %v2960_v34, %v2960_v34 }
 0xc6d   :  { %v2961_v52 = vmul.f32 %v2959_v51, %v2959_v51 }
 0xc6f   :  { %5992 = vmatprep.mubr.f32.mxu0 %v2961_v52 }
 0xc70   :  { %5993 = vmatmul.mubr.f32.vlgmr.msra.gmra.mxu0 %v2962_v53 }
 0xd30   :  { %v5994_v54 = vpop.f32.mrf.mxu0 }
 0xd31   :  { %5995 = vmatprep.subr.mxu1 %v5994_v54 }
 0xd32   :  { %v3029_v55 = vpop.f32.mrf.mxu0  ;;  %5996 = vmatpush3.msra.mxu1 %v5994_v54 }
 0xd33   :  { %5997 = vmatprep.subr.mxu1 %v3029_v55 }
 0xd34   :  { %5998 = vmatpush3.msra.mxu1 %v3029_v55 }
 0xd35   :  { %6000 = vmatmul.mubr.msk.f32.vlgmr.msra.gmra.mxu1 %vm1491_vm4, %v6471_v32 }
 0xd36   :  { %6006 = vmatprep.mubr.msk.f32.mxu1 %vm1491_vm4, %v3145_v56 }
 0xdf5   :  { %v6001_v57 = vpop.f32.mrf.mxu1 }
 0xdf6   :  { %v3110_v58 = vadd.f32 1e-05, %v6001_v57 }
 0xdf7   :  { %v3104_v59 = vpop.f32.mrf.mxu1 }
 0xdf8   :  { %6161 = vrsqrt.f32 %v3110_v58  ;;  %v3105_v60 = vadd.f32 1e-05, %v3104_v59 }
 0xdfa   :  { %6163 = vrsqrt.f32 %v3105_v60 }
 0xe05   :  { %v6162_v62 = vpop.eup %6161 }
 0xe06   :  { %v3116_v1 = vmul.f32 %v6162_v62, %v2960_v34 }
 0xe07   :  { %v6164_v2 = vpop.eup %6163 }
 0xe08   :  { %v3130_v3 = vmul.f32 %v3127_v61, %v3116_v1  ;;  %v3115_v4 = vmul.f32 %v6164_v2, %v2959_v51 }
 0xe0a   :  { %v3144_v6 = vadd.f32 %v3141_v5, %v3130_v3  ;;  %v3129_v7 = vmul.f32 %v3122_v63, %v3115_v4 }
 0xe0c   :  { %6002 = vmatprep.subr.mxu1 %v3144_v6  ;;  %v3143_v9 = vadd.f32 %v3136_v8, %v3129_v7 }
 0xe0d   :  { %6003 = vmatpush3.msra.mxu1 %v3144_v6 }
 0xe0e   :  { %6004 = vmatprep.subr.mxu1 %v3143_v9 }
 0xe0f   :  { %6005 = vmatpush3.msra.mxu1 %v3143_v9 }
 0xe10   :  { %6007 = vmatmul.mubr.msk.f32.vlgmr.msra.gmra.mxu1 %vm1491_vm4, %v3146_v10 }
 0xe11   :  { %6009 = vmatprep.mubr.msk.f32.mxu1 %vm1491_vm4, %v3147_v12 }
 0xe14   :  { %6010 = vmatmul.mubr.msk.f32.gmra.mxu1 %vm1491_vm4, %v3148_v13 }
 0xe15   :  { %6012 = vmatprep.mubr.msk.f32.mxu1 %vm1491_vm4, %v3149_v14 }
 0xe18   :  { %6013 = vmatmul.mubr.msk.f32.gmra.mxu1 %vm1491_vm4, %v3150_v17 }
 0xed0   :  { %v6008_v16 = vpop.f32.mrf.mxu1 }
 0xed1   :  { %v3277_v18 = vadd.f32 %v6008_v16, %v3165_v23 }
 0xed2   :  { %v3271_v43 = vpop.f32.mrf.mxu1 }
 0xed3   :  { %v3272_v20 = vadd.f32 %v3271_v43, %v3160_v15  ;;  %3771 = vxpose.xlu0.b32.start.end [1/1] (short) %v3277_v18, 128 }
 0xed4   :  { %v6011_v25 = vpop.f32.mrf.mxu1 }
 0xed5   :  { %v3287_v26 = vadd.f32 %v6011_v25, %v3175_v24  ;;  %3300 = vxpose.xlu1.b32.start.end [1/1] (short) %v3272_v20, 128 }
 0xed6   :  { %v3281_v28 = vpop.f32.mrf.mxu1 }
 0xed7   :  { %v3282_v29 = vadd.f32 %v3281_v28, %v3170_v27  ;;  %6076 = vmatprep.subr.mxu0 %v3287_v26 }
 0xed8   :  { %6077 = vmatpush3.msra.mxu0 %v3287_v26  ;;  %v8366_v14 = vpop.f32.mrf.mxu1 }
 0xed9   :  { %6015 = vmatprep.subr.mxu1 %v3282_v29  ;;  %6102 = vmatprep.subr.mxu0 %v6472_v0 }
 0xeda   :  { %6016 = vmatpush3.msra.mxu1 %v3282_v29  ;;  %v8368_v15 = vpop.f32.mrf.mxu1 }
 0xedb   :  { %6041 = vmatprep.subr.mxu1 %v6472_v0 }
 0xf4f   :  { %v3787_v30 = vpop.trf.xlu0 }
 0xf50   :  { %6078 = vmatprep.mubr.msk.f32.mxu0 %vm168_vm1, %v3787_v30 }
 0xf51   :  { %v3316_v31 = vpop.trf.xlu1 }
 0xf52   :  { %6017 = vmatprep.mubr.msk.f32.mxu1 %vm168_vm1, %v3316_v31 }
 0xf53   :  { %v3788_v32 = vpop.trf.xlu0 }
 0xf54   :  { %6079 = vmatmul.mubr.msk.f32.vlgmr.msra.gmra.mxu0 %vm168_vm1, %v3788_v32 }
 0xf55   :  { %v3317_v33 = vpop.trf.xlu1 }
 0xf56   :  { %6018 = vmatmul.mubr.msk.f32.vlgmr.msra.gmra.mxu1 %vm168_vm1, %v3317_v33 }
 0xf57   :  { %v3789_v34 = vpop.trf.xlu0 }
 0xf58   :  { %6081 = vmatprep.mubr.msk.f32.mxu0 %vm168_vm1, %v3789_v34 }
 0xf59   :  { %v3318_v35 = vpop.trf.xlu1 }
 0xf5a   :  { %6020 = vmatprep.mubr.msk.f32.mxu1 %vm168_vm1, %v3318_v35 }
 0xf5b   :  { %v3790_v51 = vpop.trf.xlu0 }
 0xf5c   :  { %6082 = vmatmul.mubr.msk.f32.gmra.mxu0 %vm168_vm1, %v3790_v51 }
 0xf5d   :  { %v3319_v52 = vpop.trf.xlu1 }
 0xf5e   :  { %6021 = vmatmul.mubr.msk.f32.gmra.mxu1 %vm168_vm1, %v3319_v52 }
 0xf5f   :  { %v3791_v53 = vpop.trf.xlu0 }
 0xf60   :  { %6084 = vmatprep.mubr.msk.f32.mxu0 %vm168_vm1, %v3791_v53 }
 0xf61   :  { %v3320_v54 = vpop.trf.xlu1 }
 0xf62   :  { %6023 = vmatprep.mubr.msk.f32.mxu1 %vm168_vm1, %v3320_v54 }
 0xf63   :  { %v3792_v55 = vpop.trf.xlu0 }
 0xf64   :  { %6085 = vmatmul.mubr.msk.f32.gmra.mxu0 %vm168_vm1, %v3792_v55 }
 0xf65   :  { %v3321_v56 = vpop.trf.xlu1 }
 0xf66   :  { %6024 = vmatmul.mubr.msk.f32.gmra.mxu1 %vm168_vm1, %v3321_v56 }
 0xf67   :  { %v3793_v57 = vpop.trf.xlu0 }
 0xf68   :  { %6087 = vmatprep.mubr.msk.f32.mxu0 %vm168_vm1, %v3793_v57 }
 0xf69   :  { %v3322_v58 = vpop.trf.xlu1 }
 0xf6a   :  { %6026 = vmatprep.mubr.msk.f32.mxu1 %vm168_vm1, %v3322_v58 }
 0xf6b   :  { %v3794_v59 = vpop.trf.xlu0 }
 0xf6c   :  { %6088 = vmatmul.mubr.msk.f32.gmra.mxu0 %vm168_vm1, %v3794_v59 }
 0xf6d   :  { %v3323_v60 = vpop.trf.xlu1 }
 0xf6e   :  { %6027 = vmatmul.mubr.msk.f32.gmra.mxu1 %vm168_vm1, %v3323_v60 }
 0xf6f   :  { %v3795_v61 = vpop.trf.xlu0 }
 0xf70   :  { %6090 = vmatprep.mubr.msk.f32.mxu0 %vm168_vm1, %v3795_v61 }
 0xf71   :  { %v3324_v62 = vpop.trf.xlu1 }
 0xf72   :  { %6029 = vmatprep.mubr.msk.f32.mxu1 %vm168_vm1, %v3324_v62 }
 0xf73   :  { %v3796_v63 = vpop.trf.xlu0 }
 0xf74   :  { %6091 = vmatmul.mubr.msk.f32.gmra.mxu0 %vm168_vm1, %v3796_v63 }
 0xf75   :  { %v3325_v1 = vpop.trf.xlu1 }
 0xf76   :  { %6030 = vmatmul.mubr.msk.f32.gmra.mxu1 %vm168_vm1, %v3325_v1 }
 0xf77   :  { %v3797_v2 = vpop.trf.xlu0 }
 0xf78   :  { %6093 = vmatprep.mubr.msk.f32.mxu0 %vm168_vm1, %v3797_v2 }
 0xf79   :  { %v3326_v3 = vpop.trf.xlu1 }
 0xf7a   :  { %6032 = vmatprep.mubr.msk.f32.mxu1 %vm168_vm1, %v3326_v3 }
 0xf7b   :  { %v3798_v4 = vpop.trf.xlu0 }
 0xf7c   :  { %6094 = vmatmul.mubr.msk.f32.gmra.mxu0 %vm168_vm1, %v3798_v4 }
 0xf7d   :  { %v3327_v5 = vpop.trf.xlu1 }
 0xf7e   :  { %6033 = vmatmul.mubr.msk.f32.gmra.mxu1 %vm168_vm1, %v3327_v5 }
 0xf7f   :  { %v3799_v6 = vpop.trf.xlu0 }
 0xf80   :  { %6096 = vmatprep.mubr.msk.f32.mxu0 %vm168_vm1, %v3799_v6 }
 0xf81   :  { %v3328_v7 = vpop.trf.xlu1 }
 0xf82   :  { %6035 = vmatprep.mubr.msk.f32.mxu1 %vm168_vm1, %v3328_v7 }
 0xf83   :  { %v3800_v8 = vpop.trf.xlu0 }
 0xf84   :  { %6097 = vmatmul.mubr.msk.f32.gmra.mxu0 %vm168_vm1, %v3800_v8 }
 0xf85   :  { %v3329_v9 = vpop.trf.xlu1 }
 0xf86   :  { %6036 = vmatmul.mubr.msk.f32.gmra.mxu1 %vm168_vm1, %v3329_v9 }
 0xf87   :  { %v3801_v10 = vpop.trf.xlu0 }
 0xf88   :  { %6099 = vmatprep.mubr.msk.f32.mxu0 %vm168_vm1, %v3801_v10 }
 0xf89   :  { %v3330_v12 = vpop.trf.xlu1 }
 0xf8a   :  { %6038 = vmatprep.mubr.msk.f32.mxu1 %vm168_vm1, %v3330_v12 }
 0xf8b   :  { %v3802_v13 = vpop.trf.xlu0 }
 0xf8c   :  { %6100 = vmatmul.mubr.msk.f32.gmra.mxu0 %vm168_vm1, %v3802_v13 }
 0xf8d   :  { %v3331_v23 = vpop.trf.xlu1  ;;  %6134 = vmatprep.mubr.msk.f32.mxu0 %vm6473_vm0, %v6472_v0 }
 0xf8e   :  { %6039 = vmatmul.mubr.msk.f32.gmra.mxu1 %vm168_vm1, %v3331_v23  ;;  %vm3530_vm1 = vcmp.gt.f32.partialorder %v8183_v46, 0.5 }
 0xf8f   :  { %6073 = vmatprep.mubr.msk.f32.mxu1 %vm6473_vm0, %v6472_v0  ;;  %vm3531_vm0 = vcmp.gt.f32.partialorder %v8176_v45, 0.5 }
0x1014   :  { %v8370_v16 = vpop.f32.mrf.mxu0 }
0x1016   :  { %v8372_v17 = vpop.f32.mrf.mxu1  ;;  %v8374_v18 = vpop.f32.mrf.mxu0 }
0x1017   :  { %v8517_v49 = vsel %vm3526_vm6, %v8372_v17, -1e+30 }
0x1018   :  { %v8376_v43 = vpop.f32.mrf.mxu1 }
0x101c   :  { %v8378_v20 = vpop.f32.mrf.mxu0 }
0x101e   :  { %v8380_v24 = vpop.f32.mrf.mxu1  ;;  %v8382_v25 = vpop.f32.mrf.mxu0 }
0x101f   :  { %v8500_v47 = vsel %vm3528_vm3, %v8380_v24, -1e+30 }
0x1020   :  { %v8384_v26 = vpop.f32.mrf.mxu1 }
0x1021   :  { %v8509_v48 = vsel %vm3527_vm5, %v8384_v26, -1e+30 }
0x1024   :  { %v8386_v27 = vpop.f32.mrf.mxu0 }
0x1025   :  { %v8468_v23 = vsel %vm3530_vm1, %v8386_v27, -1e+30  ;;  %v8486_v27 = vsel %vm3528_vm3, %v8378_v20, -1e+30  ;;  %v8504_v20 = vsel %vm3526_vm6, %v8370_v16, -1e+30 }
0x1026   :  { %v8388_v28 = vpop.f32.mrf.mxu1  ;;  %v8390_v29 = vpop.f32.mrf.mxu0 }
0x1027   :  { %v8482_v46 = vsel %vm3530_vm1, %v8388_v28, -1e+30 }
0x1028   :  { %v8392_v30 = vpop.f32.mrf.mxu1 }
0x1029   :  { %v8491_v41 = vsel %vm3529_vm2, %v8392_v30, -1e+30 }
0x102c   :  { %v6089_v31 = vpop.f32.mrf.mxu0 }
0x102d   :  { %v8452_v12 = vsel %vm3532_vm15, %v6089_v31, -1e+30  ;;  %v8477_v31 = vsel %vm3529_vm2, %v8390_v29, -1e+30  ;;  %v8495_v29 = vsel %vm3527_vm5, %v8382_v25, -1e+30 }
0x102e   :  { %v8394_v32 = vpop.f32.mrf.mxu1  ;;  %v3947_v33 = vpop.f32.mrf.mxu0 }
0x102f   :  { %v8459_v13 = vsel %vm3531_vm0, %v3947_v33, -1e+30  ;;  %v8464_v42 = vsel %vm3532_vm15, %v8394_v32, -1e+30 }
0x1030   :  { %v8396_v34 = vpop.f32.mrf.mxu1 }
0x1031   :  { %v8473_v45 = vsel %vm3531_vm0, %v8396_v34, -1e+30 }
0x1034   :  { %v6092_v35 = vpop.f32.mrf.mxu0 }
0x1035   :  { %v8438_v9 = vsel %vm3534_vm13, %v6092_v35, -1e+30 }
0x1036   :  { %v6031_v51 = vpop.f32.mrf.mxu1  ;;  %v3957_v52 = vpop.f32.mrf.mxu0 }
0x1037   :  { %v8445_v10 = vsel %vm3533_vm14, %v3957_v52, -1e+30  ;;  %v8449_v38 = vsel %vm3534_vm13, %v6031_v51, -1e+30 }
0x1038   :  { %v3486_v53 = vpop.f32.mrf.mxu1 }
0x1039   :  { %v8456_v39 = vsel %vm3533_vm14, %v3486_v53, -1e+30 }
0x103c   :  { %v6095_v54 = vpop.f32.mrf.mxu0 }
0x103d   :  { %v8424_v7 = vsel %vm3536_vm11, %v6095_v54, -1e+30 }
0x103e   :  { %v6034_v55 = vpop.f32.mrf.mxu1  ;;  %v3967_v56 = vpop.f32.mrf.mxu0 }
0x103f   :  { %v8431_v8 = vsel %vm3535_vm12, %v3967_v56, -1e+30  ;;  %v8435_v37 = vsel %vm3536_vm11, %v6034_v55, -1e+30 }
0x1040   :  { %v3496_v57 = vpop.f32.mrf.mxu1 }
0x1041   :  { %v8442_v21 = vsel %vm3535_vm12, %v3496_v57, -1e+30 }
0x1044   :  { %v6098_v58 = vpop.f32.mrf.mxu0 }
0x1045   :  { %v8410_v5 = vsel %vm3538_vm9, %v6098_v58, -1e+30 }
0x1046   :  { %v6037_v59 = vpop.f32.mrf.mxu1  ;;  %v3977_v60 = vpop.f32.mrf.mxu0 }
0x1047   :  { %v8417_v44 = vsel %vm3537_vm10, %v3977_v60, -1e+30  ;;  %v8421_v19 = vsel %vm3538_vm9, %v6037_v59, -1e+30 }
0x1048   :  { %v3506_v61 = vpop.f32.mrf.mxu1 }
0x1049   :  { %v8428_v40 = vsel %vm3537_vm10, %v3506_v61, -1e+30 }
0x104c   :  { %v6101_v62 = vpop.f32.mrf.mxu0 }
0x104d   :  { %v8399_v63 = vsel %vm3540_vm7, %v6101_v62, -1e+30 }
0x104e   :  { %4042 = vmax.xlane.f32.xlu0 %v8399_v63  ;;  %v6040_v1 = vpop.f32.mrf.mxu1  ;;  %v3987_v2 = vpop.f32.mrf.mxu0 }
0x104f   :  { %v8403_v3 = vsel %vm3540_vm7, %v6040_v1, -1e+30  ;;  %v8407_v4 = vsel %vm3539_vm8, %v3987_v2, -1e+30  ;;  %vm3525_vm7 = vcmp.gt.f32.partialorder %v8218_v50, 0.5 }
0x1050   :  { %3587 = vmax.xlane.f32.xlu1 %v8403_v3  ;;  %v3516_v36 = vpop.f32.mrf.mxu1  ;;  %v8513_v25 = vsel %vm3525_vm7, %v8374_v18, -1e+30  ;;  %v8521_v16 = vsel %vm3525_vm7, %v8376_v43, -1e+30 }
0x1051   :  { %v8414_v6 = vsel %vm3539_vm8, %v3516_v36, -1e+30 }
0x1052   :  { %4040 = vmax.xlane.f32.xlu0 %v8407_v4 }
0x1054   :  { %4038 = vmax.xlane.f32.xlu1 %v8410_v5 }
0x1056   :  { %3585 = vmax.xlane.f32.xlu0 %v8414_v6 }
0x1058   :  { %4036 = vmax.xlane.f32.xlu1 %v8417_v44 }
0x105a   :  { %3583 = vmax.xlane.f32.xlu0 %v8421_v19 }
0x105c   :  { %4034 = vmax.xlane.f32.xlu1 %v8424_v7 }
0x105e   :  { %3581 = vmax.xlane.f32.xlu0 %v8428_v40 }
0x1060   :  { %4032 = vmax.xlane.f32.xlu1 %v8431_v8 }
0x1062   :  { %3579 = vmax.xlane.f32.xlu0 %v8435_v37 }
0x1064   :  { %4030 = vmax.xlane.f32.xlu1 %v8438_v9 }
0x1066   :  { %3577 = vmax.xlane.f32.xlu0 %v8442_v21 }
0x1068   :  { %4028 = vmax.xlane.f32.xlu1 %v8445_v10 }
0x106a   :  { %3575 = vmax.xlane.f32.xlu0 %v8449_v38 }
0x106c   :  { %4026 = vmax.xlane.f32.xlu1 %v8452_v12 }
0x106e   :  { %3573 = vmax.xlane.f32.xlu0 %v8456_v39 }
0x1070   :  { %4024 = vmax.xlane.f32.xlu1 %v8459_v13 }
0x1072   :  { %3571 = vmax.xlane.f32.xlu0 %v8464_v42 }
0x1074   :  { %4022 = vmax.xlane.f32.xlu1 %v8468_v23 }
0x1076   :  { %3569 = vmax.xlane.f32.xlu0 %v8473_v45 }
0x1078   :  { %4020 = vmax.xlane.f32.xlu1 %v8477_v31 }
0x107a   :  { %3567 = vmax.xlane.f32.xlu0 %v8482_v46 }
0x107c   :  { %4018 = vmax.xlane.f32.xlu1 %v8486_v27 }
0x107e   :  { %3565 = vmax.xlane.f32.xlu0 %v8491_v41 }
0x1080   :  { %4016 = vmax.xlane.f32.xlu1 %v8495_v29 }
0x1082   :  { %3563 = vmax.xlane.f32.xlu0 %v8500_v47 }
0x1084   :  { %4014 = vmax.xlane.f32.xlu1 %v8504_v20 }
0x1086   :  { %3561 = vmax.xlane.f32.xlu0 %v8509_v48 }
0x1088   :  { %4012 = vmax.xlane.f32.xlu1 %v8513_v25 }
0x108a   :  { %3559 = vmax.xlane.f32.xlu0 %v8517_v49 }
0x108e   :  { %3557 = vmax.xlane.f32.xlu0 %v8521_v16 }
0x10d7   :  { %v4043_v50 = vpop.xlane.xlu0 %4042 }
0x10d8   :  { %v4059_v34 = vsub.f32 %v8399_v63, %v4043_v50 }
0x10d9   :  { %v3588_v24 = vpop.xlane.xlu1 %3587 }
0x10da   :  { %v3604_v43 = vsub.f32 %v8403_v3, %v3588_v24  ;;  %v4090_v54 = vmul.f32 1.442695, %v4059_v34 }
0x10db   :  { %v4041_v26 = vpop.xlane.xlu0 %4040 }
0x10dc   :  { %v4058_v55 = vsub.f32 %v8407_v4, %v4041_v26  ;;  %v3635_v58 = vmul.f32 1.442695, %v3604_v43 }
0x10dd   :  { %v4039_v28 = vpop.xlane.xlu1 %4038 }
0x10de   :  { %v4057_v30 = vsub.f32 %v8410_v5, %v4039_v28  ;;  %v4088_v61 = vmul.f32 1.442695, %v4058_v55 }
0x10df   :  { %v3586_v18 = vpop.xlane.xlu0 %3585 }
0x10e0   :  { %v4086_v32 = vmul.f32 1.442695, %v4057_v30  ;;  %v3603_v59 = vsub.f32 %v8414_v6, %v3586_v18 }
0x10e1   :  { %v4037_v33 = vpop.xlane.xlu1 %4036 }
0x10e2   :  { %6165 = vpow2.f32 %v4086_v32  ;;  %v4056_v17 = vsub.f32 %v8417_v44, %v4037_v33  ;;  %v3633_v1 = vmul.f32 1.442695, %v3603_v59 }
0x10e3   :  { %v3584_v35 = vpop.xlane.xlu0 %3583 }
0x10e4   :  { %v4084_v51 = vmul.f32 1.442695, %v4056_v17  ;;  %v3602_v52 = vsub.f32 %v8421_v19, %v3584_v35 }
0x10e5   :  { %v4035_v53 = vpop.xlane.xlu1 %4034 }
0x10e6   :  { %6167 = vpow2.f32 %v4084_v51  ;;  %v3631_v56 = vmul.f32 1.442695, %v3602_v52  ;;  %v4055_v62 = vsub.f32 %v8424_v7, %v4035_v53 }
0x10e7   :  { %v3582_v57 = vpop.xlane.xlu0 %3581 }
0x10e8   :  { %6169 = vpow2.f32 %v3631_v56  ;;  %v3601_v2 = vsub.f32 %v8428_v40, %v3582_v57  ;;  %v4082_v4 = vmul.f32 1.442695, %v4055_v62 }
0x10e9   :  { %v4033_v60 = vpop.xlane.xlu1 %4032  ;;  %6171 = vpow2.f32 %v4090_v54 }
0x10ea   :  { %6173 = vpow2.f32 %v3635_v58  ;;  %v4054_v36 = vsub.f32 %v8431_v8, %v4033_v60  ;;  %v3629_v6 = vmul.f32 1.442695, %v3601_v2 }
0x10eb   :  { %v3580_v63 = vpop.xlane.xlu0 %3579  ;;  %6175 = vpow2.f32 %v4088_v61 }
0x10ec   :  { %6177 = vpow2.f32 %v3633_v1  ;;  %v3600_v19 = vsub.f32 %v8435_v37, %v3580_v63  ;;  %v4080_v50 = vmul.f32 1.442695, %v4054_v36 }
0x10ed   :  { %v4031_v3 = vpop.xlane.xlu1 %4030  ;;  %6179 = vpow2.f32 %v4082_v4 }
0x10ee   :  { %v4053_v24 = vsub.f32 %v8438_v9, %v4031_v3  ;;  %6181 = vpow2.f32 %v3629_v6  ;;  %v3627_v28 = vmul.f32 1.442695, %v3600_v19 }
0x10ef   :  { %v8534_v5 = vpop.eup %6165  ;;  %v3578_v44 = vpop.xlane.xlu0 %3577  ;;  %6183 = vpow2.f32 %v4080_v50 }
0x10f0   :  { %4118 = vadd.xlane.f32.xlu1 %v8534_v5  ;;  %v3599_v8 = vsub.f32 %v8442_v21, %v3578_v44  ;;  %v4078_v37 = vmul.f32 1.442695, %v4053_v24  ;;  %6185 = vpow2.f32 %v3627_v28 }
0x10f1   :  { %v4029_v7 = vpop.xlane.xlu1 %4028 }
0x10f2   :  { %v4052_v32 = vsub.f32 %v8445_v10, %v4029_v7  ;;  %v3625_v34 = vmul.f32 1.442695, %v3599_v8  ;;  %6187 = vpow2.f32 %v4078_v37 }
0x10f3   :  { %v8539_v40 = vpop.eup %6167  ;;  %v3576_v26 = vpop.xlane.xlu0 %3575 }
0x10f4   :  { %4116 = vadd.xlane.f32.xlu1 %v8539_v40  ;;  %v3598_v17 = vsub.f32 %v8449_v38, %v3576_v26  ;;  %v4076_v43 = vmul.f32 1.442695, %v4052_v32  ;;  %6189 = vpow2.f32 %v3625_v34 }
0x10f5   :  { %v8543_v30 = vpop.eup %6169  ;;  %v4027_v18 = vpop.xlane.xlu1 %4026 }
0x10f6   :  { %3663 = vadd.xlane.f32.xlu0 %v8543_v30  ;;  %v8547_v33 = vpop.eup %6171  ;;  %v4051_v51 = vsub.f32 %v8452_v12, %v4027_v18  ;;  %v3623_v53 = vmul.f32 1.442695, %v3598_v17  ;;  %6191 = vpow2.f32 %v4076_v43 }
0x10f7   :  { %v3574_v9 = vpop.xlane.xlu0 %3573  ;;  %v8551_v21 = vpop.eup %6173 }
0x10f8   :  { %4122 = vadd.xlane.f32.xlu1 %v8547_v33  ;;  %v8555_v10 = vpop.eup %6175  ;;  %v3597_v54 = vsub.f32 %v8456_v39, %v3574_v9  ;;  %v4074_v56 = vmul.f32 1.442695, %v4051_v51  ;;  %6193 = vpow2.f32 %v3623_v53 }
0x10f9   :  { %v4025_v35 = vpop.xlane.xlu1 %4024  ;;  %v8559_v38 = vpop.eup %6177 }
0x10fa   :  { %3667 = vadd.xlane.f32.xlu0 %v8551_v21  ;;  %v4050_v57 = vsub.f32 %v8459_v13, %v4025_v35  ;;  %v8563_v12 = vpop.eup %6179  ;;  %v3621_v59 = vmul.f32 1.442695, %v3597_v54  ;;  %6195 = vpow2.f32 %v4074_v56 }
0x10fb   :  { %v3572_v52 = vpop.xlane.xlu0 %3571  ;;  %v8567_v39 = vpop.eup %6181 }
0x10fc   :  { %4120 = vadd.xlane.f32.xlu1 %v8555_v10  ;;  %v3596_v60 = vsub.f32 %v8464_v42, %v3572_v52  ;;  %v4072_v62 = vmul.f32 1.442695, %v4050_v57  ;;  %v8571_v13 = vpop.eup %6183  ;;  %6197 = vpow2.f32 %v3621_v59 }
0x10fd   :  { %v4023_v55 = vpop.xlane.xlu1 %4022  ;;  %v8575_v42 = vpop.eup %6185 }
0x10fe   :  { %3665 = vadd.xlane.f32.xlu0 %v8559_v38  ;;  %v4049_v63 = vsub.f32 %v8468_v23, %v4023_v55  ;;  %v3619_v2 = vmul.f32 1.442695, %v3596_v60  ;;  %6199 = vpow2.f32 %v4072_v62 }
0x10ff   :  { %v3570_v58 = vpop.xlane.xlu0 %3569  ;;  %v8579_v23 = vpop.eup %6187 }
0x1100   :  { %4114 = vadd.xlane.f32.xlu1 %v8563_v12  ;;  %v3595_v3 = vsub.f32 %v8473_v45, %v3570_v58  ;;  %v4070_v36 = vmul.f32 1.442695, %v4049_v63  ;;  %6201 = vpow2.f32 %v3619_v2 }
0x1101   :  { %v4021_v61 = vpop.xlane.xlu1 %4020  ;;  %v8583_v45 = vpop.eup %6189 }
0x1102   :  { %3661 = vadd.xlane.f32.xlu0 %v8567_v39  ;;  %v4048_v44 = vsub.f32 %v8477_v31, %v4021_v61  ;;  %v3617_v19 = vmul.f32 1.442695, %v3595_v3  ;;  %6203 = vpow2.f32 %v4070_v36 }
0x1103   :  { %v3568_v1 = vpop.xlane.xlu0 %3567  ;;  %v8587_v31 = vpop.eup %6191 }
0x1104   :  { %4112 = vadd.xlane.f32.xlu1 %v8571_v13  ;;  %v3594_v7 = vsub.f32 %v8482_v46, %v3568_v1  ;;  %v4068_v24 = vmul.f32 1.442695, %v4048_v44  ;;  %6205 = vpow2.f32 %v3617_v19 }
0x1105   :  { %v4019_v4 = vpop.xlane.xlu1 %4018  ;;  %v8591_v46 = vpop.eup %6193 }
0x1106   :  { %3659 = vadd.xlane.f32.xlu0 %v8575_v42  ;;  %v4047_v26 = vsub.f32 %v8486_v27, %v4019_v4  ;;  %v3615_v8 = vmul.f32 1.442695, %v3594_v7  ;;  %6207 = vpow2.f32 %v4068_v24  ;;  %v4228_v24 = vld [vmem:[%s8767_s24] sm:$0xff] }
0x1107   :  { %v3566_v6 = vpop.xlane.xlu0 %3565  ;;  %v8595_v27 = vpop.eup %6195 }
0x1108   :  { %4110 = vadd.xlane.f32.xlu1 %v8579_v23  ;;  %v3593_v18 = vsub.f32 %v8491_v41, %v3566_v6  ;;  %v4066_v32 = vmul.f32 1.442695, %v4047_v26  ;;  %6209 = vpow2.f32 %v3615_v8  ;;  %v4229_v26 = vld [vmem:[%s8767_s24 + $0x8] sm:$0xff] }
0x1109   :  { %v4017_v50 = vpop.xlane.xlu1 %4016  ;;  %v8599_v41 = vpop.eup %6197 }
0x110a   :  { %3657 = vadd.xlane.f32.xlu0 %v8583_v45  ;;  %v4046_v9 = vsub.f32 %v8495_v29, %v4017_v50  ;;  %v3613_v17 = vmul.f32 1.442695, %v3593_v18  ;;  %6211 = vpow2.f32 %v4066_v32  ;;  %v3156_v50 = vld [vmem:[%s8755_s22 + $0x28] sm:$0xff] }
0x110b   :  { %v3564_v28 = vpop.xlane.xlu0 %3563  ;;  %v8603_v29 = vpop.eup %6199 }
0x110c   :  { %4108 = vadd.xlane.f32.xlu1 %v8587_v31  ;;  %v3592_v35 = vsub.f32 %v8500_v47, %v3564_v28  ;;  %v4064_v43 = vmul.f32 1.442695, %v4046_v9  ;;  %6213 = vpow2.f32 %v3613_v17  ;;  %v3155_v28 = vld [vmem:[%s8755_s22 + $0x20] sm:$0xff] }
0x110d   :  { %v4015_v37 = vpop.xlane.xlu1 %4014  ;;  %v8607_v47 = vpop.eup %6201 }
0x110e   :  { %3655 = vadd.xlane.f32.xlu0 %v8591_v46  ;;  %v4045_v51 = vsub.f32 %v8504_v20, %v4015_v37  ;;  %v3611_v54 = vmul.f32 1.442695, %v3592_v35  ;;  %6215 = vpow2.f32 %v4064_v43 }
0x110f   :  { %v3562_v34 = vpop.xlane.xlu0 %3561  ;;  %v8611_v20 = vpop.eup %6203 }
0x1110   :  { %4106 = vadd.xlane.f32.xlu1 %v8595_v27  ;;  %v3591_v55 = vsub.f32 %v8509_v48, %v3562_v34  ;;  %v4062_v56 = vmul.f32 1.442695, %v4045_v51  ;;  %6217 = vpow2.f32 %v3611_v54 }
0x1111   :  { %v4013_v52 = vpop.xlane.xlu1 %4012  ;;  %v8615_v60 = vpop.eup %6205 }
0x1112   :  { %3653 = vadd.xlane.f32.xlu0 %v8599_v41  ;;  %v4044_v57 = vsub.f32 %v8513_v25, %v4013_v52  ;;  %v3609_v58 = vmul.f32 1.442695, %v3591_v55  ;;  %6219 = vpow2.f32 %v4062_v56 }
0x1113   :  { %v3560_v53 = vpop.xlane.xlu0 %3559  ;;  %v8618_v62 = vpop.eup %6207 }
0x1114   :  { %4104 = vadd.xlane.f32.xlu1 %v8603_v29  ;;  %v3590_v59 = vsub.f32 %v8517_v49, %v3560_v53  ;;  %v4060_v61 = vmul.f32 1.442695, %v4044_v57  ;;  %6221 = vpow2.f32 %v3609_v58 }
0x1115   :  { %v8622_v1 = vpop.eup %6209 }
0x1116   :  { %3651 = vadd.xlane.f32.xlu0 %v8607_v47  ;;  %v3607_v25 = vmul.f32 1.442695, %v3590_v59  ;;  %6223 = vpow2.f32 %v4060_v61 }
0x1117   :  { %v3558_v48 = vpop.xlane.xlu0 %3557  ;;  %v8625_v49 = vpop.eup %6211 }
0x1118   :  { %4102 = vadd.xlane.f32.xlu1 %v8611_v20  ;;  %v3589_v63 = vsub.f32 %v8521_v16, %v3558_v48  ;;  %6225 = vpow2.f32 %v3607_v25 }
0x1119   :  { %v8628_v3 = vpop.eup %6213 }
0x111a   :  { %3649 = vadd.xlane.f32.xlu0 %v8615_v60  ;;  %v3605_v2 = vmul.f32 1.442695, %v3589_v63 }
0x111b   :  { %v8631_v4 = vpop.eup %6215 }
0x111c   :  { %4100 = vadd.xlane.f32.xlu1 %v8618_v62  ;;  %6227 = vpow2.f32 %v3605_v2 }
0x111d   :  { %v8634_v16 = vpop.eup %6217 }
0x111e   :  { %3647 = vadd.xlane.f32.xlu0 %v8622_v1 }
0x111f   :  { %v8637_v36 = vpop.eup %6219 }
0x1120   :  { %4098 = vadd.xlane.f32.xlu1 %v8625_v49 }
0x1121   :  { %v8640_v44 = vpop.eup %6221 }
0x1122   :  { %3645 = vadd.xlane.f32.xlu0 %v8628_v3 }
0x1123   :  { %v8643_v6 = vpop.eup %6223 }
0x1124   :  { %4096 = vadd.xlane.f32.xlu1 %v8631_v4 }
0x1125   :  { %v8646_v19 = vpop.eup %6225 }
0x1126   :  { %3643 = vadd.xlane.f32.xlu0 %v8634_v16 }
0x1128   :  { %4094 = vadd.xlane.f32.xlu1 %v8637_v36 }
0x1129   :  { %v8649_v7 = vpop.eup %6227 }
0x112a   :  { %3641 = vadd.xlane.f32.xlu0 %v8640_v44 }
0x112c   :  { %4092 = vadd.xlane.f32.xlu1 %v8643_v6 }
0x112e   :  { %3639 = vadd.xlane.f32.xlu0 %v8646_v19 }
0x1132   :  { %3637 = vadd.xlane.f32.xlu0 %v8649_v7 }
0x113d   :  { %3184 = vperm.xlu1 %6148, %v3156_v50  }
0x1141   :  { %4232 = vperm.xlu1 %6148, %v4228_v24  }
0x1145   :  { %4237 = vperm.xlu1 %6148, %v4229_v26  }
0x1148   :  { %3179 = vperm.xlu0 %6147, %v3155_v28  }
0x1179   :  { %v4119_v8 = vpop.xlane.xlu1 %4118 }
0x117d   :  { %v4117_v18 = vpop.xlane.xlu1 %4116 }
0x117f   :  { %v3664_v37 = vpop.xlane.xlu0 %3663 }
0x1181   :  { %v4123_v32 = vpop.xlane.xlu1 %4122 }
0x1182   :  { %6229 = vrcp.f32 %v4123_v32 }
0x1183   :  { %v3668_v9 = vpop.xlane.xlu0 %3667 }
0x1184   :  { %6231 = vrcp.f32 %v3668_v9 }
0x1185   :  { %v4121_v34 = vpop.xlane.xlu1 %4120 }
0x1186   :  { %6233 = vrcp.f32 %v4121_v34 }
0x1187   :  { %6235 = vrcp.f32 %v4119_v8  ;;  %v3666_v17 = vpop.xlane.xlu0 %3665 }
0x1188   :  { %6237 = vrcp.f32 %v3666_v17 }
0x1189   :  { %v4115_v35 = vpop.xlane.xlu1 %4114  ;;  %6239 = vrcp.f32 %v3664_v37 }
0x118a   :  { %6241 = vrcp.f32 %v4117_v18 }
0x118b   :  { %v3662_v43 = vpop.xlane.xlu0 %3661 }
0x118c   :  { %6243 = vrcp.f32 %v3662_v43 }
0x118d   :  { %v4113_v51 = vpop.xlane.xlu1 %4112  ;;  %6245 = vrcp.f32 %v4115_v35 }
0x118f   :  { %v6230_v52 = vpop.eup %6229  ;;  %v3660_v53 = vpop.xlane.xlu0 %3659 }
0x1190   :  { %v4155_v54 = vmul.f32 %v6230_v52, %v8547_v33  ;;  %6247 = vrcp.f32 %v3660_v53 }
0x1191   :  { %v6232_v55 = vpop.eup %6231  ;;  %v4111_v56 = vpop.xlane.xlu1 %4110  ;;  %6249 = vrcp.f32 %v4113_v51 }
0x1192   :  { %6103 = vmatpush3.xpose.msra.mxu0 %v4155_v54  ;;  %v3700_v57 = vmul.f32 %v6232_v55, %v8551_v21 }
0x1193   :  { %v6234_v58 = vpop.eup %6233  ;;  %v3658_v59 = vpop.xlane.xlu0 %3657  ;;  %6104 = vmatprep.subr.mxu0 %v6472_v0 }
0x1194   :  { %v6236_v48 = vpop.eup %6235  ;;  %6042 = vmatpush3.xpose.msra.mxu1 %v3700_v57  ;;  %v4154_v61 = vmul.f32 %v6234_v58, %v8555_v10  ;;  %6251 = vrcp.f32 %v3658_v59 }
0x1195   :  { %v6238_v25 = vpop.eup %6237  ;;  %v4109_v63 = vpop.xlane.xlu1 %4108  ;;  %6043 = vmatprep.subr.mxu1 %v6472_v0  ;;  %6253 = vrcp.f32 %v4111_v56  ;;  %v4153_v21 = vmul.f32 %v6236_v48, %v8534_v5 }
0x1196   :  { %6105 = vmatpush3.xpose.msra.mxu0 %v4154_v61  ;;  %v3699_v33 = vmul.f32 %v6238_v25, %v8559_v38  ;;  %v6240_v2 = vpop.eup %6239 }
0x1197   :  { %v3656_v50 = vpop.xlane.xlu0 %3655  ;;  %6106 = vmatprep.subr.mxu0 %v6472_v0  ;;  %v6242_v24 = vpop.eup %6241  ;;  %v3698_v10 = vmul.f32 %v6240_v2, %v8543_v30 }
0x1198   :  { %6044 = vmatpush3.xpose.msra.mxu1 %v3699_v33  ;;  %6255 = vrcp.f32 %v3656_v50  ;;  %v4152_v38 = vmul.f32 %v6242_v24, %v8539_v40 }
0x1199   :  { %v4107_v26 = vpop.xlane.xlu1 %4106  ;;  %6045 = vmatprep.subr.mxu1 %v6472_v0  ;;  %v6244_v28 = vpop.eup %6243  ;;  %6257 = vrcp.f32 %v4109_v63 }
0x119a   :  { %6107 = vmatpush3.xpose.msra.mxu0 %v4153_v21  ;;  %v6246_v18 = vpop.eup %6245  ;;  %v3697_v5 = vmul.f32 %v6244_v28, %v8567_v39 }
0x119b   :  { %v3654_v8 = vpop.xlane.xlu0 %3653  ;;  %6108 = vmatprep.subr.mxu0 %v6472_v0  ;;  %v4151_v30 = vmul.f32 %v6246_v18, %v8563_v12 }
0x119c   :  { %6046 = vmatpush3.xpose.msra.mxu1 %v3698_v10  ;;  %6259 = vrcp.f32 %v3654_v8 }
0x119d   :  { %v4105_v37 = vpop.xlane.xlu1 %4104  ;;  %6047 = vmatprep.subr.mxu1 %v6472_v0  ;;  %v6248_v32 = vpop.eup %6247  ;;  %6261 = vrcp.f32 %v4107_v26 }
0x119e   :  { %6109 = vmatpush3.xpose.msra.mxu0 %v4152_v38  ;;  %v6250_v34 = vpop.eup %6249  ;;  %v3696_v40 = vmul.f32 %v6248_v32, %v8575_v42 }
0x119f   :  { %v3652_v9 = vpop.xlane.xlu0 %3651  ;;  %6110 = vmatprep.subr.mxu0 %v6472_v0  ;;  %v4150_v39 = vmul.f32 %v6250_v34, %v8571_v13 }
0x11a0   :  { %6048 = vmatpush3.xpose.msra.mxu1 %v3697_v5  ;;  %6263 = vrcp.f32 %v3652_v9 }
0x11a1   :  { %v4103_v17 = vpop.xlane.xlu1 %4102  ;;  %6049 = vmatprep.subr.mxu1 %v6472_v0  ;;  %v6252_v35 = vpop.eup %6251  ;;  %6265 = vrcp.f32 %v4105_v37 }
0x11a2   :  { %6111 = vmatpush3.xpose.msra.mxu0 %v4151_v30  ;;  %v6254_v51 = vpop.eup %6253  ;;  %v3695_v12 = vmul.f32 %v6252_v35, %v8583_v45 }
0x11a3   :  { %v3650_v43 = vpop.xlane.xlu0 %3649  ;;  %6112 = vmatprep.subr.mxu0 %v6472_v0  ;;  %v4149_v42 = vmul.f32 %v6254_v51, %v8579_v23 }
0x11a4   :  { %6050 = vmatpush3.xpose.msra.mxu1 %v3696_v40  ;;  %6267 = vrcp.f32 %v3650_v43 }
0x11a5   :  { %v4101_v52 = vpop.xlane.xlu1 %4100  ;;  %6051 = vmatprep.subr.mxu1 %v6472_v0  ;;  %v6256_v53 = vpop.eup %6255  ;;  %6269 = vrcp.f32 %v4103_v17 }
0x11a6   :  { %6113 = vmatpush3.xpose.msra.mxu0 %v4150_v39  ;;  %v6258_v55 = vpop.eup %6257  ;;  %v3694_v13 = vmul.f32 %v6256_v53, %v8591_v46 }
0x11a7   :  { %v3648_v54 = vpop.xlane.xlu0 %3647  ;;  %6114 = vmatprep.subr.mxu0 %v6472_v0  ;;  %v4148_v45 = vmul.f32 %v6258_v55, %v8587_v31 }
0x11a8   :  { %6052 = vmatpush3.xpose.msra.mxu1 %v3695_v12  ;;  %6271 = vrcp.f32 %v3648_v54 }
0x11a9   :  { %v4099_v56 = vpop.xlane.xlu1 %4098  ;;  %6053 = vmatprep.subr.mxu1 %v6472_v0  ;;  %v6260_v57 = vpop.eup %6259  ;;  %6273 = vrcp.f32 %v4101_v52 }
0x11aa   :  { %6115 = vmatpush3.xpose.msra.mxu0 %v4149_v42  ;;  %v6262_v59 = vpop.eup %6261  ;;  %v3693_v23 = vmul.f32 %v6260_v57, %v8599_v41 }
0x11ab   :  { %v3646_v58 = vpop.xlane.xlu0 %3645  ;;  %6116 = vmatprep.subr.mxu0 %v6472_v0  ;;  %v4147_v46 = vmul.f32 %v6262_v59, %v8595_v27 }
0x11ac   :  { %6054 = vmatpush3.xpose.msra.mxu1 %v3694_v13  ;;  %6275 = vrcp.f32 %v3646_v58 }
0x11ad   :  { %v4097_v48 = vpop.xlane.xlu1 %4096  ;;  %6055 = vmatprep.subr.mxu1 %v6472_v0  ;;  %v6264_v61 = vpop.eup %6263  ;;  %6277 = vrcp.f32 %v4099_v56 }
0x11ae   :  { %6117 = vmatpush3.xpose.msra.mxu0 %v4148_v45  ;;  %v6266_v63 = vpop.eup %6265  ;;  %v3692_v31 = vmul.f32 %v6264_v61, %v8607_v47 }
0x11af   :  { %v3644_v25 = vpop.xlane.xlu0 %3643  ;;  %6118 = vmatprep.subr.mxu0 %v6472_v0  ;;  %v4146_v41 = vmul.f32 %v6266_v63, %v8603_v29 }
0x11b0   :  { %6056 = vmatpush3.xpose.msra.mxu1 %v3693_v23  ;;  %6279 = vrcp.f32 %v3644_v25 }
0x11b1   :  { %6057 = vmatprep.subr.mxu1 %v6472_v0  ;;  %v6268_v33 = vpop.eup %6267  ;;  %v4095_v2 = vpop.xlane.xlu1 %4094  ;;  %6281 = vrcp.f32 %v4097_v48 }
0x11b2   :  { %6119 = vmatpush3.xpose.msra.mxu0 %v4147_v46  ;;  %v6270_v21 = vpop.eup %6269  ;;  %v3691_v27 = vmul.f32 %v6268_v33, %v8615_v60 }
0x11b3   :  { %v3642_v50 = vpop.xlane.xlu0 %3641  ;;  %6120 = vmatprep.subr.mxu0 %v6472_v0  ;;  %v4145_v47 = vmul.f32 %v6270_v21, %v8611_v20 }
0x11b4   :  { %6058 = vmatpush3.xpose.msra.mxu1 %v3692_v31  ;;  %6283 = vrcp.f32 %v3642_v50 }
0x11b5   :  { %6059 = vmatprep.subr.mxu1 %v6472_v0  ;;  %v6272_v24 = vpop.eup %6271  ;;  %6285 = vrcp.f32 %v4095_v2  ;;  %v4093_v28 = vpop.xlane.xlu1 %4092 }
0x11b6   :  { %6121 = vmatpush3.xpose.msra.mxu0 %v4146_v41  ;;  %v6274_v10 = vpop.eup %6273  ;;  %v3690_v29 = vmul.f32 %v6272_v24, %v8622_v1 }
0x11b7   :  { %v3640_v26 = vpop.xlane.xlu0 %3639  ;;  %6122 = vmatprep.subr.mxu0 %v6472_v0  ;;  %v4144_v60 = vmul.f32 %v6274_v10, %v8618_v62 }
0x11b8   :  { %6060 = vmatpush3.xpose.msra.mxu1 %v3691_v27  ;;  %6287 = vrcp.f32 %v3640_v26 }
0x11b9   :  { %6061 = vmatprep.subr.mxu1 %v6472_v0  ;;  %v6276_v8 = vpop.eup %6275  ;;  %6289 = vrcp.f32 %v4093_v28 }
0x11ba   :  { %6123 = vmatpush3.xpose.msra.mxu0 %v4145_v47  ;;  %v6278_v18 = vpop.eup %6277  ;;  %v3689_v20 = vmul.f32 %v6276_v8, %v8628_v3 }
0x11bb   :  { %v3638_v38 = vpop.xlane.xlu0 %3637  ;;  %6124 = vmatprep.subr.mxu0 %v6472_v0  ;;  %v4143_v1 = vmul.f32 %v6278_v18, %v8625_v49 }
0x11bc   :  { %6062 = vmatpush3.xpose.msra.mxu1 %v3690_v29  ;;  %6291 = vrcp.f32 %v3638_v38 }
0x11bd   :  { %6063 = vmatprep.subr.mxu1 %v6472_v0  ;;  %v6280_v37 = vpop.eup %6279 }
0x11be   :  { %6125 = vmatpush3.xpose.msra.mxu0 %v4144_v60  ;;  %v6282_v5 = vpop.eup %6281  ;;  %v3688_v32 = vmul.f32 %v6280_v37, %v8634_v16 }
0x11bf   :  { %6126 = vmatprep.subr.mxu0 %v6472_v0  ;;  %v4142_v9 = vmul.f32 %v6282_v5, %v8631_v4  ;;  %v3185_v4 = vpop.permute.xlu1 %3184 }
0x11c0   :  { %6064 = vmatpush3.xpose.msra.mxu1 %v3689_v20 }
0x11c1   :  { %6065 = vmatprep.subr.mxu1 %v6472_v0  ;;  %v6284_v62 = vpop.eup %6283 }
0x11c2   :  { %6127 = vmatpush3.xpose.msra.mxu0 %v4143_v1  ;;  %v6286_v30 = vpop.eup %6285  ;;  %v3687_v3 = vmul.f32 %v6284_v62, %v8640_v44 }
0x11c3   :  { %6128 = vmatprep.subr.mxu0 %v6472_v0  ;;  %v4141_v49 = vmul.f32 %v6286_v30, %v8637_v36  ;;  %v3180_v44 = vpop.permute.xlu0 %3179  ;;  %v3297_v36 = vadd.f32 %v8366_v14, %v3185_v4  ;;  %v4227_v14 = vld [vmem:[%s8801_s1 + $0x8] sm:$0xff] }
0x11c4   :  { %6066 = vmatpush3.xpose.msra.mxu1 %v3688_v32  ;;  %v3292_v39 = vadd.f32 %v8368_v15, %v3180_v44  ;;  %v4233_v15 = vpop.permute.xlu1 %4232 }
0x11c5   :  { %6067 = vmatprep.subr.mxu1 %v6472_v0  ;;  %v6288_v34 = vpop.eup %6287 }
0x11c6   :  { %6129 = vmatpush3.xpose.msra.mxu0 %v4142_v9  ;;  %v6290_v17 = vpop.eup %6289  ;;  %v3686_v16 = vmul.f32 %v6288_v34, %v8646_v19  ;;  %v4226_v19 = vld [vmem:[%s8801_s1] sm:$0xff] }
0x11c7   :  { %6130 = vmatprep.subr.mxu0 %v6472_v0  ;;  %v4140_v35 = vmul.f32 %v6290_v17, %v8643_v6 }
0x11c8   :  { %6068 = vmatpush3.xpose.msra.mxu1 %v3687_v3  ;;  %v4238_v52 = vpop.permute.xlu1 %4237 }
0x11c9   :  { %6069 = vmatprep.subr.mxu1 %v6472_v0  ;;  %v6292_v40 = vpop.eup %6291 }
0x11ca   :  { %6131 = vmatpush3.xpose.msra.mxu0 %v4141_v49  ;;  %v3685_v43 = vmul.f32 %v6292_v40, %v8649_v7 }
0x11cb   :  { %6132 = vmatprep.subr.mxu0 %v6472_v0 }
0x11cc   :  { %6070 = vmatpush3.xpose.msra.mxu1 %v3686_v16 }
0x11cd   :  { %6071 = vmatprep.subr.mxu1 %v6472_v0 }
0x11ce   :  { %6133 = vmatpush3.xpose.msra.mxu0 %v4140_v35 }
0x11d0   :  { %6072 = vmatpush3.xpose.msra.mxu1 %v3685_v43 }
0x11d1   :  { %6135 = vmatmul.mubr.f32.vlgmr.msra.gmra.mxu0 %v3297_v36 }
0x11d3   :  { %6074 = vmatmul.mubr.f32.vlgmr.msra.gmra.mxu1 %v3292_v39 }
0x11d4   :  { %6141 = vmatprep.mubr.msk.f32.mxu1 %vm1491_vm4, %v4226_v19 }
0x1291   :  { %v4222_v6 = vpop.f32.mrf.mxu0 }
0x1292   :  { %6137 = vmatprep.subr.mxu1 %v4222_v6 }
0x1293   :  { %v3767_v0 = vpop.f32.mrf.mxu1  ;;  %v6136_v51 = vpop.f32.mrf.mxu0  ;;  %6138 = vmatpush3.msra.mxu1 %v4222_v6 }
0x1294   :  { %6139 = vmatprep.subr.mxu1 %v3767_v0 }
0x1295   :  { %v6075_v7 = vpop.f32.mrf.mxu1  ;;  %6140 = vmatpush3.msra.mxu1 %v3767_v0 }
0x1296   :  { %6142 = vmatmul.mubr.msk.f32.vlgmr.msra.gmra.mxu1 %vm1491_vm4, %v4227_v14 }
0x1356   :  { %v6143_v12 = vpop.f32.mrf.mxu1 }
0x1357   :  { %v4318_v53 = vadd.f32 %v6143_v12, %v4238_v52 }
0x1358   :  { %v4312_v54 = vpop.f32.mrf.mxu1 }
0x1359   :  { %v4322_v42 = vadd.f32 %v4318_v53, %v8258_v11  ;;  %v4313_v55 = vadd.f32 %v4312_v54, %v4233_v15 }
0x135b   :  { %v4324_v56 = vmul.f32 0.70710677, %v4322_v42  ;;  %v4321_v13 = vadd.f32 %v4313_v55, %v8255_v22 }
0x135d   :  { %4326 = vst [vmem:[%s8802_s15 + $0x8] sm:$0xff] %v4324_v56  ;;  %v4323_v57 = vmul.f32 0.70710677, %v4321_v13 }
0x135f   :  { %4325 = vst [vmem:[%s8802_s15] sm:$0xff] %v4323_v57 }

</bundles_post_ra>
